<compile_context>
chip_gen: v5e
topology: v5e:2x2
jax: 0.10.0
libtpu: 0.0.40
codegen_flags: <defaults>
</compile_context>

<pallas_src>
import functools

import jax
import jax.numpy as jnp
import numpy as np
from jax.experimental import pallas as pl
from jax.experimental.pallas import tpu as pltpu

STYLE_LAYERS = [0, 2, 5, 7, 10]
STYLE_WEIGHTS = [0.2, 0.2, 0.2, 0.2, 0.2]

# Safe on v5e/v6e (128 MiB VMEM) and v7x (64 MiB physical / 32 MiB scoped).
_VMEM_LIMIT = 32 * 1024 * 1024


# ---------------------------- Pallas kernels ----------------------------

def _conv_mm_kernel(p_ref, w_ref, b_ref, o_ref, acc_ref):
    """Conv-as-matmul with lane-dense output; K-reduction on grid axis 2.

    p_ref:   [1, tk, thw]   bf16 im2col patches (HW on the lane axis)
    w_ref:   [Cout, tk]     bf16 weights
    b_ref:   [Cout, 1]      f32 bias (read only in the finalize step)
    o_ref:   [1, Cout, thw] f32 conv+bias+ReLU output (lane-dense)
    acc_ref: [Cout, thw]    f32 VMEM accumulator
    """
    k_i = pl.program_id(2)

    @pl.when(k_i == 0)
    def _():
        acc_ref[...] = jnp.zeros_like(acc_ref)

    # [Cout, tk] @ [tk, thw] -> [Cout, thw], bf16 in / f32 accumulate on the MXU.
    acc_ref[...] += jnp.dot(w_ref[...], p_ref[0],
                            preferred_element_type=jnp.float32)

    @pl.when(k_i == pl.num_programs(2) - 1)
    def _():
        o_ref[0] = jnp.maximum(acc_ref[...] + b_ref[...], 0.0)


def _gram_mse_kernel(f_ref, o_ref, gs_ref, gt_ref, *, mse_scale):
    """Fused Gram(source), Gram(target) and their MSE; HW-reduction on grid axis 0.

    f_ref:   [2, C, thw] bf16 (source, target) feature tile
    o_ref:   [1, 1]      f32 scalar MSE (SMEM)
    gs_ref / gt_ref: [C, C] f32 Gram accumulators
    """
    j = pl.program_id(0)

    @pl.when(j == 0)
    def _():
        gs_ref[...] = jnp.zeros_like(gs_ref)
        gt_ref[...] = jnp.zeros_like(gt_ref)

    # Contract the last (HW) dim of both operands -> F F^T without any explicit .T
    dn = (((1,), (1,)), ((), ()))
    fs = f_ref[0]
    ft = f_ref[1]
    gs_ref[...] += jax.lax.dot_general(fs, fs, dn,
                                       preferred_element_type=jnp.float32)
    gt_ref[...] += jax.lax.dot_general(ft, ft, dn,
                                       preferred_element_type=jnp.float32)

    @pl.when(j == pl.num_programs(0) - 1)
    def _():
        d = gs_ref[...] - gt_ref[...]
        o_ref[0, 0] = mse_scale * jnp.sum(d * d)


# ---------------------------- wrappers ----------------------------

def _pick_k_tile(k):
    """Largest multiple-of-128 divisor of k that is <= 512, else the full k."""
    for cand in (512, 384, 256, 128):
        if k % cand == 0:
            return cand
    return k


def conv3x3_relu(x, w, b):
    """x: [B, Cin, H, W]; w: [Cout, Cin, 3, 3]; b: [Cout] -> [B, Cout, H, W]."""
    bsz, cin, h, wd = x.shape
    cout = w.shape[0]
    hw = h * wd
    k = cin * 9

    xp = jnp.pad(x, ((0, 0), (0, 0), (1, 1), (1, 1)))
    # im2col with HW as the (lane) minor dim; (cin, ki, kj) ordering matches
    # PyTorch's weight.reshape(Cout, Cin*9). No transpose anywhere.
    cols = [xp[:, :, ki:ki + h, kj:kj + wd] for ki in range(3) for kj in range(3)]
    patches = jnp.stack(cols, axis=2).reshape(bsz, k, hw).astype(jnp.bfloat16)
    wmat = w.reshape(cout, k).astype(jnp.bfloat16)
    bcol = b.reshape(cout, 1).astype(jnp.float32)

    thw = 128 if hw % 128 == 0 else hw
    tk = _pick_k_tile(k)
    grid = (bsz, hw // thw, k // tk)

    cost = pl.CostEstimate(
        flops=2 * bsz * hw * k * cout,
        transcendentals=0,
        bytes_accessed=patches.size * 2 + wmat.size * 2 + cout * 4
        + bsz * cout * hw * 4,
    )

    out = pl.pallas_call(
        _conv_mm_kernel,
        out_shape=jax.ShapeDtypeStruct((bsz, cout, hw), jnp.float32),
        grid_spec=pltpu.PrefetchScalarGridSpec(
            num_scalar_prefetch=0,
            grid=grid,
            in_specs=[
                pl.BlockSpec((1, tk, thw), lambda b_i, j_i, k_i: (b_i, k_i, j_i)),
                pl.BlockSpec((cout, tk), lambda b_i, j_i, k_i: (0, k_i)),
                pl.BlockSpec((cout, 1), lambda b_i, j_i, k_i: (0, 0)),
            ],
            out_specs=pl.BlockSpec((1, cout, thw),
                                   lambda b_i, j_i, k_i: (b_i, 0, j_i)),
            scratch_shapes=[pltpu.VMEM((cout, thw), jnp.float32)],
        ),
        compiler_params=pltpu.CompilerParams(
            dimension_semantics=("parallel", "parallel", "arbitrary"),
            vmem_limit_bytes=_VMEM_LIMIT,
        ),
        cost_estimate=cost,
    )(patches, wmat, bcol)
    # Lane-dense [B, Cout, HW] -> [B, Cout, H, W]: contiguous reshape, no transpose.
    return out.reshape(bsz, cout, h, wd)


def maxpool2x2(x):
    """x: [B, C, H, W] -> [B, C, H//2, W//2]; single fused XLA reshape+max.

    Kept out of Pallas on purpose (perf review: fuse the pool into the next
    stage's input) — one read of x and a quarter-size write, no extra launch,
    no 4 strided HBM copies.
    """
    b, c, h, w = x.shape
    return x.reshape(b, c, h // 2, 2, w // 2, 2).max(axis=(3, 5))


def gram_mse(f, scale):
    """f: [2, C, HW] (source & target features). MSE of the scaled Gram matrices."""
    _, c, hw = f.shape
    thw = 128 if hw % 128 == 0 else hw
    n_hw = hw // thw
    # MSE(scale*Gs, scale*Gt) = scale^2 / C^2 * sum((Gs - Gt)^2)
    mse_scale = float(scale * scale / (c * c))
    f = f.astype(jnp.bfloat16)

    kernel = functools.partial(_gram_mse_kernel, mse_scale=mse_scale)
    cost = pl.CostEstimate(
        flops=2 * 2 * c * c * hw,
        transcendentals=0,
        bytes_accessed=f.size * 2 + 4,
    )

    out = pl.pallas_call(
        kernel,
        out_shape=jax.ShapeDtypeStruct((1, 1), jnp.float32),
        grid_spec=pltpu.PrefetchScalarGridSpec(
            num_scalar_prefetch=0,
            grid=(n_hw,),
            in_specs=[pl.BlockSpec((2, c, thw), lambda j: (0, 0, j))],
            out_specs=pl.BlockSpec((1, 1), lambda j: (0, 0),
                                   memory_space=pltpu.MemorySpace.SMEM),
            scratch_shapes=[pltpu.VMEM((c, c), jnp.float32),
                            pltpu.VMEM((c, c), jnp.float32)],
        ),
        compiler_params=pltpu.CompilerParams(
            dimension_semantics=("arbitrary",),
            vmem_limit_bytes=_VMEM_LIMIT,
        ),
        cost_estimate=cost,
    )(f)
    return out[0, 0]


def vgg_prefix_features(x, params):
    """x: [2, 3, H, W] (source & target batched) -> features at style boundaries."""
    feats = {0: x}                                   # layers[0:0] == identity
    h = conv3x3_relu(x, params["w0"], params["b0"])  # layers 0, 1
    feats[2] = h
    h = conv3x3_relu(h, params["w2"], params["b2"])  # layers 2, 3
    h = maxpool2x2(h)                                # layer 4
    feats[5] = h
    h = conv3x3_relu(h, params["w5"], params["b5"])  # layers 5, 6
    feats[7] = h
    h = conv3x3_relu(h, params["w7"], params["b7"])  # layers 7, 8
    h = maxpool2x2(h)                                # layer 9
    feats[10] = h
    return feats


def style_loss(source, target, params):
    """source, target: [1, 3, H, W] (NCHW, N must be 1)."""
    assert source.shape[0] == 1 and target.shape[0] == 1
    x = jnp.concatenate([source, target], axis=0)    # one batched VGG pass
    feats = vgg_prefix_features(x, params)
    loss = jnp.float32(0.0)
    for layer, weight in zip(STYLE_LAYERS, STYLE_WEIGHTS):
        f = feats[layer]
        _, c, h, w = f.shape
        # get_feature_map divides by 2 -> Gram of (F/2) = 0.25 * F F^T; then /(n*c*h*w)
        scale = 0.25 / float(c * h * w)
        if c < 8:
            # Layer 0: a 3x3 Gram is trivial VPU work; a pallas_call here is
            # pure launch overhead, so compute it in plain JAX.
            f2 = f.reshape(2, c, h * w)
            g = jnp.einsum("bci,bdi->bcd", f2, f2) * scale
            l = jnp.mean((g[0] - g[1]) ** 2)
        else:
            l = gram_mse(f.reshape(2, c, h * w), scale)
        loss = loss + weight * l
    return loss


# ---------------------------- pure-JAX reference ----------------------------

def _conv_relu_ref(x, w, b):
    y = jax.lax.conv_general_dilated(
        x[None], w, window_strides=(1, 1), padding=((1, 1), (1, 1)),
        dimension_numbers=("NCHW", "OIHW", "NCHW"))[0]
    return jnp.maximum(y + b[:, None, None], 0.0)


def _maxpool_ref(x):
    c, h, w = x.shape
    return x.reshape(c, h // 2, 2, w // 2, 2).max(axis=(2, 4))


def _features_ref(x, params):
    feats = {0: x}
    h = _conv_relu_ref(x, params["w0"], params["b0"])
    feats[2] = h
    h = _conv_relu_ref(h, params["w2"], params["b2"])
    h = _maxpool_ref(h)
    feats[5] = h
    h = _conv_relu_ref(h, params["w5"], params["b5"])
    feats[7] = h
    h = _conv_relu_ref(h, params["w7"], params["b7"])
    h = _maxpool_ref(h)
    feats[10] = h
    return feats


def style_loss_ref(source, target, params):
    fs = _features_ref(source[0], params)
    ft = _features_ref(target[0], params)
    loss = jnp.float32(0.0)
    for layer, weight in zip(STYLE_LAYERS, STYLE_WEIGHTS):
        s_f, t_f = fs[layer], ft[layer]
        c, h, w = s_f.shape
        gs = (s_f.reshape(c, h * w) / 2.0) @ (s_f.reshape(c, h * w) / 2.0).T / (c * h * w)
        gt = (t_f.reshape(c, h * w) / 2.0) @ (t_f.reshape(c, h * w) / 2.0).T / (c * h * w)
        loss = loss + weight * jnp.mean((gs - gt) ** 2)
    return loss


# ---------------------------- main ----------------------------

def _init_conv(key, cout, cin):
    kw, kb = jax.random.split(key)
    std = (2.0 / (cin * 9)) ** 0.5
    w = jax.random.normal(kw, (cout, cin, 3, 3), jnp.float32) * std
    b = jax.random.normal(kb, (cout,), jnp.float32) * 0.05
    return w, b


if __name__ == "__main__":
    key = jax.random.PRNGKey(0)
    k_src, k_tgt, k0, k2, k5, k7 = jax.random.split(key, 6)

    N, C, H, W = 1, 3, 16, 16
    source = jax.random.normal(k_src, (N, C, H, W), jnp.float32)
    target = jax.random.normal(k_tgt, (N, C, H, W), jnp.float32)

    w0, b0 = _init_conv(k0, 64, 3)      # VGG19.features[0]
    w2, b2 = _init_conv(k2, 64, 64)     # VGG19.features[2]
    w5, b5 = _init_conv(k5, 128, 64)    # VGG19.features[5]
    w7, b7 = _init_conv(k7, 128, 128)   # VGG19.features[7]
    params = {"w0": w0, "b0": b0, "w2": w2, "b2": b2,
              "w5": w5, "b5": b5, "w7": w7, "b7": b7}

    loss = jax.jit(style_loss)(source, target, params)
    loss = jax.block_until_ready(loss)

    ref = style_loss_ref(source, target, params)
    # bf16 MXU inputs (f32 accumulate) introduce ~1e-2 relative error on the
    # small deep-layer terms; well within the tolerance.
    np.testing.assert_allclose(np.asarray(loss), np.asarray(ref), rtol=5e-2, atol=1e-8)

    print("KERNEL_OK")
</pallas_src>

<mosaic_0001>
module attributes {stable_mosaic.version = 11 : i64} {
  func.func @_conv_mm_kernel(%arg0: i32, %arg1: i32, %arg2: i32, %arg3: memref<1x27x128xbf16, #tpu.memory_space<vmem>>, %arg4: memref<64x27xbf16, #tpu.memory_space<vmem>>, %arg5: memref<64x1xf32, #tpu.memory_space<vmem>>, %arg6: memref<1x64x128xf32, #tpu.memory_space<vmem>>, %arg7: memref<64x128xf32, #tpu.memory_space<vmem>>) attributes {dimension_semantics = [#tpu.dimension_semantics<parallel>, #tpu.dimension_semantics<parallel>, #tpu.dimension_semantics<arbitrary>], iteration_bounds = array<i64: 2, 2, 1>, scalar_prefetch = 0 : i64, scratch_operands = 1 : i64, tpu.core_type = #tpu.core_type<tc>, window_params = [{transform_indices = @transform_0, window_bounds = array<i64: 1, 27, 128>}, {transform_indices = @transform_1, window_bounds = array<i64: 64, 27>}, {pipeline_mode = #tpu.pipeline_mode<synchronous>, transform_indices = @transform_2, window_bounds = array<i64: 64, 1>}, {transform_indices = @transform_3, window_bounds = array<i64: 1, 64, 128>}]} {
    %c0_i32 = arith.constant 0 : i32
    %0 = arith.cmpi eq, %arg2, %c0_i32 : i32
    %1 = arith.extui %0 : i1 to i32
    %c0_i32_0 = arith.constant 0 : i32
    %2 = arith.cmpi ne, %1, %c0_i32_0 : i32
    scf.if %2 {
      %cst_11 = arith.constant 0.000000e+00 : f32
      %13 = vector.broadcast %cst_11 : f32 to vector<64x128xf32>
      %c0_12 = arith.constant 0 : index
      %c0_13 = arith.constant 0 : index
      %14 = vector.load %arg7[%c0_12, %c0_13] : memref<64x128xf32, #tpu.memory_space<vmem>>, vector<64x128xf32>
      tpu.vector_store %arg7[%c0_12, %c0_13], %13 {strides = array<i32>} : memref<64x128xf32, #tpu.memory_space<vmem>>, vector<64x128xf32>,
    } else {
    }
    %c0 = arith.constant 0 : index
    %c0_1 = arith.constant 0 : index
    %3 = vector.load %arg7[%c0, %c0_1] : memref<64x128xf32, #tpu.memory_space<vmem>>, vector<64x128xf32>
    %c0_2 = arith.constant 0 : index
    %c0_3 = arith.constant 0 : index
    %4 = vector.load %arg4[%c0_2, %c0_3] : memref<64x27xbf16, #tpu.memory_space<vmem>>, vector<64x27xbf16>
    %c0_4 = arith.constant 0 : index
    %c0_5 = arith.constant 0 : index
    %c0_6 = arith.constant 0 : index
    %5 = vector.load %arg3[%c0_4, %c0_5, %c0_6] : memref<1x27x128xbf16, #tpu.memory_space<vmem>>, vector<1x27x128xbf16>
    %6 = vector.shape_cast %5 : vector<1x27x128xbf16> to vector<27x128xbf16>
    %cst = arith.constant dense<0.000000e+00> : vector<64x128xf32>
    %7 = tpu.matmul %4, %6, %cst {dimension_numbers = #tpu.dot_dimension_numbers<[1], [0], [0], [1], [0, 0, 1, 1], [], []>} : vector<64x27xbf16>, vector<27x128xbf16>, vector<64x128xf32> -> vector<64x128xf32>
    %8 = arith.addf %3, %7 : vector<64x128xf32>
    %c0_7 = arith.constant 0 : index
    %c0_8 = arith.constant 0 : index
    %9 = vector.load %arg7[%c0_7, %c0_8] : memref<64x128xf32, #tpu.memory_space<vmem>>, vector<64x128xf32>
    tpu.vector_store %arg7[%c0_7, %c0_8], %8 {strides = array<i32>} : memref<64x128xf32, #tpu.memory_space<vmem>>, vector<64x128xf32>,
    %c0_i32_9 = arith.constant 0 : i32
    %10 = arith.cmpi eq, %arg2, %c0_i32_9 : i32
    %11 = arith.extui %10 : i1 to i32
    %c0_i32_10 = arith.constant 0 : i32
    %12 = arith.cmpi ne, %11, %c0_i32_10 : i32
    scf.if %12 {
      %c0_11 = arith.constant 0 : index
      %c0_12 = arith.constant 0 : index
      %13 = vector.load %arg7[%c0_11, %c0_12] : memref<64x128xf32, #tpu.memory_space<vmem>>, vector<64x128xf32>
      %c0_13 = arith.constant 0 : index
      %c0_14 = arith.constant 0 : index
      %14 = vector.load %arg5[%c0_13, %c0_14] : memref<64x1xf32, #tpu.memory_space<vmem>>, vector<64x1xf32>
      %15 = vector.broadcast %14 : vector<64x1xf32> to vector<64x128xf32>
      %16 = arith.addf %13, %15 : vector<64x128xf32>
      %cst_15 = arith.constant 0.000000e+00 : f32
      %17 = vector.broadcast %cst_15 : f32 to vector<64x128xf32>
      %18 = arith.maximumf %16, %17 : vector<64x128xf32>
      %c0_16 = arith.constant 0 : index
      %c0_17 = arith.constant 0 : index
      %c0_18 = arith.constant 0 : index
      %19 = vector.load %arg6[%c0_16, %c0_17, %c0_18] : memref<1x64x128xf32, #tpu.memory_space<vmem>>, vector<1x64x128xf32>
      %20 = vector.shape_cast %19 : vector<1x64x128xf32> to vector<64x128xf32>
      %21 = vector.shape_cast %18 : vector<64x128xf32> to vector<1x64x128xf32>
      tpu.vector_store %arg6[%c0_16, %c0_17, %c0_18], %21 {strides = array<i32>} : memref<1x64x128xf32, #tpu.memory_space<vmem>>, vector<1x64x128xf32>,
    } else {
    }
    return
  }
  func.func @transform_0(%arg0: i32, %arg1: i32, %arg2: i32) -> (i32, i32, i32) {
    %c0_i32 = arith.constant 0 : i32
    return %arg0, %arg2, %arg1 : i32, i32, i32
  }
  func.func @transform_1(%arg0: i32, %arg1: i32, %arg2: i32) -> (i32, i32) {
    %c0_i32 = arith.constant 0 : i32
    %c0_i32_0 = arith.constant 0 : i32
    return %c0_i32, %arg2 : i32, i32
  }
  func.func @transform_2(%arg0: i32, %arg1: i32, %arg2: i32) -> (i32, i32) {
    %c0_i32 = arith.constant 0 : i32
    %c0_i32_0 = arith.constant 0 : i32
    %c0_i32_1 = arith.constant 0 : i32
    return %c0_i32, %c0_i32_0 : i32, i32
  }
  func.func @transform_3(%arg0: i32, %arg1: i32, %arg2: i32) -> (i32, i32, i32) {
    %c0_i32 = arith.constant 0 : i32
    %c0_i32_0 = arith.constant 0 : i32
    return %arg0, %c0_i32, %arg1 : i32, i32, i32
  }
}

module attributes {stable_mosaic.version = 11 : i64} {
  func.func @_gram_mse_kernel(%arg0: i32, %arg1: memref<2x64x128xbf16, #tpu.memory_space<vmem>>, %arg2: memref<1x1xf32, #tpu.memory_space<smem>>, %arg3: memref<64x64xf32, #tpu.memory_space<vmem>>, %arg4: memref<64x64xf32, #tpu.memory_space<vmem>>) attributes {dimension_semantics = [#tpu.dimension_semantics<arbitrary>], iteration_bounds = array<i64: 2>, scalar_prefetch = 0 : i64, scratch_operands = 2 : i64, tpu.core_type = #tpu.core_type<tc>, window_params = [{transform_indices = @transform_0, window_bounds = array<i64: 2, 64, 128>}, {transform_indices = @transform_1, window_bounds = array<i64: 1, 1>}]} {
    %c0_i32 = arith.constant 0 : i32
    %0 = arith.cmpi eq, %arg0, %c0_i32 : i32
    %1 = arith.extui %0 : i1 to i32
    %c0_i32_0 = arith.constant 0 : i32
    %2 = arith.cmpi ne, %1, %c0_i32_0 : i32
    scf.if %2 {
      %cst_15 = arith.constant 0.000000e+00 : f32
      %18 = vector.broadcast %cst_15 : f32 to vector<64x64xf32>
      %c0_16 = arith.constant 0 : index
      %c0_17 = arith.constant 0 : index
      %19 = vector.load %arg3[%c0_16, %c0_17] : memref<64x64xf32, #tpu.memory_space<vmem>>, vector<64x64xf32>
      tpu.vector_store %arg3[%c0_16, %c0_17], %18 {strides = array<i32>} : memref<64x64xf32, #tpu.memory_space<vmem>>, vector<64x64xf32>,
      %cst_18 = arith.constant 0.000000e+00 : f32
      %20 = vector.broadcast %cst_18 : f32 to vector<64x64xf32>
      %c0_19 = arith.constant 0 : index
      %c0_20 = arith.constant 0 : index
      %21 = vector.load %arg4[%c0_19, %c0_20] : memref<64x64xf32, #tpu.memory_space<vmem>>, vector<64x64xf32>
      tpu.vector_store %arg4[%c0_19, %c0_20], %20 {strides = array<i32>} : memref<64x64xf32, #tpu.memory_space<vmem>>, vector<64x64xf32>,
    } else {
    }
    %c0 = arith.constant 0 : index
    %c0_1 = arith.constant 0 : index
    %c0_2 = arith.constant 0 : index
    %3 = vector.load %arg1[%c0, %c0_1, %c0_2] : memref<2x64x128xbf16, #tpu.memory_space<vmem>>, vector<1x64x128xbf16>
    %4 = vector.shape_cast %3 : vector<1x64x128xbf16> to vector<64x128xbf16>
    %c1 = arith.constant 1 : index
    %c0_3 = arith.constant 0 : index
    %c0_4 = arith.constant 0 : index
    %5 = vector.load %arg1[%c1, %c0_3, %c0_4] : memref<2x64x128xbf16, #tpu.memory_space<vmem>>, vector<1x64x128xbf16>
    %6 = vector.shape_cast %5 : vector<1x64x128xbf16> to vector<64x128xbf16>
    %c0_5 = arith.constant 0 : index
    %c0_6 = arith.constant 0 : index
    %7 = vector.load %arg3[%c0_5, %c0_6] : memref<64x64xf32, #tpu.memory_space<vmem>>, vector<64x64xf32>
    %cst = arith.constant dense<0.000000e+00> : vector<64x64xf32>
    %8 = tpu.matmul %4, %4, %cst {dimension_numbers = #tpu.dot_dimension_numbers<[1], [1], [0], [0], [0, 0, 1, 0], [], []>} : vector<64x128xbf16>, vector<64x128xbf16>, vector<64x64xf32> -> vector<64x64xf32>
    %9 = arith.addf %7, %8 : vector<64x64xf32>
    %c0_7 = arith.constant 0 : index
    %c0_8 = arith.constant 0 : index
    %10 = vector.load %arg3[%c0_7, %c0_8] : memref<64x64xf32, #tpu.memory_space<vmem>>, vector<64x64xf32>
    tpu.vector_store %arg3[%c0_7, %c0_8], %9 {strides = array<i32>} : memref<64x64xf32, #tpu.memory_space<vmem>>, vector<64x64xf32>,
    %c0_9 = arith.constant 0 : index
    %c0_10 = arith.constant 0 : index
    %11 = vector.load %arg4[%c0_9, %c0_10] : memref<64x64xf32, #tpu.memory_space<vmem>>, vector<64x64xf32>
    %cst_11 = arith.constant dense<0.000000e+00> : vector<64x64xf32>
    %12 = tpu.matmul %6, %6, %cst_11 {dimension_numbers = #tpu.dot_dimension_numbers<[1], [1], [0], [0], [0, 0, 1, 0], [], []>} : vector<64x128xbf16>, vector<64x128xbf16>, vector<64x64xf32> -> vector<64x64xf32>
    %13 = arith.addf %11, %12 : vector<64x64xf32>
    %c0_12 = arith.constant 0 : index
    %c0_13 = arith.constant 0 : index
    %14 = vector.load %arg4[%c0_12, %c0_13] : memref<64x64xf32, #tpu.memory_space<vmem>>, vector<64x64xf32>
    tpu.vector_store %arg4[%c0_12, %c0_13], %13 {strides = array<i32>} : memref<64x64xf32, #tpu.memory_space<vmem>>, vector<64x64xf32>,
    %c1_i32 = arith.constant 1 : i32
    %15 = arith.cmpi eq, %arg0, %c1_i32 : i32
    %16 = arith.extui %15 : i1 to i32
    %c0_i32_14 = arith.constant 0 : i32
    %17 = arith.cmpi ne, %16, %c0_i32_14 : i32
    scf.if %17 {
      %c0_15 = arith.constant 0 : index
      %c0_16 = arith.constant 0 : index
      %18 = vector.load %arg3[%c0_15, %c0_16] : memref<64x64xf32, #tpu.memory_space<vmem>>, vector<64x64xf32>
      %c0_17 = arith.constant 0 : index
      %c0_18 = arith.constant 0 : index
      %19 = vector.load %arg4[%c0_17, %c0_18] : memref<64x64xf32, #tpu.memory_space<vmem>>, vector<64x64xf32>
      %20 = arith.subf %18, %19 : vector<64x64xf32>
      %21 = arith.mulf %20, %20 : vector<64x64xf32>
      %22 = vector.shape_cast %21 : vector<64x64xf32> to vector<1x64x64xf32>
      %cst_19 = arith.constant dense<0.000000e+00> : vector<1xf32>
      %23 = vector.multi_reduction <add>, %22, %cst_19 [1, 2] : vector<1x64x64xf32> to vector<1xf32>
      %24 = vector.shape_cast %23 : vector<1xf32> to vector<1x1x1xf32>
      %25 = vector.extract %24[0, 0, 0] : f32 from vector<1x1x1xf32>
      %cst_20 = arith.constant 5.68434189E-14 : f32
      %26 = arith.mulf %cst_20, %25 : f32
      %c0_21 = arith.constant 0 : index
      %c0_22 = arith.constant 0 : index
      %27 = memref.load %arg2[%c0_21, %c0_22] : memref<1x1xf32, #tpu.memory_space<smem>>
      memref.store %26, %arg2[%c0_21, %c0_22] : memref<1x1xf32, #tpu.memory_space<smem>>
    } else {
    }
    return
  }
  func.func @transform_0(%arg0: i32) -> (i32, i32, i32) {
    %c0_i32 = arith.constant 0 : i32
    %c0_i32_0 = arith.constant 0 : i32
    %c0_i32_1 = arith.constant 0 : i32
    return %c0_i32, %c0_i32_0, %arg0 : i32, i32, i32
  }
  func.func @transform_1(%arg0: i32) -> (i32, i32) {
    %c0_i32 = arith.constant 0 : i32
    %c0_i32_0 = arith.constant 0 : i32
    %c0_i32_1 = arith.constant 0 : i32
    return %c0_i32, %c0_i32_0 : i32, i32
  }
}

module attributes {stable_mosaic.version = 11 : i64} {
  func.func @_conv_mm_kernel(%arg0: i32, %arg1: i32, %arg2: i32, %arg3: memref<1x576x128xbf16, #tpu.memory_space<vmem>>, %arg4: memref<64x576xbf16, #tpu.memory_space<vmem>>, %arg5: memref<64x1xf32, #tpu.memory_space<vmem>>, %arg6: memref<1x64x128xf32, #tpu.memory_space<vmem>>, %arg7: memref<64x128xf32, #tpu.memory_space<vmem>>) attributes {dimension_semantics = [#tpu.dimension_semantics<parallel>, #tpu.dimension_semantics<parallel>, #tpu.dimension_semantics<arbitrary>], iteration_bounds = array<i64: 2, 2, 1>, scalar_prefetch = 0 : i64, scratch_operands = 1 : i64, tpu.core_type = #tpu.core_type<tc>, window_params = [{transform_indices = @transform_0, window_bounds = array<i64: 1, 576, 128>}, {transform_indices = @transform_1, window_bounds = array<i64: 64, 576>}, {pipeline_mode = #tpu.pipeline_mode<synchronous>, transform_indices = @transform_2, window_bounds = array<i64: 64, 1>}, {transform_indices = @transform_3, window_bounds = array<i64: 1, 64, 128>}]} {
    %c0_i32 = arith.constant 0 : i32
    %0 = arith.cmpi eq, %arg2, %c0_i32 : i32
    %1 = arith.extui %0 : i1 to i32
    %c0_i32_0 = arith.constant 0 : i32
    %2 = arith.cmpi ne, %1, %c0_i32_0 : i32
    scf.if %2 {
      %cst_11 = arith.constant 0.000000e+00 : f32
      %13 = vector.broadcast %cst_11 : f32 to vector<64x128xf32>
      %c0_12 = arith.constant 0 : index
      %c0_13 = arith.constant 0 : index
      %14 = vector.load %arg7[%c0_12, %c0_13] : memref<64x128xf32, #tpu.memory_space<vmem>>, vector<64x128xf32>
      tpu.vector_store %arg7[%c0_12, %c0_13], %13 {strides = array<i32>} : memref<64x128xf32, #tpu.memory_space<vmem>>, vector<64x128xf32>,
    } else {
    }
    %c0 = arith.constant 0 : index
    %c0_1 = arith.constant 0 : index
    %3 = vector.load %arg7[%c0, %c0_1] : memref<64x128xf32, #tpu.memory_space<vmem>>, vector<64x128xf32>
    %c0_2 = arith.constant 0 : index
    %c0_3 = arith.constant 0 : index
    %4 = vector.load %arg4[%c0_2, %c0_3] : memref<64x576xbf16, #tpu.memory_space<vmem>>, vector<64x576xbf16>
    %c0_4 = arith.constant 0 : index
    %c0_5 = arith.constant 0 : index
    %c0_6 = arith.constant 0 : index
    %5 = vector.load %arg3[%c0_4, %c0_5, %c0_6] : memref<1x576x128xbf16, #tpu.memory_space<vmem>>, vector<1x576x128xbf16>
    %6 = vector.shape_cast %5 : vector<1x576x128xbf16> to vector<576x128xbf16>
    %cst = arith.constant dense<0.000000e+00> : vector<64x128xf32>
    %7 = tpu.matmul %4, %6, %cst {dimension_numbers = #tpu.dot_dimension_numbers<[1], [0], [0], [1], [0, 0, 1, 1], [], []>} : vector<64x576xbf16>, vector<576x128xbf16>, vector<64x128xf32> -> vector<64x128xf32>
    %8 = arith.addf %3, %7 : vector<64x128xf32>
    %c0_7 = arith.constant 0 : index
    %c0_8 = arith.constant 0 : index
    %9 = vector.load %arg7[%c0_7, %c0_8] : memref<64x128xf32, #tpu.memory_space<vmem>>, vector<64x128xf32>
    tpu.vector_store %arg7[%c0_7, %c0_8], %8 {strides = array<i32>} : memref<64x128xf32, #tpu.memory_space<vmem>>, vector<64x128xf32>,
    %c0_i32_9 = arith.constant 0 : i32
    %10 = arith.cmpi eq, %arg2, %c0_i32_9 : i32
    %11 = arith.extui %10 : i1 to i32
    %c0_i32_10 = arith.constant 0 : i32
    %12 = arith.cmpi ne, %11, %c0_i32_10 : i32
    scf.if %12 {
      %c0_11 = arith.constant 0 : index
      %c0_12 = arith.constant 0 : index
      %13 = vector.load %arg7[%c0_11, %c0_12] : memref<64x128xf32, #tpu.memory_space<vmem>>, vector<64x128xf32>
      %c0_13 = arith.constant 0 : index
      %c0_14 = arith.constant 0 : index
      %14 = vector.load %arg5[%c0_13, %c0_14] : memref<64x1xf32, #tpu.memory_space<vmem>>, vector<64x1xf32>
      %15 = vector.broadcast %14 : vector<64x1xf32> to vector<64x128xf32>
      %16 = arith.addf %13, %15 : vector<64x128xf32>
      %cst_15 = arith.constant 0.000000e+00 : f32
      %17 = vector.broadcast %cst_15 : f32 to vector<64x128xf32>
      %18 = arith.maximumf %16, %17 : vector<64x128xf32>
      %c0_16 = arith.constant 0 : index
      %c0_17 = arith.constant 0 : index
      %c0_18 = arith.constant 0 : index
      %19 = vector.load %arg6[%c0_16, %c0_17, %c0_18] : memref<1x64x128xf32, #tpu.memory_space<vmem>>, vector<1x64x128xf32>
      %20 = vector.shape_cast %19 : vector<1x64x128xf32> to vector<64x128xf32>
      %21 = vector.shape_cast %18 : vector<64x128xf32> to vector<1x64x128xf32>
      tpu.vector_store %arg6[%c0_16, %c0_17, %c0_18], %21 {strides = array<i32>} : memref<1x64x128xf32, #tpu.memory_space<vmem>>, vector<1x64x128xf32>,
    } else {
    }
    return
  }
  func.func @transform_0(%arg0: i32, %arg1: i32, %arg2: i32) -> (i32, i32, i32) {
    %c0_i32 = arith.constant 0 : i32
    return %arg0, %arg2, %arg1 : i32, i32, i32
  }
  func.func @transform_1(%arg0: i32, %arg1: i32, %arg2: i32) -> (i32, i32) {
    %c0_i32 = arith.constant 0 : i32
    %c0_i32_0 = arith.constant 0 : i32
    return %c0_i32, %arg2 : i32, i32
  }
  func.func @transform_2(%arg0: i32, %arg1: i32, %arg2: i32) -> (i32, i32) {
    %c0_i32 = arith.constant 0 : i32
    %c0_i32_0 = arith.constant 0 : i32
    %c0_i32_1 = arith.constant 0 : i32
    return %c0_i32, %c0_i32_0 : i32, i32
  }
  func.func @transform_3(%arg0: i32, %arg1: i32, %arg2: i32) -> (i32, i32, i32) {
    %c0_i32 = arith.constant 0 : i32
    %c0_i32_0 = arith.constant 0 : i32
    return %arg0, %c0_i32, %arg1 : i32, i32, i32
  }
}

module attributes {stable_mosaic.version = 11 : i64} {
  func.func @_gram_mse_kernel(%arg0: i32, %arg1: memref<2x64x64xbf16, #tpu.memory_space<vmem>>, %arg2: memref<1x1xf32, #tpu.memory_space<smem>>, %arg3: memref<64x64xf32, #tpu.memory_space<vmem>>, %arg4: memref<64x64xf32, #tpu.memory_space<vmem>>) attributes {dimension_semantics = [#tpu.dimension_semantics<arbitrary>], iteration_bounds = array<i64: 1>, scalar_prefetch = 0 : i64, scratch_operands = 2 : i64, tpu.core_type = #tpu.core_type<tc>, window_params = [{transform_indices = @transform_0, window_bounds = array<i64: 2, 64, 64>}, {transform_indices = @transform_1, window_bounds = array<i64: 1, 1>}]} {
    %c0_i32 = arith.constant 0 : i32
    %0 = arith.cmpi eq, %arg0, %c0_i32 : i32
    %1 = arith.extui %0 : i1 to i32
    %c0_i32_0 = arith.constant 0 : i32
    %2 = arith.cmpi ne, %1, %c0_i32_0 : i32
    scf.if %2 {
      %cst_16 = arith.constant 0.000000e+00 : f32
      %18 = vector.broadcast %cst_16 : f32 to vector<64x64xf32>
      %c0_17 = arith.constant 0 : index
      %c0_18 = arith.constant 0 : index
      %19 = vector.load %arg3[%c0_17, %c0_18] : memref<64x64xf32, #tpu.memory_space<vmem>>, vector<64x64xf32>
      tpu.vector_store %arg3[%c0_17, %c0_18], %18 {strides = array<i32>} : memref<64x64xf32, #tpu.memory_space<vmem>>, vector<64x64xf32>,
      %cst_19 = arith.constant 0.000000e+00 : f32
      %20 = vector.broadcast %cst_19 : f32 to vector<64x64xf32>
      %c0_20 = arith.constant 0 : index
      %c0_21 = arith.constant 0 : index
      %21 = vector.load %arg4[%c0_20, %c0_21] : memref<64x64xf32, #tpu.memory_space<vmem>>, vector<64x64xf32>
      tpu.vector_store %arg4[%c0_20, %c0_21], %20 {strides = array<i32>} : memref<64x64xf32, #tpu.memory_space<vmem>>, vector<64x64xf32>,
    } else {
    }
    %c0 = arith.constant 0 : index
    %c0_1 = arith.constant 0 : index
    %c0_2 = arith.constant 0 : index
    %3 = vector.load %arg1[%c0, %c0_1, %c0_2] : memref<2x64x64xbf16, #tpu.memory_space<vmem>>, vector<1x64x64xbf16>
    %4 = vector.shape_cast %3 : vector<1x64x64xbf16> to vector<64x64xbf16>
    %c1 = arith.constant 1 : index
    %c0_3 = arith.constant 0 : index
    %c0_4 = arith.constant 0 : index
    %5 = vector.load %arg1[%c1, %c0_3, %c0_4] : memref<2x64x64xbf16, #tpu.memory_space<vmem>>, vector<1x64x64xbf16>
    %6 = vector.shape_cast %5 : vector<1x64x64xbf16> to vector<64x64xbf16>
    %c0_5 = arith.constant 0 : index
    %c0_6 = arith.constant 0 : index
    %7 = vector.load %arg3[%c0_5, %c0_6] : memref<64x64xf32, #tpu.memory_space<vmem>>, vector<64x64xf32>
    %cst = arith.constant dense<0.000000e+00> : vector<64x64xf32>
    %8 = tpu.matmul %4, %4, %cst {dimension_numbers = #tpu.dot_dimension_numbers<[1], [1], [0], [0], [0, 0, 1, 0], [], []>} : vector<64x64xbf16>, vector<64x64xbf16>, vector<64x64xf32> -> vector<64x64xf32>
    %9 = arith.addf %7, %8 : vector<64x64xf32>
    %c0_7 = arith.constant 0 : index
    %c0_8 = arith.constant 0 : index
    %10 = vector.load %arg3[%c0_7, %c0_8] : memref<64x64xf32, #tpu.memory_space<vmem>>, vector<64x64xf32>
    tpu.vector_store %arg3[%c0_7, %c0_8], %9 {strides = array<i32>} : memref<64x64xf32, #tpu.memory_space<vmem>>, vector<64x64xf32>,
    %c0_9 = arith.constant 0 : index
    %c0_10 = arith.constant 0 : index
    %11 = vector.load %arg4[%c0_9, %c0_10] : memref<64x64xf32, #tpu.memory_space<vmem>>, vector<64x64xf32>
    %cst_11 = arith.constant dense<0.000000e+00> : vector<64x64xf32>
    %12 = tpu.matmul %6, %6, %cst_11 {dimension_numbers = #tpu.dot_dimension_numbers<[1], [1], [0], [0], [0, 0, 1, 0], [], []>} : vector<64x64xbf16>, vector<64x64xbf16>, vector<64x64xf32> -> vector<64x64xf32>
    %13 = arith.addf %11, %12 : vector<64x64xf32>
    %c0_12 = arith.constant 0 : index
    %c0_13 = arith.constant 0 : index
    %14 = vector.load %arg4[%c0_12, %c0_13] : memref<64x64xf32, #tpu.memory_space<vmem>>, vector<64x64xf32>
    tpu.vector_store %arg4[%c0_12, %c0_13], %13 {strides = array<i32>} : memref<64x64xf32, #tpu.memory_space<vmem>>, vector<64x64xf32>,
    %c0_i32_14 = arith.constant 0 : i32
    %15 = arith.cmpi eq, %arg0, %c0_i32_14 : i32
    %16 = arith.extui %15 : i1 to i32
    %c0_i32_15 = arith.constant 0 : i32
    %17 = arith.cmpi ne, %16, %c0_i32_15 : i32
    scf.if %17 {
      %c0_16 = arith.constant 0 : index
      %c0_17 = arith.constant 0 : index
      %18 = vector.load %arg3[%c0_16, %c0_17] : memref<64x64xf32, #tpu.memory_space<vmem>>, vector<64x64xf32>
      %c0_18 = arith.constant 0 : index
      %c0_19 = arith.constant 0 : index
      %19 = vector.load %arg4[%c0_18, %c0_19] : memref<64x64xf32, #tpu.memory_space<vmem>>, vector<64x64xf32>
      %20 = arith.subf %18, %19 : vector<64x64xf32>
      %21 = arith.mulf %20, %20 : vector<64x64xf32>
      %22 = vector.shape_cast %21 : vector<64x64xf32> to vector<1x64x64xf32>
      %cst_20 = arith.constant dense<0.000000e+00> : vector<1xf32>
      %23 = vector.multi_reduction <add>, %22, %cst_20 [1, 2] : vector<1x64x64xf32> to vector<1xf32>
      %24 = vector.shape_cast %23 : vector<1xf32> to vector<1x1x1xf32>
      %25 = vector.extract %24[0, 0, 0] : f32 from vector<1x1x1xf32>
      %cst_21 = arith.constant 9.09494702E-13 : f32
      %26 = arith.mulf %cst_21, %25 : f32
      %c0_22 = arith.constant 0 : index
      %c0_23 = arith.constant 0 : index
      %27 = memref.load %arg2[%c0_22, %c0_23] : memref<1x1xf32, #tpu.memory_space<smem>>
      memref.store %26, %arg2[%c0_22, %c0_23] : memref<1x1xf32, #tpu.memory_space<smem>>
    } else {
    }
    return
  }
  func.func @transform_0(%arg0: i32) -> (i32, i32, i32) {
    %c0_i32 = arith.constant 0 : i32
    %c0_i32_0 = arith.constant 0 : i32
    %c0_i32_1 = arith.constant 0 : i32
    return %c0_i32, %c0_i32_0, %arg0 : i32, i32, i32
  }
  func.func @transform_1(%arg0: i32) -> (i32, i32) {
    %c0_i32 = arith.constant 0 : i32
    %c0_i32_0 = arith.constant 0 : i32
    %c0_i32_1 = arith.constant 0 : i32
    return %c0_i32, %c0_i32_0 : i32, i32
  }
}

module attributes {stable_mosaic.version = 11 : i64} {
  func.func @_conv_mm_kernel(%arg0: i32, %arg1: i32, %arg2: i32, %arg3: memref<1x576x64xbf16, #tpu.memory_space<vmem>>, %arg4: memref<128x576xbf16, #tpu.memory_space<vmem>>, %arg5: memref<128x1xf32, #tpu.memory_space<vmem>>, %arg6: memref<1x128x64xf32, #tpu.memory_space<vmem>>, %arg7: memref<128x64xf32, #tpu.memory_space<vmem>>) attributes {dimension_semantics = [#tpu.dimension_semantics<parallel>, #tpu.dimension_semantics<parallel>, #tpu.dimension_semantics<arbitrary>], iteration_bounds = array<i64: 2, 1, 1>, scalar_prefetch = 0 : i64, scratch_operands = 1 : i64, tpu.core_type = #tpu.core_type<tc>, window_params = [{transform_indices = @transform_0, window_bounds = array<i64: 1, 576, 64>}, {transform_indices = @transform_1, window_bounds = array<i64: 128, 576>}, {pipeline_mode = #tpu.pipeline_mode<synchronous>, transform_indices = @transform_2, window_bounds = array<i64: 128, 1>}, {transform_indices = @transform_3, window_bounds = array<i64: 1, 128, 64>}]} {
    %c0_i32 = arith.constant 0 : i32
    %0 = arith.cmpi eq, %arg2, %c0_i32 : i32
    %1 = arith.extui %0 : i1 to i32
    %c0_i32_0 = arith.constant 0 : i32
    %2 = arith.cmpi ne, %1, %c0_i32_0 : i32
    scf.if %2 {
      %cst_11 = arith.constant 0.000000e+00 : f32
      %13 = vector.broadcast %cst_11 : f32 to vector<128x64xf32>
      %c0_12 = arith.constant 0 : index
      %c0_13 = arith.constant 0 : index
      %14 = vector.load %arg7[%c0_12, %c0_13] : memref<128x64xf32, #tpu.memory_space<vmem>>, vector<128x64xf32>
      tpu.vector_store %arg7[%c0_12, %c0_13], %13 {strides = array<i32>} : memref<128x64xf32, #tpu.memory_space<vmem>>, vector<128x64xf32>,
    } else {
    }
    %c0 = arith.constant 0 : index
    %c0_1 = arith.constant 0 : index
    %3 = vector.load %arg7[%c0, %c0_1] : memref<128x64xf32, #tpu.memory_space<vmem>>, vector<128x64xf32>
    %c0_2 = arith.constant 0 : index
    %c0_3 = arith.constant 0 : index
    %4 = vector.load %arg4[%c0_2, %c0_3] : memref<128x576xbf16, #tpu.memory_space<vmem>>, vector<128x576xbf16>
    %c0_4 = arith.constant 0 : index
    %c0_5 = arith.constant 0 : index
    %c0_6 = arith.constant 0 : index
    %5 = vector.load %arg3[%c0_4, %c0_5, %c0_6] : memref<1x576x64xbf16, #tpu.memory_space<vmem>>, vector<1x576x64xbf16>
    %6 = vector.shape_cast %5 : vector<1x576x64xbf16> to vector<576x64xbf16>
    %cst = arith.constant dense<0.000000e+00> : vector<128x64xf32>
    %7 = tpu.matmul %4, %6, %cst {dimension_numbers = #tpu.dot_dimension_numbers<[1], [0], [0], [1], [0, 0, 1, 1], [], []>} : vector<128x576xbf16>, vector<576x64xbf16>, vector<128x64xf32> -> vector<128x64xf32>
    %8 = arith.addf %3, %7 : vector<128x64xf32>
    %c0_7 = arith.constant 0 : index
    %c0_8 = arith.constant 0 : index
    %9 = vector.load %arg7[%c0_7, %c0_8] : memref<128x64xf32, #tpu.memory_space<vmem>>, vector<128x64xf32>
    tpu.vector_store %arg7[%c0_7, %c0_8], %8 {strides = array<i32>} : memref<128x64xf32, #tpu.memory_space<vmem>>, vector<128x64xf32>,
    %c0_i32_9 = arith.constant 0 : i32
    %10 = arith.cmpi eq, %arg2, %c0_i32_9 : i32
    %11 = arith.extui %10 : i1 to i32
    %c0_i32_10 = arith.constant 0 : i32
    %12 = arith.cmpi ne, %11, %c0_i32_10 : i32
    scf.if %12 {
      %c0_11 = arith.constant 0 : index
      %c0_12 = arith.constant 0 : index
      %13 = vector.load %arg7[%c0_11, %c0_12] : memref<128x64xf32, #tpu.memory_space<vmem>>, vector<128x64xf32>
      %c0_13 = arith.constant 0 : index
      %c0_14 = arith.constant 0 : index
      %14 = vector.load %arg5[%c0_13, %c0_14] : memref<128x1xf32, #tpu.memory_space<vmem>>, vector<128x1xf32>
      %15 = vector.broadcast %14 : vector<128x1xf32> to vector<128x64xf32>
      %16 = arith.addf %13, %15 : vector<128x64xf32>
      %cst_15 = arith.constant 0.000000e+00 : f32
      %17 = vector.broadcast %cst_15 : f32 to vector<128x64xf32>
      %18 = arith.maximumf %16, %17 : vector<128x64xf32>
      %c0_16 = arith.constant 0 : index
      %c0_17 = arith.constant 0 : index
      %c0_18 = arith.constant 0 : index
      %19 = vector.load %arg6[%c0_16, %c0_17, %c0_18] : memref<1x128x64xf32, #tpu.memory_space<vmem>>, vector<1x128x64xf32>
      %20 = vector.shape_cast %19 : vector<1x128x64xf32> to vector<128x64xf32>
      %21 = vector.shape_cast %18 : vector<128x64xf32> to vector<1x128x64xf32>
      tpu.vector_store %arg6[%c0_16, %c0_17, %c0_18], %21 {strides = array<i32>} : memref<1x128x64xf32, #tpu.memory_space<vmem>>, vector<1x128x64xf32>,
    } else {
    }
    return
  }
  func.func @transform_0(%arg0: i32, %arg1: i32, %arg2: i32) -> (i32, i32, i32) {
    %c0_i32 = arith.constant 0 : i32
    return %arg0, %arg2, %arg1 : i32, i32, i32
  }
  func.func @transform_1(%arg0: i32, %arg1: i32, %arg2: i32) -> (i32, i32) {
    %c0_i32 = arith.constant 0 : i32
    %c0_i32_0 = arith.constant 0 : i32
    return %c0_i32, %arg2 : i32, i32
  }
  func.func @transform_2(%arg0: i32, %arg1: i32, %arg2: i32) -> (i32, i32) {
    %c0_i32 = arith.constant 0 : i32
    %c0_i32_0 = arith.constant 0 : i32
    %c0_i32_1 = arith.constant 0 : i32
    return %c0_i32, %c0_i32_0 : i32, i32
  }
  func.func @transform_3(%arg0: i32, %arg1: i32, %arg2: i32) -> (i32, i32, i32) {
    %c0_i32 = arith.constant 0 : i32
    %c0_i32_0 = arith.constant 0 : i32
    return %arg0, %c0_i32, %arg1 : i32, i32, i32
  }
}

module attributes {stable_mosaic.version = 11 : i64} {
  func.func @_gram_mse_kernel(%arg0: i32, %arg1: memref<2x128x64xbf16, #tpu.memory_space<vmem>>, %arg2: memref<1x1xf32, #tpu.memory_space<smem>>, %arg3: memref<128x128xf32, #tpu.memory_space<vmem>>, %arg4: memref<128x128xf32, #tpu.memory_space<vmem>>) attributes {dimension_semantics = [#tpu.dimension_semantics<arbitrary>], iteration_bounds = array<i64: 1>, scalar_prefetch = 0 : i64, scratch_operands = 2 : i64, tpu.core_type = #tpu.core_type<tc>, window_params = [{transform_indices = @transform_0, window_bounds = array<i64: 2, 128, 64>}, {transform_indices = @transform_1, window_bounds = array<i64: 1, 1>}]} {
    %c0_i32 = arith.constant 0 : i32
    %0 = arith.cmpi eq, %arg0, %c0_i32 : i32
    %1 = arith.extui %0 : i1 to i32
    %c0_i32_0 = arith.constant 0 : i32
    %2 = arith.cmpi ne, %1, %c0_i32_0 : i32
    scf.if %2 {
      %cst_16 = arith.constant 0.000000e+00 : f32
      %18 = vector.broadcast %cst_16 : f32 to vector<128x128xf32>
      %c0_17 = arith.constant 0 : index
      %c0_18 = arith.constant 0 : index
      %19 = vector.load %arg3[%c0_17, %c0_18] : memref<128x128xf32, #tpu.memory_space<vmem>>, vector<128x128xf32>
      tpu.vector_store %arg3[%c0_17, %c0_18], %18 {strides = array<i32>} : memref<128x128xf32, #tpu.memory_space<vmem>>, vector<128x128xf32>,
      %cst_19 = arith.constant 0.000000e+00 : f32
      %20 = vector.broadcast %cst_19 : f32 to vector<128x128xf32>
      %c0_20 = arith.constant 0 : index
      %c0_21 = arith.constant 0 : index
      %21 = vector.load %arg4[%c0_20, %c0_21] : memref<128x128xf32, #tpu.memory_space<vmem>>, vector<128x128xf32>
      tpu.vector_store %arg4[%c0_20, %c0_21], %20 {strides = array<i32>} : memref<128x128xf32, #tpu.memory_space<vmem>>, vector<128x128xf32>,
    } else {
    }
    %c0 = arith.constant 0 : index
    %c0_1 = arith.constant 0 : index
    %c0_2 = arith.constant 0 : index
    %3 = vector.load %arg1[%c0, %c0_1, %c0_2] : memref<2x128x64xbf16, #tpu.memory_space<vmem>>, vector<1x128x64xbf16>
    %4 = vector.shape_cast %3 : vector<1x128x64xbf16> to vector<128x64xbf16>
    %c1 = arith.constant 1 : index
    %c0_3 = arith.constant 0 : index
    %c0_4 = arith.constant 0 : index
    %5 = vector.load %arg1[%c1, %c0_3, %c0_4] : memref<2x128x64xbf16, #tpu.memory_space<vmem>>, vector<1x128x64xbf16>
    %6 = vector.shape_cast %5 : vector<1x128x64xbf16> to vector<128x64xbf16>
    %c0_5 = arith.constant 0 : index
    %c0_6 = arith.constant 0 : index
    %7 = vector.load %arg3[%c0_5, %c0_6] : memref<128x128xf32, #tpu.memory_space<vmem>>, vector<128x128xf32>
    %cst = arith.constant dense<0.000000e+00> : vector<128x128xf32>
    %8 = tpu.matmul %4, %4, %cst {dimension_numbers = #tpu.dot_dimension_numbers<[1], [1], [0], [0], [0, 0, 1, 0], [], []>} : vector<128x64xbf16>, vector<128x64xbf16>, vector<128x128xf32> -> vector<128x128xf32>
    %9 = arith.addf %7, %8 : vector<128x128xf32>
    %c0_7 = arith.constant 0 : index
    %c0_8 = arith.constant 0 : index
    %10 = vector.load %arg3[%c0_7, %c0_8] : memref<128x128xf32, #tpu.memory_space<vmem>>, vector<128x128xf32>
    tpu.vector_store %arg3[%c0_7, %c0_8], %9 {strides = array<i32>} : memref<128x128xf32, #tpu.memory_space<vmem>>, vector<128x128xf32>,
    %c0_9 = arith.constant 0 : index
    %c0_10 = arith.constant 0 : index
    %11 = vector.load %arg4[%c0_9, %c0_10] : memref<128x128xf32, #tpu.memory_space<vmem>>, vector<128x128xf32>
    %cst_11 = arith.constant dense<0.000000e+00> : vector<128x128xf32>
    %12 = tpu.matmul %6, %6, %cst_11 {dimension_numbers = #tpu.dot_dimension_numbers<[1], [1], [0], [0], [0, 0, 1, 0], [], []>} : vector<128x64xbf16>, vector<128x64xbf16>, vector<128x128xf32> -> vector<128x128xf32>
    %13 = arith.addf %11, %12 : vector<128x128xf32>
    %c0_12 = arith.constant 0 : index
    %c0_13 = arith.constant 0 : index
    %14 = vector.load %arg4[%c0_12, %c0_13] : memref<128x128xf32, #tpu.memory_space<vmem>>, vector<128x128xf32>
    tpu.vector_store %arg4[%c0_12, %c0_13], %13 {strides = array<i32>} : memref<128x128xf32, #tpu.memory_space<vmem>>, vector<128x128xf32>,
    %c0_i32_14 = arith.constant 0 : i32
    %15 = arith.cmpi eq, %arg0, %c0_i32_14 : i32
    %16 = arith.extui %15 : i1 to i32
    %c0_i32_15 = arith.constant 0 : i32
    %17 = arith.cmpi ne, %16, %c0_i32_15 : i32
    scf.if %17 {
      %c0_16 = arith.constant 0 : index
      %c0_17 = arith.constant 0 : index
      %18 = vector.load %arg3[%c0_16, %c0_17] : memref<128x128xf32, #tpu.memory_space<vmem>>, vector<128x128xf32>
      %c0_18 = arith.constant 0 : index
      %c0_19 = arith.constant 0 : index
      %19 = vector.load %arg4[%c0_18, %c0_19] : memref<128x128xf32, #tpu.memory_space<vmem>>, vector<128x128xf32>
      %20 = arith.subf %18, %19 : vector<128x128xf32>
      %21 = arith.mulf %20, %20 : vector<128x128xf32>
      %22 = vector.shape_cast %21 : vector<128x128xf32> to vector<1x128x128xf32>
      %cst_20 = arith.constant dense<0.000000e+00> : vector<1xf32>
      %23 = vector.multi_reduction <add>, %22, %cst_20 [1, 2] : vector<1x128x128xf32> to vector<1xf32>
      %24 = vector.shape_cast %23 : vector<1xf32> to vector<1x1x1xf32>
      %25 = vector.extract %24[0, 0, 0] : f32 from vector<1x1x1xf32>
      %cst_21 = arith.constant 5.68434189E-14 : f32
      %26 = arith.mulf %cst_21, %25 : f32
      %c0_22 = arith.constant 0 : index
      %c0_23 = arith.constant 0 : index
      %27 = memref.load %arg2[%c0_22, %c0_23] : memref<1x1xf32, #tpu.memory_space<smem>>
      memref.store %26, %arg2[%c0_22, %c0_23] : memref<1x1xf32, #tpu.memory_space<smem>>
    } else {
    }
    return
  }
  func.func @transform_0(%arg0: i32) -> (i32, i32, i32) {
    %c0_i32 = arith.constant 0 : i32
    %c0_i32_0 = arith.constant 0 : i32
    %c0_i32_1 = arith.constant 0 : i32
    return %c0_i32, %c0_i32_0, %arg0 : i32, i32, i32
  }
  func.func @transform_1(%arg0: i32) -> (i32, i32) {
    %c0_i32 = arith.constant 0 : i32
    %c0_i32_0 = arith.constant 0 : i32
    %c0_i32_1 = arith.constant 0 : i32
    return %c0_i32, %c0_i32_0 : i32, i32
  }
}

module attributes {stable_mosaic.version = 11 : i64} {
  func.func @_conv_mm_kernel(%arg0: i32, %arg1: i32, %arg2: i32, %arg3: memref<1x384x64xbf16, #tpu.memory_space<vmem>>, %arg4: memref<128x384xbf16, #tpu.memory_space<vmem>>, %arg5: memref<128x1xf32, #tpu.memory_space<vmem>>, %arg6: memref<1x128x64xf32, #tpu.memory_space<vmem>>, %arg7: memref<128x64xf32, #tpu.memory_space<vmem>>) attributes {dimension_semantics = [#tpu.dimension_semantics<parallel>, #tpu.dimension_semantics<parallel>, #tpu.dimension_semantics<arbitrary>], iteration_bounds = array<i64: 2, 1, 3>, scalar_prefetch = 0 : i64, scratch_operands = 1 : i64, tpu.core_type = #tpu.core_type<tc>, window_params = [{transform_indices = @transform_0, window_bounds = array<i64: 1, 384, 64>}, {transform_indices = @transform_1, window_bounds = array<i64: 128, 384>}, {pipeline_mode = #tpu.pipeline_mode<synchronous>, transform_indices = @transform_2, window_bounds = array<i64: 128, 1>}, {transform_indices = @transform_3, window_bounds = array<i64: 1, 128, 64>}]} {
    %c0_i32 = arith.constant 0 : i32
    %0 = arith.cmpi eq, %arg2, %c0_i32 : i32
    %1 = arith.extui %0 : i1 to i32
    %c0_i32_0 = arith.constant 0 : i32
    %2 = arith.cmpi ne, %1, %c0_i32_0 : i32
    scf.if %2 {
      %cst_10 = arith.constant 0.000000e+00 : f32
      %13 = vector.broadcast %cst_10 : f32 to vector<128x64xf32>
      %c0_11 = arith.constant 0 : index
      %c0_12 = arith.constant 0 : index
      %14 = vector.load %arg7[%c0_11, %c0_12] : memref<128x64xf32, #tpu.memory_space<vmem>>, vector<128x64xf32>
      tpu.vector_store %arg7[%c0_11, %c0_12], %13 {strides = array<i32>} : memref<128x64xf32, #tpu.memory_space<vmem>>, vector<128x64xf32>,
    } else {
    }
    %c0 = arith.constant 0 : index
    %c0_1 = arith.constant 0 : index
    %3 = vector.load %arg7[%c0, %c0_1] : memref<128x64xf32, #tpu.memory_space<vmem>>, vector<128x64xf32>
    %c0_2 = arith.constant 0 : index
    %c0_3 = arith.constant 0 : index
    %4 = vector.load %arg4[%c0_2, %c0_3] : memref<128x384xbf16, #tpu.memory_space<vmem>>, vector<128x384xbf16>
    %c0_4 = arith.constant 0 : index
    %c0_5 = arith.constant 0 : index
    %c0_6 = arith.constant 0 : index
    %5 = vector.load %arg3[%c0_4, %c0_5, %c0_6] : memref<1x384x64xbf16, #tpu.memory_space<vmem>>, vector<1x384x64xbf16>
    %6 = vector.shape_cast %5 : vector<1x384x64xbf16> to vector<384x64xbf16>
    %cst = arith.constant dense<0.000000e+00> : vector<128x64xf32>
    %7 = tpu.matmul %4, %6, %cst {dimension_numbers = #tpu.dot_dimension_numbers<[1], [0], [0], [1], [0, 0, 1, 1], [], []>} : vector<128x384xbf16>, vector<384x64xbf16>, vector<128x64xf32> -> vector<128x64xf32>
    %8 = arith.addf %3, %7 : vector<128x64xf32>
    %c0_7 = arith.constant 0 : index
    %c0_8 = arith.constant 0 : index
    %9 = vector.load %arg7[%c0_7, %c0_8] : memref<128x64xf32, #tpu.memory_space<vmem>>, vector<128x64xf32>
    tpu.vector_store %arg7[%c0_7, %c0_8], %8 {strides = array<i32>} : memref<128x64xf32, #tpu.memory_space<vmem>>, vector<128x64xf32>,
    %c2_i32 = arith.constant 2 : i32
    %10 = arith.cmpi eq, %arg2, %c2_i32 : i32
    %11 = arith.extui %10 : i1 to i32
    %c0_i32_9 = arith.constant 0 : i32
    %12 = arith.cmpi ne, %11, %c0_i32_9 : i32
    scf.if %12 {
      %c0_10 = arith.constant 0 : index
      %c0_11 = arith.constant 0 : index
      %13 = vector.load %arg7[%c0_10, %c0_11] : memref<128x64xf32, #tpu.memory_space<vmem>>, vector<128x64xf32>
      %c0_12 = arith.constant 0 : index
      %c0_13 = arith.constant 0 : index
      %14 = vector.load %arg5[%c0_12, %c0_13] : memref<128x1xf32, #tpu.memory_space<vmem>>, vector<128x1xf32>
      %15 = vector.broadcast %14 : vector<128x1xf32> to vector<128x64xf32>
      %16 = arith.addf %13, %15 : vector<128x64xf32>
      %cst_14 = arith.constant 0.000000e+00 : f32
      %17 = vector.broadcast %cst_14 : f32 to vector<128x64xf32>
      %18 = arith.maximumf %16, %17 : vector<128x64xf32>
      %c0_15 = arith.constant 0 : index
      %c0_16 = arith.constant 0 : index
      %c0_17 = arith.constant 0 : index
      %19 = vector.load %arg6[%c0_15, %c0_16, %c0_17] : memref<1x128x64xf32, #tpu.memory_space<vmem>>, vector<1x128x64xf32>
      %20 = vector.shape_cast %19 : vector<1x128x64xf32> to vector<128x64xf32>
      %21 = vector.shape_cast %18 : vector<128x64xf32> to vector<1x128x64xf32>
      tpu.vector_store %arg6[%c0_15, %c0_16, %c0_17], %21 {strides = array<i32>} : memref<1x128x64xf32, #tpu.memory_space<vmem>>, vector<1x128x64xf32>,
    } else {
    }
    return
  }
  func.func @transform_0(%arg0: i32, %arg1: i32, %arg2: i32) -> (i32, i32, i32) {
    %c0_i32 = arith.constant 0 : i32
    return %arg0, %arg2, %arg1 : i32, i32, i32
  }
  func.func @transform_1(%arg0: i32, %arg1: i32, %arg2: i32) -> (i32, i32) {
    %c0_i32 = arith.constant 0 : i32
    %c0_i32_0 = arith.constant 0 : i32
    return %c0_i32, %arg2 : i32, i32
  }
  func.func @transform_2(%arg0: i32, %arg1: i32, %arg2: i32) -> (i32, i32) {
    %c0_i32 = arith.constant 0 : i32
    %c0_i32_0 = arith.constant 0 : i32
    %c0_i32_1 = arith.constant 0 : i32
    return %c0_i32, %c0_i32_0 : i32, i32
  }
  func.func @transform_3(%arg0: i32, %arg1: i32, %arg2: i32) -> (i32, i32, i32) {
    %c0_i32 = arith.constant 0 : i32
    %c0_i32_0 = arith.constant 0 : i32
    return %arg0, %c0_i32, %arg1 : i32, i32, i32
  }
}

module attributes {stable_mosaic.version = 11 : i64} {
  func.func @_gram_mse_kernel(%arg0: i32, %arg1: memref<2x128x16xbf16, #tpu.memory_space<vmem>>, %arg2: memref<1x1xf32, #tpu.memory_space<smem>>, %arg3: memref<128x128xf32, #tpu.memory_space<vmem>>, %arg4: memref<128x128xf32, #tpu.memory_space<vmem>>) attributes {dimension_semantics = [#tpu.dimension_semantics<arbitrary>], iteration_bounds = array<i64: 1>, scalar_prefetch = 0 : i64, scratch_operands = 2 : i64, tpu.core_type = #tpu.core_type<tc>, window_params = [{transform_indices = @transform_0, window_bounds = array<i64: 2, 128, 16>}, {transform_indices = @transform_1, window_bounds = array<i64: 1, 1>}]} {
    %c0_i32 = arith.constant 0 : i32
    %0 = arith.cmpi eq, %arg0, %c0_i32 : i32
    %1 = arith.extui %0 : i1 to i32
    %c0_i32_0 = arith.constant 0 : i32
    %2 = arith.cmpi ne, %1, %c0_i32_0 : i32
    scf.if %2 {
      %cst_16 = arith.constant 0.000000e+00 : f32
      %18 = vector.broadcast %cst_16 : f32 to vector<128x128xf32>
      %c0_17 = arith.constant 0 : index
      %c0_18 = arith.constant 0 : index
      %19 = vector.load %arg3[%c0_17, %c0_18] : memref<128x128xf32, #tpu.memory_space<vmem>>, vector<128x128xf32>
      tpu.vector_store %arg3[%c0_17, %c0_18], %18 {strides = array<i32>} : memref<128x128xf32, #tpu.memory_space<vmem>>, vector<128x128xf32>,
      %cst_19 = arith.constant 0.000000e+00 : f32
      %20 = vector.broadcast %cst_19 : f32 to vector<128x128xf32>
      %c0_20 = arith.constant 0 : index
      %c0_21 = arith.constant 0 : index
      %21 = vector.load %arg4[%c0_20, %c0_21] : memref<128x128xf32, #tpu.memory_space<vmem>>, vector<128x128xf32>
      tpu.vector_store %arg4[%c0_20, %c0_21], %20 {strides = array<i32>} : memref<128x128xf32, #tpu.memory_space<vmem>>, vector<128x128xf32>,
    } else {
    }
    %c0 = arith.constant 0 : index
    %c0_1 = arith.constant 0 : index
    %c0_2 = arith.constant 0 : index
    %3 = vector.load %arg1[%c0, %c0_1, %c0_2] : memref<2x128x16xbf16, #tpu.memory_space<vmem>>, vector<1x128x16xbf16>
    %4 = vector.shape_cast %3 : vector<1x128x16xbf16> to vector<128x16xbf16>
    %c1 = arith.constant 1 : index
    %c0_3 = arith.constant 0 : index
    %c0_4 = arith.constant 0 : index
    %5 = vector.load %arg1[%c1, %c0_3, %c0_4] : memref<2x128x16xbf16, #tpu.memory_space<vmem>>, vector<1x128x16xbf16>
    %6 = vector.shape_cast %5 : vector<1x128x16xbf16> to vector<128x16xbf16>
    %c0_5 = arith.constant 0 : index
    %c0_6 = arith.constant 0 : index
    %7 = vector.load %arg3[%c0_5, %c0_6] : memref<128x128xf32, #tpu.memory_space<vmem>>, vector<128x128xf32>
    %cst = arith.constant dense<0.000000e+00> : vector<128x128xf32>
    %8 = tpu.matmul %4, %4, %cst {dimension_numbers = #tpu.dot_dimension_numbers<[1], [1], [0], [0], [0, 0, 1, 0], [], []>} : vector<128x16xbf16>, vector<128x16xbf16>, vector<128x128xf32> -> vector<128x128xf32>
    %9 = arith.addf %7, %8 : vector<128x128xf32>
    %c0_7 = arith.constant 0 : index
    %c0_8 = arith.constant 0 : index
    %10 = vector.load %arg3[%c0_7, %c0_8] : memref<128x128xf32, #tpu.memory_space<vmem>>, vector<128x128xf32>
    tpu.vector_store %arg3[%c0_7, %c0_8], %9 {strides = array<i32>} : memref<128x128xf32, #tpu.memory_space<vmem>>, vector<128x128xf32>,
    %c0_9 = arith.constant 0 : index
    %c0_10 = arith.constant 0 : index
    %11 = vector.load %arg4[%c0_9, %c0_10] : memref<128x128xf32, #tpu.memory_space<vmem>>, vector<128x128xf32>
    %cst_11 = arith.constant dense<0.000000e+00> : vector<128x128xf32>
    %12 = tpu.matmul %6, %6, %cst_11 {dimension_numbers = #tpu.dot_dimension_numbers<[1], [1], [0], [0], [0, 0, 1, 0], [], []>} : vector<128x16xbf16>, vector<128x16xbf16>, vector<128x128xf32> -> vector<128x128xf32>
    %13 = arith.addf %11, %12 : vector<128x128xf32>
    %c0_12 = arith.constant 0 : index
    %c0_13 = arith.constant 0 : index
    %14 = vector.load %arg4[%c0_12, %c0_13] : memref<128x128xf32, #tpu.memory_space<vmem>>, vector<128x128xf32>
    tpu.vector_store %arg4[%c0_12, %c0_13], %13 {strides = array<i32>} : memref<128x128xf32, #tpu.memory_space<vmem>>, vector<128x128xf32>,
    %c0_i32_14 = arith.constant 0 : i32
    %15 = arith.cmpi eq, %arg0, %c0_i32_14 : i32
    %16 = arith.extui %15 : i1 to i32
    %c0_i32_15 = arith.constant 0 : i32
    %17 = arith.cmpi ne, %16, %c0_i32_15 : i32
    scf.if %17 {
      %c0_16 = arith.constant 0 : index
      %c0_17 = arith.constant 0 : index
      %18 = vector.load %arg3[%c0_16, %c0_17] : memref<128x128xf32, #tpu.memory_space<vmem>>, vector<128x128xf32>
      %c0_18 = arith.constant 0 : index
      %c0_19 = arith.constant 0 : index
      %19 = vector.load %arg4[%c0_18, %c0_19] : memref<128x128xf32, #tpu.memory_space<vmem>>, vector<128x128xf32>
      %20 = arith.subf %18, %19 : vector<128x128xf32>
      %21 = arith.mulf %20, %20 : vector<128x128xf32>
      %22 = vector.shape_cast %21 : vector<128x128xf32> to vector<1x128x128xf32>
      %cst_20 = arith.constant dense<0.000000e+00> : vector<1xf32>
      %23 = vector.multi_reduction <add>, %22, %cst_20 [1, 2] : vector<1x128x128xf32> to vector<1xf32>
      %24 = vector.shape_cast %23 : vector<1xf32> to vector<1x1x1xf32>
      %25 = vector.extract %24[0, 0, 0] : f32 from vector<1x1x1xf32>
      %cst_21 = arith.constant 9.09494702E-13 : f32
      %26 = arith.mulf %cst_21, %25 : f32
      %c0_22 = arith.constant 0 : index
      %c0_23 = arith.constant 0 : index
      %27 = memref.load %arg2[%c0_22, %c0_23] : memref<1x1xf32, #tpu.memory_space<smem>>
      memref.store %26, %arg2[%c0_22, %c0_23] : memref<1x1xf32, #tpu.memory_space<smem>>
    } else {
    }
    return
  }
  func.func @transform_0(%arg0: i32) -> (i32, i32, i32) {
    %c0_i32 = arith.constant 0 : i32
    %c0_i32_0 = arith.constant 0 : i32
    %c0_i32_1 = arith.constant 0 : i32
    return %c0_i32, %c0_i32_0, %arg0 : i32, i32, i32
  }
  func.func @transform_1(%arg0: i32) -> (i32, i32) {
    %c0_i32 = arith.constant 0 : i32
    %c0_i32_0 = arith.constant 0 : i32
    %c0_i32_1 = arith.constant 0 : i32
    return %c0_i32, %c0_i32_0 : i32, i32
  }
}

</mosaic_0001>

<bundles_post_ra>
// kernel: style_loss.8
= control target key start
LH: loop header
LB: loop body
LE: loop exit
PB: predicated region body
PF: predicated region fallthrough
CT: control target
= control target key end

     0   :  { %s839_s12 = smov 0   ;;  %s841_s13 = smov 0   ;;  %s993_s0 = inlined_call_operand.vmem [shape: bf16[2,27,256], index: 0, kind: input, shape index: {}]   ;;  %s994_s1 = inlined_call_operand.vmem [shape: bf16[64,27], index: 1, kind: input, shape index: {}]   ;;  %s995_s2 = inlined_call_operand.vmem [shape: f32[64,1], index: 2, kind: input, shape index: {}]   ;;  %s996_s3 = inlined_call_operand.vmem [shape: f32[2,64,256], index: 3, kind: output, shape index: {}]  }
   0x1   :  { %s843_s14 = smov 0   ;;  %s845_s15 = smov 0  }
   0x2   :  { %s847_s16 = smov 0   ;;  %s849_s17 = smov 0  }
   0x3   :  { %s851_s18 = smov 0  }
   0x4 LB: > { %s28_s19 = sadd.s32 1, %s807_s16  ;;  %s32_s20 = sadd.s32 1, %s811_s17  ;;  %s815_s18 = sphi %s851_s18, %s13_s18   ;;  %s811_s17 = sphi %s849_s17, %s1003_s17   ;;  %s807_s16 = sphi %s847_s16, %s1002_s16   ;;  %s803_s15 = sphi %s845_s15, %s1001_s15   ;;  %s799_s14 = sphi %s843_s14, %s1000_s14   ;;  %s795_s13 = sphi %s841_s13, %s999_s13   ;;  %s791_s12 = sphi %s839_s12, %s998_s12  }
   0x5   : > { %p30_p0 = scmp.ge.s32.totalorder %s28_s19, 2  ;;  %s644_s21 = sadd.s32 4294967295, %s815_s18  }
   0x6   : > { %p50_p1 = scmp.ne.s32.totalorder %s795_s13, %s791_s12  ;;  %p51_p2 = scmp.eq.s32.totalorder %s815_s18, 0 }
   0x7   : > { %s1005_s19 = smov (%p30_p0, %s28_s19), 0  ;;  %s1007_s20 = smov (!%p30_p0, %s32_s20), %s811_s17 }
   0x8   : > { %p34_p3 = scmp.ge.s32.totalorder %s1007_s20, 2  ;;  %p129_p4 = scmp.eq.s32.totalorder %s644_s21, 3 }
   0x9   : > { %s39_s22 = ssub.s32 %s807_s16, %s1005_s19  ;;  %p52_p5 = por %p51_p2, %p50_p1 }
   0xa   : > { %s1009_s20 = smov (%p34_p3, %s1007_s20), 0  ;;  %p887_p6 = por %p129_p4, %p50_p1 }
   0xb   : > { %s36_s24 = ssub.s32 %s811_s17, %s1009_s20  ;;  %s43_s26 = sadd.s32 1, %s795_s13 }
   0xc   : > { %s40_s25 = sor.u32 %s39_s22, %s36_s24  ;;  %p648_p8 = scmp.ge.s32.totalorder %s815_s18, 4 }
   0xd   : > { %p41_p7 = scmp.eq.s32.totalorder %s40_s25, 0 }
   0xe   : > { %161 = sbr.rel (%p648_p8) target bundleno = 29 (0x1d), region = 24 }
   0xf   : > { %s895_s27 = scalar_select %p41_p7, %s795_s13, %s43_s26  }
  0x13   : > { %164 = sbr.rel (!%p52_p5) target bundleno = 29 (0x1d), region = 28  ;;  %s166_s28 = sand.u32 (%p52_p5), 1, %s795_s13  }
  0x14   : > { %s650_s29 = sshll.u32 (%p52_p5), %s811_s17, 3  ;;  %s649_s30 = sshll.u32 (%p52_p5), %s166_s28, 4 }
  0x15   : > { %s173_s4 = sadd.s32 (%p52_p5), %s807_s16, %s650_s29  ;;  %s168_s9 = scalar_lea.vmem (%p52_p5), [#allocation3], %s649_s30 }
  0x16   : > { %s651_s5 = sshll.u32 (%p52_p5), %s173_s4, 2 }
  0x17   : > { %s175_s8 = scalar_lea.vmem (%p52_p5), %s993_s0, %s651_s5 }
  0x18   : > { %v192_v0 = vld [vmem:[%s175_s8] sm:$0xf]  ;;  %v194_v1 = vld [vmem:[%s175_s8 + $0x8] sm:$0xf]  ;;  %v196_v2 = vld [vmem:[%s175_s8 + $0x10] sm:$0xf] }
  0x19   : > { %193 = vst [vmem:[%s168_s9] sm:$0xf] %v192_v0  ;;  %v198_v3 = vld [vmem:[%s175_s8 + $0x18] sm:$0xf] }
  0x1a   : > { %195 = vst [vmem:[%s168_s9 + $0x4] sm:$0xf] %v194_v1 }
  0x1b   : > { %197 = vst [vmem:[%s168_s9 + $0x8] sm:$0xf] %v196_v2 }
  0x1c   : > { %199 = vst [vmem:[%s168_s9 + $0xc] sm:$0xf] %v198_v3 }
  0x1d PF: > { %p652_p9 = scmp.ge.s32.totalorder %s815_s18, 1  ;;  %p230_p10 = scmp.lt.s32.totalorder %s815_s18, 5 }
  0x1f   : > { %p231_p11 = pnand %p652_p9, %p230_p10 }
  0x20   : > { %s237_s24 = sand.u32 (!%p231_p11), 1, %s791_s12  }
  0x21   : > { %234 = sbr.rel (%p231_p11) target bundleno = 207 (0xcf), region = 69  ;;  %s653_s25 = sshll.u32 (!%p231_p11), %s237_s24, 4 }
  0x22   : > { %s239_s26 = scalar_lea.vmem (!%p231_p11), [#allocation3], %s653_s25  ;;  %s654_s6 = sshll.u32 (!%p231_p11), %s237_s24, 6 }
  0x23   : > { %s947_s7 = scalar_lea.vmem (!%p231_p11), [#allocation4], %s654_s6 }
  0x26   : > { %v410_v4 = vld [vmem:[%s995_s2 + $0x10] sm:$0xff]  ;;  %v408_v5 = vld [vmem:[%s995_s2] sm:$0xff]  ;;  %vm345_vm0 = vcmask 1044480   ;;  %vm346_vm1 = vcmask 1045504   ;;  %v817_v6 = vmov 0   ;;  %v818_v7 = vmov 65535  }
  0x27   : > { %759 = vset.pattern.permute.xlu1 %v817_v6  ;;  %758 = vset.pattern.permute.xlu0 %v817_v6  ;;  %v347_v8 = vsel %vm345_vm0, 4294967295, %v818_v7  ;;  %v677_v9 = vld [vmem:[%s239_s26 + $0x8] sm:$0xf]  ;;  %v693_v10 = vld [vmem:[%s239_s26 + $0x8] sm:$0x30]  ;;  %v412_v13 = vld [vmem:[%s995_s2 + $0x20] sm:$0xff] }
  0x28   : > { %428 = vperm.xlu1 %759, %v410_v4   ;;  %418 = vperm.xlu0 %758, %v408_v5   ;;  %v348_v11 = vsel %vm346_vm1, %v347_v8, 0  ;;  %v678_v12 = vor.u32 %v693_v10, %v677_v9  ;;  %v411_v15 = vld [vmem:[%s995_s2 + $0x18] sm:$0xff]  ;;  %v409_v16 = vld [vmem:[%s995_s2 + $0x8] sm:$0xff]  ;;  %v692_v17 = vld [vmem:[%s239_s26] sm:$0xff]  ;;  %vm332_vm2 = vcmask 220160   ;;  %s684_s12 = sshll.u32 (%p887_p6), %s803_s15, 4 }
  0x29   : > { %760 = vset.pattern.permute.xlu2 %v817_v6  ;;  %v688_v18 = vld [vmem:[%s994_s1] sm:$0xff]  ;;  %v689_v19 = vld [vmem:[%s994_s1 + $0x8] sm:$0xff]  ;;  %v690_v21 = vld [vmem:[%s994_s1 + $0x10] sm:$0xff]  ;;  %s488_s24 = sadd.s32 (%p887_p6), %s799_s14, %s684_s12 }
  0x2a   : > { %v350_v14 = vand.u32 %v678_v12, %v348_v11  ;;  %438 = vperm.xlu2 %760, %v412_v13   ;;  %v413_v20 = vld [vmem:[%s995_s2 + $0x28] sm:$0xff]  ;;  %v691_v22 = vld [vmem:[%s994_s1 + $0x18] sm:$0xff]  ;;  %v414_v24 = vld [vmem:[%s995_s2 + $0x30] sm:$0xff]  ;;  %s685_s8 = sshll.u32 (%p887_p6), %s488_s24, 3 }
  0x2b   : > { %v415_v23 = vld [vmem:[%s995_s2 + $0x38] sm:$0xff]  ;;  %s490_s23 = scalar_lea.vmem (%p887_p6), %s996_s3, %s685_s8 }
  0x2c   : > { %358 = vmatpush.bf16.msra.mxu0 %v350_v14  ;;  %694 = vmatpush.bf16.msra.mxu1 %v350_v14 }
  0x2d   : > { %695 = vmatpush.bf16.msra.mxu2 %v350_v14  ;;  %696 = vmatpush.bf16.msra.mxu3 %v350_v14 }
  0x30   : > { %433 = vperm.xlu1 %759, %v411_v15   ;;  %423 = vperm.xlu0 %758, %v409_v16  }
  0x31   : > { %359 = vmatpush.bf16.msra.mxu0 %v692_v17  ;;  %697 = vmatpush.bf16.msra.mxu1 %v692_v17 }
  0x32   : > { %698 = vmatpush.bf16.msra.mxu2 %v692_v17  ;;  %699 = vmatpush.bf16.msra.mxu3 %v692_v17 }
  0x33   : > { %443 = vperm.xlu2 %760, %v413_v20  }
  0x34   : > { %679 = vmatmul.msk.bf16.vlgmr.msra.gmra.mxu0 %vm332_vm2, %v688_v18  ;;  %680 = vmatmul.msk.bf16.vlgmr.msra.gmra.mxu1 %vm332_vm2, %v689_v19 }
  0x35   : > { %681 = vmatmul.msk.bf16.vlgmr.msra.gmra.mxu2 %vm332_vm2, %v690_v21  ;;  %682 = vmatmul.msk.bf16.vlgmr.msra.gmra.mxu3 %vm332_vm2, %v691_v22 }
  0x38   : > { %453 = vperm.xlu1 %759, %v415_v23   ;;  %448 = vperm.xlu0 %758, %v414_v24  }
  0x84   : > { %v439_v35 = vpop.permute.xlu2 %438 }
  0x8d   : > { %v444_v50 = vpop.permute.xlu2 %443 }
  0x9a   : > { %v419_v25 = vpop.permute.xlu0 %418  ;;  %v429_v26 = vpop.permute.xlu1 %428 }
  0xa2   : > { %v424_v27 = vpop.permute.xlu0 %423  ;;  %v434_v34 = vpop.permute.xlu1 %433 }
  0xaa   : > { %v449_v36 = vpop.permute.xlu0 %448  ;;  %v454_v49 = vpop.permute.xlu1 %453 }
  0xb1   : > { %v361_v28 = vpop.f32.mrf.mxu0  ;;  %v366_v29 = vpop.f32.mrf.mxu1 }
  0xb2   : > { %v456_v30 = vadd.f32 %v419_v25, %v361_v28  ;;  %v458_v31 = vadd.f32 %v429_v26, %v366_v29 }
  0xb4   : > { %v464_v32 = vmax.f32 %v456_v30, 0.0  ;;  %v466_v33 = vmax.f32 %v458_v31, 0.0 }
  0xb6   : > { %472 = vst [vmem:[%s947_s7] sm:$0xff] %v464_v32 }
  0xb7   : > { %474 = vst [vmem:[%s947_s7 + $0x10] sm:$0xff] %v466_v33 }
  0xb8   : > { %v371_v37 = vpop.f32.mrf.mxu2  ;;  %v376_v38 = vpop.f32.mrf.mxu3 }
  0xb9   : > { %v460_v39 = vadd.f32 %v439_v35, %v371_v37  ;;  %v462_v40 = vadd.f32 %v449_v36, %v376_v38  ;;  %v363_v41 = vpop.f32.mrf.mxu0  ;;  %v368_v42 = vpop.f32.mrf.mxu1 }
  0xba   : > { %v457_v43 = vadd.f32 %v424_v27, %v363_v41  ;;  %v459_v44 = vadd.f32 %v434_v34, %v368_v42 }
  0xbb   : > { %v468_v45 = vmax.f32 %v460_v39, 0.0  ;;  %v470_v46 = vmax.f32 %v462_v40, 0.0 }
  0xbc   : > { %v465_v47 = vmax.f32 %v457_v43, 0.0  ;;  %v467_v48 = vmax.f32 %v459_v44, 0.0 }
  0xbd   : > { %476 = vst [vmem:[%s947_s7 + $0x20] sm:$0xff] %v468_v45  ;;  %v533_v57 = vld [vmem:[%s947_s7] sm:$0xff] (%p887_p6) }
  0xbe   : > { %478 = vst [vmem:[%s947_s7 + $0x30] sm:$0xff] %v470_v46  ;;  %v537_v59 = vld [vmem:[%s947_s7 + $0x10] sm:$0xff] (%p887_p6) }
  0xbf   : > { %473 = vst [vmem:[%s947_s7 + $0x8] sm:$0xff] %v465_v47 }
  0xc0   : > { %475 = vst [vmem:[%s947_s7 + $0x18] sm:$0xff] %v467_v48  ;;  %v373_v51 = vpop.f32.mrf.mxu2  ;;  %v378_v52 = vpop.f32.mrf.mxu3 }
  0xc1   : > { %v461_v53 = vadd.f32 %v444_v50, %v373_v51  ;;  %v463_v54 = vadd.f32 %v454_v49, %v378_v52  ;;  %534 = vst [vmem:[%s490_s23] sm:$0xff] (%p887_p6), %v533_v57 }
  0xc2   : > { %486 = sbr.rel (!%p887_p6) target bundleno = 207 (0xcf), region = 85  ;;  %538 = vst [vmem:[%s490_s23 + $0x20] sm:$0xff] (%p887_p6), %v537_v59 }
  0xc3   : > { %v469_v55 = vmax.f32 %v461_v53, 0.0  ;;  %v471_v56 = vmax.f32 %v463_v54, 0.0 }
  0xc4   : > { %v541_v61 = vld [vmem:[%s947_s7 + $0x20] sm:$0xff] (%p887_p6) }
  0xc5   : > { %477 = vst [vmem:[%s947_s7 + $0x28] sm:$0xff] %v469_v55  ;;  %v545_v63 = vld [vmem:[%s947_s7 + $0x30] sm:$0xff] (%p887_p6) }
  0xc6   : > { %479 = vst [vmem:[%s947_s7 + $0x38] sm:$0xff] %v471_v56  ;;  %v535_v58 = vld [vmem:[%s947_s7 + $0x8] sm:$0xff] (%p887_p6) }
  0xc7   : > { %v539_v60 = vld [vmem:[%s947_s7 + $0x18] sm:$0xff]  ;;  %536 = vst [vmem:[%s490_s23 + $0x10] sm:$0xff] %v535_v58 }
  0xc8   : > { %540 = vst [vmem:[%s490_s23 + $0x30] sm:$0xff] %v539_v60 }
  0xc9   : > { %542 = vst [vmem:[%s490_s23 + $0x40] sm:$0xff] %v541_v61 }
  0xca   : > { %546 = vst [vmem:[%s490_s23 + $0x60] sm:$0xff] %v545_v63 }
  0xcc   : > { %v543_v62 = vld [vmem:[%s947_s7 + $0x28] sm:$0xff] }
  0xcd   : > { %v547_v0 = vld [vmem:[%s947_s7 + $0x38] sm:$0xff]  ;;  %544 = vst [vmem:[%s490_s23 + $0x50] sm:$0xff] %v543_v62 }
  0xce   : > { %548 = vst [vmem:[%s490_s23 + $0x70] sm:$0xff] %v547_v0 }
  0xcf PF: > { %s13_s18 = sadd.s32 1, %s815_s18   ;;  %s998_s12 = smov %s795_s13 }
  0xd0   : > { %p10_p12 = scmp.ge.s32.totalorder %s13_s18, 6   ;;  %s999_s13 = smov %s895_s27 }
  0xd1   : > { %s1000_s14 = smov %s807_s16  ;;  %s1001_s15 = smov %s811_s17 }
  0xd2   : > { %s1002_s16 = smov %s1005_s19  ;;  %s1003_s17 = smov %s1009_s20 }
  0xd3   :  { %12 = sbr.rel (!%p10_p12) target bundleno = 4 (0x4), region = 157 }

// kernel: style_loss.12
= control target key start
LH: loop header
LB: loop body
LE: loop exit
PB: predicated region body
PF: predicated region fallthrough
CT: control target
= control target key end

     0   :  { %6 = vsyncpa [#allocation6], 0  ;;  %s673_s6 = smov 0   ;;  %s675_s7 = smov 0   ;;  %s796_s0 = inlined_call_operand.vmem [shape: bf16[2,64,256], index: 0, kind: input, shape index: {}]   ;;  %s797_s1 = inlined_call_operand.hbm [shape: f32[1,1], index: 1, kind: output, shape index: {}]  }
   0x1   :  { %s677_s8 = smov 0  }
   0x2 LB: > { %s689_s9 = sadd.s32 4294967295, %s659_s8   ;;  %s692_s10 = sadd.s32 1, %s659_s8   ;;  %s659_s8 = sphi %s677_s8, %s800_s8   ;;  %s655_s7 = sphi %s675_s7, %s799_s7   ;;  %s651_s6 = sphi %s673_s6, %s798_s6  }
   0x3   : > { %s16_s11 = ssub.s32 %s659_s8, %s692_s10  ;;  %s19_s12 = sadd.s32 1, %s655_s7 }
   0x4   : > { %p17_p0 = scmp.eq.s32.totalorder %s16_s11, 0  ;;  %p26_p1 = scmp.ne.s32.totalorder %s655_s7, %s651_s6 }
   0x5   : > { %p27_p2 = scmp.eq.s32.totalorder %s659_s8, 0  ;;  %p518_p4 = scmp.ge.s32.totalorder %s659_s8, 2 }
   0x6   : > { %s701_s13 = scalar_select %p17_p0, %s655_s7, %s19_s12  }
   0x7   : > { %p28_p3 = por %p27_p2, %p26_p1  ;;  %73 = sbr.rel (%p518_p4) target bundleno = 32 (0x20), region = 16 }
   0xc   : > { %76 = sbr.rel (!%p28_p3) target bundleno = 32 (0x20), region = 20  ;;  %s78_s14 = sand.u32 (%p28_p3), 1, %s655_s7  }
   0xd   : > { %s520_s15 = sshll.u32 (%p28_p3), %s659_s8, 2  ;;  %s519_s16 = sshll.u32 (%p28_p3), %s78_s14, 6 }
   0xe   : > { %s709_s19 = scalar_lea.vmem (%p28_p3), %s796_s0, %s520_s15  ;;  %s80_s20 = scalar_lea.vmem (%p28_p3), [#allocation4], %s519_s16 }
   0xf   : > { %v99_v0 = vld [vmem:[%s709_s19] sm:$0xf] (%p28_p3)  ;;  %v101_v1 = vld [vmem:[%s709_s19 + $0x8] sm:$0xf] (%p28_p3)  ;;  %v103_v2 = vld [vmem:[%s709_s19 + $0x10] sm:$0xf] (%p28_p3) }
  0x10   : > { %100 = vst [vmem:[%s80_s20] sm:$0xf] (%p28_p3), %v99_v0  ;;  %v105_v3 = vld [vmem:[%s709_s19 + $0x18] sm:$0xf] (%p28_p3)  ;;  %v107_v4 = vld [vmem:[%s709_s19 + $0x20] sm:$0xf] (%p28_p3) }
  0x11   : > { %102 = vst [vmem:[%s80_s20 + $0x4] sm:$0xf] %v101_v1  ;;  %v109_v5 = vld [vmem:[%s709_s19 + $0x28] sm:$0xf]  ;;  %v111_v6 = vld [vmem:[%s709_s19 + $0x30] sm:$0xf] }
  0x12   : > { %104 = vst [vmem:[%s80_s20 + $0x8] sm:$0xf] %v103_v2  ;;  %v113_v7 = vld [vmem:[%s709_s19 + $0x38] sm:$0xf]  ;;  %v115_v8 = vld [vmem:[%s709_s19 + $0x40] sm:$0xf] }
  0x13   : > { %106 = vst [vmem:[%s80_s20 + $0xc] sm:$0xf] %v105_v3  ;;  %v117_v9 = vld [vmem:[%s709_s19 + $0x48] sm:$0xf]  ;;  %v119_v10 = vld [vmem:[%s709_s19 + $0x50] sm:$0xf] }
  0x14   : > { %108 = vst [vmem:[%s80_s20 + $0x10] sm:$0xf] %v107_v4  ;;  %v121_v11 = vld [vmem:[%s709_s19 + $0x58] sm:$0xf]  ;;  %v123_v12 = vld [vmem:[%s709_s19 + $0x60] sm:$0xf] }
  0x15   : > { %110 = vst [vmem:[%s80_s20 + $0x14] sm:$0xf] %v109_v5  ;;  %v125_v13 = vld [vmem:[%s709_s19 + $0x68] sm:$0xf]  ;;  %v127_v14 = vld [vmem:[%s709_s19 + $0x70] sm:$0xf] }
  0x16   : > { %112 = vst [vmem:[%s80_s20 + $0x18] sm:$0xf] %v111_v6  ;;  %v129_v15 = vld [vmem:[%s709_s19 + $0x78] sm:$0xf] }
  0x17   : > { %114 = vst [vmem:[%s80_s20 + $0x1c] sm:$0xf] %v113_v7 }
  0x18   : > { %116 = vst [vmem:[%s80_s20 + $0x20] sm:$0xf] %v115_v8 }
  0x19   : > { %118 = vst [vmem:[%s80_s20 + $0x24] sm:$0xf] %v117_v9 }
  0x1a   : > { %120 = vst [vmem:[%s80_s20 + $0x28] sm:$0xf] %v119_v10 }
  0x1b   : > { %122 = vst [vmem:[%s80_s20 + $0x2c] sm:$0xf] %v121_v11 }
  0x1c   : > { %124 = vst [vmem:[%s80_s20 + $0x30] sm:$0xf] %v123_v12 }
  0x1d   : > { %126 = vst [vmem:[%s80_s20 + $0x34] sm:$0xf] %v125_v13 }
  0x1e   : > { %128 = vst [vmem:[%s80_s20 + $0x38] sm:$0xf] %v127_v14 }
  0x1f   : > { %130 = vst [vmem:[%s80_s20 + $0x3c] sm:$0xf] %v129_v15 }
  0x20 PF: > { %p521_p5 = scmp.ge.s32.totalorder %s659_s8, 1  ;;  %p185_p6 = scmp.lt.s32.totalorder %s659_s8, 3 }
  0x22   : > { %p186_p7 = pnand %p521_p5, %p185_p6 }
  0x23   : > { %s192_s21 = sand.u32 (!%p186_p7), 1, %s651_s6   ;;  %p523_p8 = scmp.ne.s32.totalorder (!%p186_p7), %s689_s9, 0 }
  0x24   : > { %189 = sbr.rel (%p186_p7) target bundleno = 464 (0x1d0), region = 61  ;;  %s522_s22 = sshll.u32 (!%p186_p7), %s192_s21, 6 }
  0x25   : > { %s730_s23 = scalar_lea.vmem (!%p186_p7), [#allocation4], %s522_s22 }
  0x29   : > { %210 = sbr.rel (%p523_p8) target bundleno = 63 (0x3f), region = 69 }
  0x2e   : > { %vm211_vm0 = vcmask 523264   ;;  %v661_v16 = vmov 0.0  }
  0x2f   : > { %212 = vst.msk [vmem:[#allocation2] sm:$0xff] %vm211_vm0, %v661_v16 }
  0x30   : > { %213 = vst.msk [vmem:[#allocation2 + $0x8] sm:$0xff] %vm211_vm0, %v661_v16 }
  0x31   : > { %214 = vst.msk [vmem:[#allocation2 + $0x10] sm:$0xff] %vm211_vm0, %v661_v16 }
  0x32   : > { %215 = vst.msk [vmem:[#allocation2 + $0x18] sm:$0xff] %vm211_vm0, %v661_v16 }
  0x33   : > { %216 = vst.msk [vmem:[#allocation2 + $0x20] sm:$0xff] %vm211_vm0, %v661_v16 }
  0x34   : > { %217 = vst.msk [vmem:[#allocation2 + $0x28] sm:$0xff] %vm211_vm0, %v661_v16 }
  0x35   : > { %218 = vst.msk [vmem:[#allocation2 + $0x30] sm:$0xff] %vm211_vm0, %v661_v16 }
  0x36   : > { %219 = vst.msk [vmem:[#allocation2 + $0x38] sm:$0xff] %vm211_vm0, %v661_v16 }
  0x37   : > { %220 = vst.msk [vmem:[#allocation3] sm:$0xff] %vm211_vm0, %v661_v16 }
  0x38   : > { %221 = vst.msk [vmem:[#allocation3 + $0x8] sm:$0xff] %vm211_vm0, %v661_v16 }
  0x39   : > { %222 = vst.msk [vmem:[#allocation3 + $0x10] sm:$0xff] %vm211_vm0, %v661_v16 }
  0x3a   : > { %223 = vst.msk [vmem:[#allocation3 + $0x18] sm:$0xff] %vm211_vm0, %v661_v16 }
  0x3b   : > { %224 = vst.msk [vmem:[#allocation3 + $0x20] sm:$0xff] %vm211_vm0, %v661_v16 }
  0x3c   : > { %225 = vst.msk [vmem:[#allocation3 + $0x28] sm:$0xff] %vm211_vm0, %v661_v16 }
  0x3d   : > { %226 = vst.msk [vmem:[#allocation3 + $0x30] sm:$0xff] %vm211_vm0, %v661_v16 }
  0x3e   : > { %227 = vst.msk [vmem:[#allocation3 + $0x38] sm:$0xff] %vm211_vm0, %v661_v16 }
  0x3f PF: > { %v572_v17 = vld [vmem:[%s730_s23 + $0x18] sm:$0xff]  ;;  %v571_v19 = vld [vmem:[%s730_s23 + $0x10] sm:$0xff]  ;;  %v570_v21 = vld [vmem:[%s730_s23 + $0x8] sm:$0xff]  ;;  %vm314_vm1 = vcmask 523264   ;;  %p564_p9 = scmp.ne.s32.totalorder %s689_s9, 1 }
  0x40   : > { %v576_v18 = vld [vmem:[%s730_s23 + $0x38] sm:$0xff]  ;;  %281 = vmatpush.bf16.xpose.msra.mxu0 %v572_v17  ;;  %577 = vmatpush.bf16.xpose.msra.mxu2 %v572_v17  ;;  %v575_v20 = vld [vmem:[%s730_s23 + $0x30] sm:$0xff]  ;;  %v574_v22 = vld [vmem:[%s730_s23 + $0x28] sm:$0xff] }
  0x41   : > { %359 = vmatpush.bf16.xpose.msra.mxu1 %v576_v18  ;;  %581 = vmatpush.bf16.xpose.msra.mxu3 %v576_v18  ;;  %v569_v23 = vld [vmem:[%s730_s23] sm:$0xff]  ;;  %v246_v34 = vld [vmem:[#allocation2 + $0x8] sm:$0xff]  ;;  %v247_v46 = vld [vmem:[#allocation2 + $0x10] sm:$0xff] }
  0x42   : > { %v573_v24 = vld [vmem:[%s730_s23 + $0x20] sm:$0xff]  ;;  %v324_v37 = vld [vmem:[#allocation3 + $0x8] sm:$0xff]  ;;  %v325_v49 = vld [vmem:[#allocation3 + $0x10] sm:$0xff] }
  0x43   : > { %v245_v25 = vld [vmem:[#allocation2] sm:$0xff]  ;;  %v250_v43 = vld [vmem:[#allocation2 + $0x28] sm:$0xff]  ;;  %v251_v55 = vld [vmem:[#allocation2 + $0x30] sm:$0xff] }
  0x44   : > { %v323_v26 = vld [vmem:[#allocation3] sm:$0xff]  ;;  %v328_v44 = vld [vmem:[#allocation3 + $0x28] sm:$0xff]  ;;  %v329_v56 = vld [vmem:[#allocation3 + $0x30] sm:$0xff] }
  0x45   : > { %v249_v31 = vld [vmem:[#allocation2 + $0x20] sm:$0xff]  ;;  %v248_v58 = vld [vmem:[#allocation2 + $0x18] sm:$0xff] }
  0x46   : > { %v327_v32 = vld [vmem:[#allocation3 + $0x20] sm:$0xff]  ;;  %v326_v61 = vld [vmem:[#allocation3 + $0x18] sm:$0xff] }
  0x47   : > { %v252_v3 = vld [vmem:[#allocation2 + $0x38] sm:$0xff] }
  0x48   : > { %282 = vmatpush.bf16.xpose.msra.mxu0 %v571_v19  ;;  %578 = vmatpush.bf16.xpose.msra.mxu2 %v571_v19  ;;  %v330_v4 = vld [vmem:[#allocation3 + $0x38] sm:$0xff] }
  0x49   : > { %360 = vmatpush.bf16.xpose.msra.mxu1 %v575_v20  ;;  %582 = vmatpush.bf16.xpose.msra.mxu3 %v575_v20 }
  0x50   : > { %283 = vmatpush.bf16.xpose.msra.mxu0 %v570_v21  ;;  %579 = vmatpush.bf16.xpose.msra.mxu2 %v570_v21 }
  0x51   : > { %361 = vmatpush.bf16.xpose.msra.mxu1 %v574_v22  ;;  %583 = vmatpush.bf16.xpose.msra.mxu3 %v574_v22 }
  0x58   : > { %284 = vmatpush.bf16.xpose.msra.mxu0 %v569_v23  ;;  %580 = vmatpush.bf16.xpose.msra.mxu2 %v569_v23 }
  0x59   : > { %362 = vmatpush.bf16.xpose.msra.mxu1 %v573_v24  ;;  %584 = vmatpush.bf16.xpose.msra.mxu3 %v573_v24 }
  0x5f   : > { %285 = vmatmul.bf16.vlgmr.msra.gmra.mxu0 %v569_v23  ;;  %295 = vmatmul.bf16.vlgmr.msra.gmra.mxu2 %v571_v19 }
  0x60   : > { %363 = vmatmul.bf16.vlgmr.msra.gmra.mxu1 %v573_v24  ;;  %373 = vmatmul.bf16.vlgmr.msra.gmra.mxu3 %v575_v20 }
  0x6f   : > { %290 = vmatmul.bf16.gmra.mxu0 %v570_v21  ;;  %300 = vmatmul.bf16.gmra.mxu2 %v572_v17 }
  0x70   : > { %368 = vmatmul.bf16.gmra.mxu1 %v574_v22  ;;  %378 = vmatmul.bf16.gmra.mxu3 %v576_v18 }
  0xdc   : > { %v286_v27 = vpop.f32.mrf.mxu0 }
  0xdd   : > { %v306_v28 = vadd.f32 %v286_v27, %v245_v25  ;;  %v364_v29 = vpop.f32.mrf.mxu1 }
  0xde   : > { %v384_v30 = vadd.f32 %v364_v29, %v323_v26 }
  0xdf   : > { %315 = vst.msk [vmem:[#allocation2] sm:$0xff] %vm314_vm1, %v306_v28 }
  0xe0   : > { %392 = vst.msk [vmem:[#allocation3] sm:$0xff] %vm314_vm1, %v384_v30 }
  0xe2   : > { %v296_v33 = vpop.f32.mrf.mxu2 }
  0xe3   : > { %v310_v35 = vadd.f32 %v296_v33, %v249_v31  ;;  %v374_v36 = vpop.f32.mrf.mxu3 }
  0xe4   : > { %v388_v38 = vadd.f32 %v374_v36, %v327_v32  ;;  %v288_v39 = vpop.f32.mrf.mxu0 }
  0xe5   : > { %319 = vst.msk [vmem:[#allocation2 + $0x20] sm:$0xff] %vm314_vm1, %v310_v35  ;;  %v307_v40 = vadd.f32 %v288_v39, %v246_v34  ;;  %v366_v41 = vpop.f32.mrf.mxu1 }
  0xe6   : > { %396 = vst.msk [vmem:[#allocation3 + $0x20] sm:$0xff] %vm314_vm1, %v388_v38  ;;  %v385_v42 = vadd.f32 %v366_v41, %v324_v37 }
  0xe7   : > { %316 = vst.msk [vmem:[#allocation2 + $0x8] sm:$0xff] %vm314_vm1, %v307_v40 }
  0xe8   : > { %393 = vst.msk [vmem:[#allocation3 + $0x8] sm:$0xff] %vm314_vm1, %v385_v42 }
  0xea   : > { %v298_v45 = vpop.f32.mrf.mxu2 }
  0xeb   : > { %v311_v47 = vadd.f32 %v298_v45, %v250_v43  ;;  %v376_v48 = vpop.f32.mrf.mxu3 }
  0xec   : > { %v389_v50 = vadd.f32 %v376_v48, %v328_v44  ;;  %v291_v51 = vpop.f32.mrf.mxu0 }
  0xed   : > { %320 = vst.msk [vmem:[#allocation2 + $0x28] sm:$0xff] %vm314_vm1, %v311_v47  ;;  %v308_v52 = vadd.f32 %v291_v51, %v247_v46  ;;  %v369_v53 = vpop.f32.mrf.mxu1 }
  0xee   : > { %397 = vst.msk [vmem:[#allocation3 + $0x28] sm:$0xff] %vm314_vm1, %v389_v50  ;;  %v386_v54 = vadd.f32 %v369_v53, %v325_v49 }
  0xef   : > { %317 = vst.msk [vmem:[#allocation2 + $0x10] sm:$0xff] %vm314_vm1, %v308_v52 }
  0xf0   : > { %394 = vst.msk [vmem:[#allocation3 + $0x10] sm:$0xff] %vm314_vm1, %v386_v54 }
  0xf2   : > { %v301_v57 = vpop.f32.mrf.mxu2 }
  0xf3   : > { %v312_v59 = vadd.f32 %v301_v57, %v251_v55  ;;  %v379_v60 = vpop.f32.mrf.mxu3 }
  0xf4   : > { %v390_v62 = vadd.f32 %v379_v60, %v329_v56  ;;  %v293_v63 = vpop.f32.mrf.mxu0 }
  0xf5   : > { %321 = vst.msk [vmem:[#allocation2 + $0x30] sm:$0xff] %vm314_vm1, %v312_v59  ;;  %v309_v0 = vadd.f32 %v293_v63, %v248_v58  ;;  %v371_v1 = vpop.f32.mrf.mxu1 }
  0xf6   : > { %398 = vst.msk [vmem:[#allocation3 + $0x30] sm:$0xff] %vm314_vm1, %v390_v62  ;;  %v387_v2 = vadd.f32 %v371_v1, %v326_v61 }
  0xf7   : > { %318 = vst.msk [vmem:[#allocation2 + $0x18] sm:$0xff] %vm314_vm1, %v309_v0 }
  0xf8   : > { %395 = vst.msk [vmem:[#allocation3 + $0x18] sm:$0xff] %vm314_vm1, %v387_v2 }
  0xfa   : > { %v303_v5 = vpop.f32.mrf.mxu2  ;;  %403 = sbr.rel (%p564_p9) target bundleno = 458 (0x1ca), region = 73 }
  0xfb   : > { %v313_v6 = vadd.f32 %v303_v5, %v252_v3  ;;  %v381_v7 = vpop.f32.mrf.mxu3 }
  0xfc   : > { %v391_v8 = vadd.f32 %v381_v7, %v330_v4 }
  0xfd   : > { %322 = vst.msk [vmem:[#allocation2 + $0x38] sm:$0xff] %vm314_vm1, %v313_v6 }
  0xfe   : > { %399 = vst.msk [vmem:[#allocation3 + $0x38] sm:$0xff] %vm314_vm1, %v391_v8 }
  0xff   : > { %v404_v9 = vld [vmem:[#allocation2] sm:$0xff]  ;;  %v405_v10 = vld [vmem:[#allocation2 + $0x8] sm:$0xff]  ;;  %v406_v11 = vld [vmem:[#allocation2 + $0x10] sm:$0xff] }
 0x100   : > { %v407_v12 = vld [vmem:[#allocation2 + $0x18] sm:$0xff]  ;;  %v408_v13 = vld [vmem:[#allocation2 + $0x20] sm:$0xff]  ;;  %v409_v14 = vld [vmem:[#allocation2 + $0x28] sm:$0xff] }
 0x101   : > { %v412_v15 = vld [vmem:[#allocation3] sm:$0xff]  ;;  %v413_v16 = vld [vmem:[#allocation3 + $0x8] sm:$0xff]  ;;  %v414_v17 = vld [vmem:[#allocation3 + $0x10] sm:$0xff] }
 0x102   : > { %v415_v18 = vld [vmem:[#allocation3 + $0x18] sm:$0xff]  ;;  %v420_v19 = vsub.f32 %v404_v9, %v412_v15  ;;  %v416_v20 = vld [vmem:[#allocation3 + $0x20] sm:$0xff]  ;;  %v417_v21 = vld [vmem:[#allocation3 + $0x28] sm:$0xff]  ;;  %v421_v22 = vsub.f32 %v405_v10, %v413_v16  ;;  %v422_v23 = vsub.f32 %v406_v11, %v414_v17 }
 0x103   : > { %v423_v24 = vsub.f32 %v407_v12, %v415_v18  ;;  %v410_v25 = vld [vmem:[#allocation2 + $0x30] sm:$0xff]  ;;  %v424_v27 = vsub.f32 %v408_v13, %v416_v20  ;;  %v425_v29 = vsub.f32 %v409_v14, %v417_v21 }
 0x104   : > { %v418_v26 = vld [vmem:[#allocation3 + $0x30] sm:$0xff]  ;;  %v428_v28 = vmul.f32 %v420_v19, %v420_v19  ;;  %v429_v30 = vmul.f32 %v421_v22, %v421_v22  ;;  %v430_v31 = vmul.f32 %v422_v23, %v422_v23  ;;  %v411_v33 = vld [vmem:[#allocation2 + $0x38] sm:$0xff] }
 0x105   : > { %v431_v32 = vmul.f32 %v423_v24, %v423_v24  ;;  %v419_v34 = vld [vmem:[#allocation3 + $0x38] sm:$0xff]  ;;  %v426_v36 = vsub.f32 %v410_v25, %v418_v26  ;;  %v432_v37 = vmul.f32 %v424_v27, %v424_v27  ;;  %v433_v42 = vmul.f32 %v425_v29, %v425_v29 }
 0x106   : > { %v436_v35 = vsel %vm314_vm1, %v428_v28, 0.0  ;;  %v437_v38 = vsel %vm314_vm1, %v429_v30, 0.0  ;;  %v439_v39 = vsel %vm314_vm1, %v430_v31, 0.0  ;;  %v427_v41 = vsub.f32 %v411_v33, %v419_v34 }
 0x107   : > { %v438_v40 = vadd.f32 %v437_v38, %v436_v35  ;;  %v441_v43 = vsel %vm314_vm1, %v431_v32, 0.0  ;;  %v434_v45 = vmul.f32 %v426_v36, %v426_v36  ;;  %v443_v46 = vsel %vm314_vm1, %v432_v37, 0.0 }
 0x108   : > { %v435_v48 = vmul.f32 %v427_v41, %v427_v41  ;;  %v445_v49 = vsel %vm314_vm1, %v433_v42, 0.0 }
 0x109   : > { %v440_v44 = vadd.f32 %v439_v39, %v438_v40  ;;  %v447_v51 = vsel %vm314_vm1, %v434_v45, 0.0 }
 0x10a   : > { %v449_v53 = vsel %vm314_vm1, %v435_v48, 0.0 }
 0x10b   : > { %v442_v47 = vadd.f32 %v441_v43, %v440_v44 }
 0x10d   : > { %v444_v50 = vadd.f32 %v443_v46, %v442_v47 }
 0x10f   : > { %v446_v52 = vadd.f32 %v445_v49, %v444_v50 }
 0x111   : > { %v448_v54 = vadd.f32 %v447_v51, %v446_v52 }
 0x113   : > { %v450_v55 = vadd.f32 %v449_v53, %v448_v54 }
 0x115   : > { %451 = vadd.xlane.f32.xlu0 %v450_v55 }
 0x188   : > { %v452_v56 = vpop.xlane.xlu0 %451 }
 0x189   : > { %v453_v57 = vrot.slane %v452_v56, 4 }
 0x18b   : > { %v454_v58 = vadd.f32 %v453_v57, %v452_v56 }
 0x18d   : > { %v455_v59 = vrot.slane %v454_v58, 2 }
 0x18f   : > { %v456_v60 = vadd.f32 %v455_v59, %v454_v58 }
 0x191   : > { %v457_v61 = vrot.slane %v456_v60, 1 }
 0x193   : > { %v458_v62 = vadd.f32 %v457_v61, %v456_v60 }
 0x195   : > { %585 = vpush %v458_v62 }
 0x1c6   : > { %s586_s24 = spop %585 }
 0x1c7   : > { %s460_s25 = smul.f32 5.684342e-14, %s586_s24 }
 0x1c9   : > { %462 = sst [smem:[#allocation5]] %s460_s25 }
 0x1ca PF: > { %p591_p10 = scmp.eq.s32.totalorder %s689_s9, 1  ;;  %s469_s28 = sshll.u32 %s797_s1, 4  ;;  %s470_s28 = int_to_ptr.hbm [resolvable:$true] %s469_s28 }
 0x1cb   : > { %s662_s29 = smov [#allocation5]  }
 0x1cc   : > { %588 = dma.smem_to_hbm (%p591_p10), %s662_s29, 16, %s470_s28, [#allocation6]  }
 0x1cd   : > { %646 = dma.done.wait (%p591_p10), [#allocation6], 16  }
 0x1ce   : > { %648 = vsyncadd (%p591_p10), [#allocation6], 4294967280 }
 0x1cf   : > { %478 = sfence }
 0x1d0 PF: > { %p9_p11 = scmp.ge.s32.totalorder %s692_s10, 4   ;;  %s798_s6 = smov %s655_s7 }
 0x1d1   : > { %s799_s7 = smov %s701_s13  ;;  %s800_s8 = smov %s692_s10 }
 0x1d2   :  { %11 = sbr.rel (!%p9_p11) target bundleno = 2 (0x2), region = 107 }
 0x1d7   :  { %484 = vsyncpa [#allocation6], 1 }
 0x1d8   :  { %486 = vsyncpa [#allocation6 + $0x1], 1 }

// kernel: style_loss.9
= control target key start
LH: loop header
LB: loop body
LE: loop exit
PB: predicated region body
PF: predicated region fallthrough
CT: control target
= control target key end

     0   :  { %s1852_s12 = smov 0   ;;  %s1854_s13 = smov 0   ;;  %s2310_s0 = inlined_call_operand.vmem [shape: bf16[2,576,256], index: 0, kind: input, shape index: {}]   ;;  %s2311_s1 = inlined_call_operand.vmem [shape: bf16[64,576], index: 1, kind: input, shape index: {}]   ;;  %s2312_s2 = inlined_call_operand.vmem [shape: f32[64,1], index: 2, kind: input, shape index: {}]   ;;  %s2313_s3 = inlined_call_operand.vmem [shape: f32[2,64,256], index: 3, kind: output, shape index: {}]  }
   0x1   :  { %s1856_s14 = smov 0   ;;  %s1858_s15 = smov 0  }
   0x2   :  { %s1860_s16 = smov 0   ;;  %s1862_s17 = smov 0  }
   0x3   :  { %s1864_s18 = smov 0  }
   0x4 LB: > { %s28_s19 = sadd.s32 1, %s1821_s16  ;;  %s32_s20 = sadd.s32 1, %s1825_s17  ;;  %s1829_s18 = sphi %s1864_s18, %s13_s18   ;;  %s1825_s17 = sphi %s1862_s17, %s2320_s17   ;;  %s1821_s16 = sphi %s1860_s16, %s2319_s16   ;;  %s1817_s15 = sphi %s1858_s15, %s2318_s15   ;;  %s1813_s14 = sphi %s1856_s14, %s2317_s14   ;;  %s1809_s13 = sphi %s1854_s13, %s2316_s13   ;;  %s1805_s12 = sphi %s1852_s12, %s2315_s12  }
   0x5   : > { %p30_p0 = scmp.ge.s32.totalorder %s28_s19, 2  ;;  %s1399_s21 = sadd.s32 4294967295, %s1829_s18  }
   0x6   : > { %p50_p1 = scmp.ne.s32.totalorder %s1809_s13, %s1805_s12  ;;  %p51_p2 = scmp.eq.s32.totalorder %s1829_s18, 0 }
   0x7   : > { %s2322_s19 = smov (%p30_p0, %s28_s19), 0  ;;  %s2324_s20 = smov (!%p30_p0, %s32_s20), %s1825_s17 }
   0x8   : > { %p34_p3 = scmp.ge.s32.totalorder %s2324_s20, 2  ;;  %p129_p4 = scmp.eq.s32.totalorder %s1399_s21, 3 }
   0x9   : > { %s39_s22 = ssub.s32 %s1821_s16, %s2322_s19  ;;  %p52_p5 = por %p51_p2, %p50_p1 }
   0xa   : > { %s2326_s20 = smov (%p34_p3, %s2324_s20), 0  ;;  %p1900_p6 = por %p129_p4, %p50_p1 }
   0xb   : > { %s36_s24 = ssub.s32 %s1825_s17, %s2326_s20  ;;  %s43_s26 = sadd.s32 1, %s1809_s13 }
   0xc   : > { %s40_s25 = sor.u32 %s39_s22, %s36_s24  ;;  %p1403_p8 = scmp.ge.s32.totalorder %s1829_s18, 4 }
   0xd   : > { %p41_p7 = scmp.eq.s32.totalorder %s40_s25, 0 }
   0xe   : > { %163 = sbr.rel (%p1403_p8) target bundleno = 98 (0x62), region = 24 }
   0xf   : > { %s1908_s27 = scalar_select %p41_p7, %s1809_s13, %s43_s26  }
  0x13   : > { %166 = sbr.rel (!%p52_p5) target bundleno = 98 (0x62), region = 28  ;;  %s168_s28 = sand.u32 (%p52_p5), 1, %s1809_s13  }
  0x14   : > { %s1713_s29 = smul.u32 (%p52_p5), 144, %s1825_s17 }
  0x15   : > { %s1712_s30 = smul.u32 (%p52_p5), 288, %s168_s28 }
  0x16   : > { %s175_s4 = sadd.s32 (%p52_p5), %s1821_s16, %s1713_s29 }
  0x17   : > { %s1404_s5 = sshll.u32 (%p52_p5), %s175_s4, 2  ;;  %s1922_s9 = scalar_lea.vmem (%p52_p5), [#allocation3], %s1712_s30 }
  0x18   : > { %s1917_s8 = scalar_lea.vmem %s2310_s0, %s1404_s5 }
  0x19   : > { %v194_v0 = vld [vmem:[%s1917_s8] sm:$0xf]  ;;  %v196_v1 = vld [vmem:[%s1917_s8 + $0x8] sm:$0xf]  ;;  %v198_v2 = vld [vmem:[%s1917_s8 + $0x10] sm:$0xf] }
  0x1a   : > { %195 = vst [vmem:[%s1922_s9] sm:$0xf] %v194_v0  ;;  %v200_v3 = vld [vmem:[%s1917_s8 + $0x18] sm:$0xf]  ;;  %v202_v4 = vld [vmem:[%s1917_s8 + $0x20] sm:$0xf] }
  0x1b   : > { %197 = vst [vmem:[%s1922_s9 + $0x4] sm:$0xf] %v196_v1  ;;  %v204_v5 = vld [vmem:[%s1917_s8 + $0x28] sm:$0xf]  ;;  %v206_v6 = vld [vmem:[%s1917_s8 + $0x30] sm:$0xf] }
  0x1c   : > { %199 = vst [vmem:[%s1922_s9 + $0x8] sm:$0xf] %v198_v2  ;;  %v208_v7 = vld [vmem:[%s1917_s8 + $0x38] sm:$0xf]  ;;  %v210_v8 = vld [vmem:[%s1917_s8 + $0x40] sm:$0xf] }
  0x1d   : > { %201 = vst [vmem:[%s1922_s9 + $0xc] sm:$0xf] %v200_v3  ;;  %v212_v9 = vld [vmem:[%s1917_s8 + $0x48] sm:$0xf]  ;;  %v214_v10 = vld [vmem:[%s1917_s8 + $0x50] sm:$0xf] }
  0x1e   : > { %203 = vst [vmem:[%s1922_s9 + $0x10] sm:$0xf] %v202_v4  ;;  %v216_v11 = vld [vmem:[%s1917_s8 + $0x58] sm:$0xf]  ;;  %v218_v12 = vld [vmem:[%s1917_s8 + $0x60] sm:$0xf] }
  0x1f   : > { %205 = vst [vmem:[%s1922_s9 + $0x14] sm:$0xf] %v204_v5  ;;  %v220_v13 = vld [vmem:[%s1917_s8 + $0x68] sm:$0xf]  ;;  %v222_v14 = vld [vmem:[%s1917_s8 + $0x70] sm:$0xf] }
  0x20   : > { %207 = vst [vmem:[%s1922_s9 + $0x18] sm:$0xf] %v206_v6  ;;  %v224_v15 = vld [vmem:[%s1917_s8 + $0x78] sm:$0xf]  ;;  %v226_v16 = vld [vmem:[%s1917_s8 + $0x80] sm:$0xf] }
  0x21   : > { %209 = vst [vmem:[%s1922_s9 + $0x1c] sm:$0xf] %v208_v7  ;;  %v228_v17 = vld [vmem:[%s1917_s8 + $0x88] sm:$0xf]  ;;  %v230_v18 = vld [vmem:[%s1917_s8 + $0x90] sm:$0xf] }
  0x22   : > { %211 = vst [vmem:[%s1922_s9 + $0x20] sm:$0xf] %v210_v8  ;;  %v232_v19 = vld [vmem:[%s1917_s8 + $0x98] sm:$0xf]  ;;  %v234_v20 = vld [vmem:[%s1917_s8 + $0xa0] sm:$0xf] }
  0x23   : > { %213 = vst [vmem:[%s1922_s9 + $0x24] sm:$0xf] %v212_v9  ;;  %v236_v21 = vld [vmem:[%s1917_s8 + $0xa8] sm:$0xf]  ;;  %v238_v22 = vld [vmem:[%s1917_s8 + $0xb0] sm:$0xf] }
  0x24   : > { %215 = vst [vmem:[%s1922_s9 + $0x28] sm:$0xf] %v214_v10  ;;  %v240_v23 = vld [vmem:[%s1917_s8 + $0xb8] sm:$0xf]  ;;  %v242_v24 = vld [vmem:[%s1917_s8 + $0xc0] sm:$0xf] }
  0x25   : > { %217 = vst [vmem:[%s1922_s9 + $0x2c] sm:$0xf] %v216_v11  ;;  %v244_v25 = vld [vmem:[%s1917_s8 + $0xc8] sm:$0xf]  ;;  %v246_v26 = vld [vmem:[%s1917_s8 + $0xd0] sm:$0xf] }
  0x26   : > { %219 = vst [vmem:[%s1922_s9 + $0x30] sm:$0xf] %v218_v12  ;;  %v248_v27 = vld [vmem:[%s1917_s8 + $0xd8] sm:$0xf]  ;;  %v250_v28 = vld [vmem:[%s1917_s8 + $0xe0] sm:$0xf] }
  0x27   : > { %221 = vst [vmem:[%s1922_s9 + $0x34] sm:$0xf] %v220_v13  ;;  %v252_v29 = vld [vmem:[%s1917_s8 + $0xe8] sm:$0xf]  ;;  %v254_v30 = vld [vmem:[%s1917_s8 + $0xf0] sm:$0xf] }
  0x28   : > { %223 = vst [vmem:[%s1922_s9 + $0x38] sm:$0xf] %v222_v14  ;;  %v256_v31 = vld [vmem:[%s1917_s8 + $0xf8] sm:$0xf]  ;;  %v258_v32 = vld [vmem:[%s1917_s8 + $0x100] sm:$0xf] }
  0x29   : > { %225 = vst [vmem:[%s1922_s9 + $0x3c] sm:$0xf] %v224_v15  ;;  %v260_v33 = vld [vmem:[%s1917_s8 + $0x108] sm:$0xf]  ;;  %v262_v34 = vld [vmem:[%s1917_s8 + $0x110] sm:$0xf] }
  0x2a   : > { %227 = vst [vmem:[%s1922_s9 + $0x40] sm:$0xf] %v226_v16  ;;  %v264_v35 = vld [vmem:[%s1917_s8 + $0x118] sm:$0xf]  ;;  %v266_v36 = vld [vmem:[%s1917_s8 + $0x120] sm:$0xf] }
  0x2b   : > { %229 = vst [vmem:[%s1922_s9 + $0x44] sm:$0xf] %v228_v17  ;;  %v268_v37 = vld [vmem:[%s1917_s8 + $0x128] sm:$0xf]  ;;  %v270_v38 = vld [vmem:[%s1917_s8 + $0x130] sm:$0xf] }
  0x2c   : > { %231 = vst [vmem:[%s1922_s9 + $0x48] sm:$0xf] %v230_v18  ;;  %v272_v39 = vld [vmem:[%s1917_s8 + $0x138] sm:$0xf]  ;;  %v274_v40 = vld [vmem:[%s1917_s8 + $0x140] sm:$0xf] }
  0x2d   : > { %233 = vst [vmem:[%s1922_s9 + $0x4c] sm:$0xf] %v232_v19  ;;  %v276_v41 = vld [vmem:[%s1917_s8 + $0x148] sm:$0xf]  ;;  %v278_v42 = vld [vmem:[%s1917_s8 + $0x150] sm:$0xf] }
  0x2e   : > { %235 = vst [vmem:[%s1922_s9 + $0x50] sm:$0xf] %v234_v20  ;;  %v280_v43 = vld [vmem:[%s1917_s8 + $0x158] sm:$0xf]  ;;  %v282_v44 = vld [vmem:[%s1917_s8 + $0x160] sm:$0xf] }
  0x2f   : > { %237 = vst [vmem:[%s1922_s9 + $0x54] sm:$0xf] %v236_v21  ;;  %v284_v45 = vld [vmem:[%s1917_s8 + $0x168] sm:$0xf]  ;;  %v286_v46 = vld [vmem:[%s1917_s8 + $0x170] sm:$0xf] }
  0x30   : > { %239 = vst [vmem:[%s1922_s9 + $0x58] sm:$0xf] %v238_v22  ;;  %v288_v47 = vld [vmem:[%s1917_s8 + $0x178] sm:$0xf]  ;;  %v290_v48 = vld [vmem:[%s1917_s8 + $0x180] sm:$0xf] }
  0x31   : > { %241 = vst [vmem:[%s1922_s9 + $0x5c] sm:$0xf] %v240_v23  ;;  %v292_v49 = vld [vmem:[%s1917_s8 + $0x188] sm:$0xf]  ;;  %v294_v50 = vld [vmem:[%s1917_s8 + $0x190] sm:$0xf] }
  0x32   : > { %243 = vst [vmem:[%s1922_s9 + $0x60] sm:$0xf] %v242_v24  ;;  %v296_v51 = vld [vmem:[%s1917_s8 + $0x198] sm:$0xf]  ;;  %v298_v52 = vld [vmem:[%s1917_s8 + $0x1a0] sm:$0xf] }
  0x33   : > { %245 = vst [vmem:[%s1922_s9 + $0x64] sm:$0xf] %v244_v25  ;;  %v300_v53 = vld [vmem:[%s1917_s8 + $0x1a8] sm:$0xf]  ;;  %v302_v54 = vld [vmem:[%s1917_s8 + $0x1b0] sm:$0xf] }
  0x34   : > { %247 = vst [vmem:[%s1922_s9 + $0x68] sm:$0xf] %v246_v26  ;;  %v304_v55 = vld [vmem:[%s1917_s8 + $0x1b8] sm:$0xf]  ;;  %v306_v56 = vld [vmem:[%s1917_s8 + $0x1c0] sm:$0xf] }
  0x35   : > { %249 = vst [vmem:[%s1922_s9 + $0x6c] sm:$0xf] %v248_v27  ;;  %v308_v57 = vld [vmem:[%s1917_s8 + $0x1c8] sm:$0xf]  ;;  %v310_v58 = vld [vmem:[%s1917_s8 + $0x1d0] sm:$0xf] }
  0x36   : > { %251 = vst [vmem:[%s1922_s9 + $0x70] sm:$0xf] %v250_v28  ;;  %v312_v59 = vld [vmem:[%s1917_s8 + $0x1d8] sm:$0xf]  ;;  %v314_v60 = vld [vmem:[%s1917_s8 + $0x1e0] sm:$0xf] }
  0x37   : > { %253 = vst [vmem:[%s1922_s9 + $0x74] sm:$0xf] %v252_v29  ;;  %v316_v61 = vld [vmem:[%s1917_s8 + $0x1e8] sm:$0xf]  ;;  %v318_v62 = vld [vmem:[%s1917_s8 + $0x1f0] sm:$0xf] }
  0x38   : > { %255 = vst [vmem:[%s1922_s9 + $0x78] sm:$0xf] %v254_v30  ;;  %v320_v63 = vld [vmem:[%s1917_s8 + $0x1f8] sm:$0xf]  ;;  %v322_v0 = vld [vmem:[%s1917_s8 + $0x200] sm:$0xf] }
  0x39   : > { %257 = vst [vmem:[%s1922_s9 + $0x7c] sm:$0xf] %v256_v31  ;;  %v324_v1 = vld [vmem:[%s1917_s8 + $0x208] sm:$0xf]  ;;  %v326_v2 = vld [vmem:[%s1917_s8 + $0x210] sm:$0xf] }
  0x3a   : > { %259 = vst [vmem:[%s1922_s9 + $0x80] sm:$0xf] %v258_v32  ;;  %v328_v3 = vld [vmem:[%s1917_s8 + $0x218] sm:$0xf]  ;;  %v330_v4 = vld [vmem:[%s1917_s8 + $0x220] sm:$0xf] }
  0x3b   : > { %261 = vst [vmem:[%s1922_s9 + $0x84] sm:$0xf] %v260_v33  ;;  %v332_v5 = vld [vmem:[%s1917_s8 + $0x228] sm:$0xf]  ;;  %v334_v6 = vld [vmem:[%s1917_s8 + $0x230] sm:$0xf] }
  0x3c   : > { %263 = vst [vmem:[%s1922_s9 + $0x88] sm:$0xf] %v262_v34  ;;  %v336_v7 = vld [vmem:[%s1917_s8 + $0x238] sm:$0xf] }
  0x3d   : > { %265 = vst [vmem:[%s1922_s9 + $0x8c] sm:$0xf] %v264_v35 }
  0x3e   : > { %267 = vst [vmem:[%s1922_s9 + $0x90] sm:$0xf] %v266_v36 }
  0x3f   : > { %269 = vst [vmem:[%s1922_s9 + $0x94] sm:$0xf] %v268_v37 }
  0x40   : > { %271 = vst [vmem:[%s1922_s9 + $0x98] sm:$0xf] %v270_v38 }
  0x41   : > { %273 = vst [vmem:[%s1922_s9 + $0x9c] sm:$0xf] %v272_v39 }
  0x42   : > { %275 = vst [vmem:[%s1922_s9 + $0xa0] sm:$0xf] %v274_v40 }
  0x43   : > { %277 = vst [vmem:[%s1922_s9 + $0xa4] sm:$0xf] %v276_v41 }
  0x44   : > { %279 = vst [vmem:[%s1922_s9 + $0xa8] sm:$0xf] %v278_v42 }
  0x45   : > { %281 = vst [vmem:[%s1922_s9 + $0xac] sm:$0xf] %v280_v43 }
  0x46   : > { %283 = vst [vmem:[%s1922_s9 + $0xb0] sm:$0xf] %v282_v44 }
  0x47   : > { %285 = vst [vmem:[%s1922_s9 + $0xb4] sm:$0xf] %v284_v45 }
  0x48   : > { %287 = vst [vmem:[%s1922_s9 + $0xb8] sm:$0xf] %v286_v46 }
  0x49   : > { %289 = vst [vmem:[%s1922_s9 + $0xbc] sm:$0xf] %v288_v47 }
  0x4a   : > { %291 = vst [vmem:[%s1922_s9 + $0xc0] sm:$0xf] %v290_v48 }
  0x4b   : > { %293 = vst [vmem:[%s1922_s9 + $0xc4] sm:$0xf] %v292_v49 }
  0x4c   : > { %295 = vst [vmem:[%s1922_s9 + $0xc8] sm:$0xf] %v294_v50 }
  0x4d   : > { %297 = vst [vmem:[%s1922_s9 + $0xcc] sm:$0xf] %v296_v51 }
  0x4e   : > { %299 = vst [vmem:[%s1922_s9 + $0xd0] sm:$0xf] %v298_v52 }
  0x4f   : > { %301 = vst [vmem:[%s1922_s9 + $0xd4] sm:$0xf] %v300_v53 }
  0x50   : > { %303 = vst [vmem:[%s1922_s9 + $0xd8] sm:$0xf] %v302_v54 }
  0x51   : > { %305 = vst [vmem:[%s1922_s9 + $0xdc] sm:$0xf] %v304_v55 }
  0x52   : > { %307 = vst [vmem:[%s1922_s9 + $0xe0] sm:$0xf] %v306_v56 }
  0x53   : > { %309 = vst [vmem:[%s1922_s9 + $0xe4] sm:$0xf] %v308_v57 }
  0x54   : > { %311 = vst [vmem:[%s1922_s9 + $0xe8] sm:$0xf] %v310_v58 }
  0x55   : > { %313 = vst [vmem:[%s1922_s9 + $0xec] sm:$0xf] %v312_v59 }
  0x56   : > { %315 = vst [vmem:[%s1922_s9 + $0xf0] sm:$0xf] %v314_v60 }
  0x57   : > { %317 = vst [vmem:[%s1922_s9 + $0xf4] sm:$0xf] %v316_v61 }
  0x58   : > { %319 = vst [vmem:[%s1922_s9 + $0xf8] sm:$0xf] %v318_v62 }
  0x59   : > { %321 = vst [vmem:[%s1922_s9 + $0xfc] sm:$0xf] %v320_v63 }
  0x5a   : > { %323 = vst [vmem:[%s1922_s9 + $0x100] sm:$0xf] %v322_v0 }
  0x5b   : > { %325 = vst [vmem:[%s1922_s9 + $0x104] sm:$0xf] %v324_v1 }
  0x5c   : > { %327 = vst [vmem:[%s1922_s9 + $0x108] sm:$0xf] %v326_v2 }
  0x5d   : > { %329 = vst [vmem:[%s1922_s9 + $0x10c] sm:$0xf] %v328_v3 }
  0x5e   : > { %331 = vst [vmem:[%s1922_s9 + $0x110] sm:$0xf] %v330_v4 }
  0x5f   : > { %333 = vst [vmem:[%s1922_s9 + $0x114] sm:$0xf] %v332_v5 }
  0x60   : > { %335 = vst [vmem:[%s1922_s9 + $0x118] sm:$0xf] %v334_v6 }
  0x61   : > { %337 = vst [vmem:[%s1922_s9 + $0x11c] sm:$0xf] %v336_v7 }
  0x62 PF: > { %p1405_p9 = scmp.ge.s32.totalorder %s1829_s18, 1  ;;  %p504_p10 = scmp.lt.s32.totalorder %s1829_s18, 5 }
  0x64   : > { %p505_p11 = pnand %p1405_p9, %p504_p10 }
  0x65   : > { %s511_s10 = sand.u32 (!%p505_p11), 1, %s1805_s12  }
  0x66   : > { %508 = sbr.rel (%p505_p11) target bundleno = 378 (0x17a), region = 69  ;;  %s1406_s5 = sshll.u32 (!%p505_p11), %s511_s10, 6 }
  0x67   : > { %s1714_s11 = smul.u32 (!%p505_p11), 288, %s511_s10  ;;  %s2262_s6 = scalar_lea.vmem (!%p505_p11), [#allocation4], %s1406_s5 }
  0x69   : > { %s2070_s21 = scalar_lea.vmem (!%p505_p11), [#allocation3], %s1714_s11 }
  0x6b   : > { %v1667_v8 = vld [vmem:[%s2070_s21 + $0x38] sm:$0xff]  ;;  %v1666_v9 = vld [vmem:[%s2070_s21 + $0x30] sm:$0xff]  ;;  %v1665_v12 = vld [vmem:[%s2070_s21 + $0x28] sm:$0xff]  ;;  %vm978_vm0 = vcmask 523264   ;;  %v1831_v61 = vmov 0   ;;  %s1636_s12 = sshll.u32 (%p1900_p6), %s1817_s15, 4 }
  0x6c   : > { %1696 = vmatpush.bf16.msra.mxu1 %v1667_v8  ;;  %1697 = vmatpush.bf16.msra.mxu2 %v1667_v8  ;;  %v1691_v10 = vld [vmem:[%s2070_s21 + $0xf8] sm:$0xff]  ;;  %v1690_v11 = vld [vmem:[%s2070_s21 + $0xf0] sm:$0xff]  ;;  %v1689_v13 = vld [vmem:[%s2070_s21 + $0xe8] sm:$0xff]  ;;  %s1243_s10 = sadd.s32 (%p1900_p6), %s1813_s14, %s1636_s12 }
  0x6d   : > { %991 = vmatpush.bf16.msra.mxu0 %v1667_v8  ;;  %1078 = vmatpush.bf16.msra.mxu3 %v1691_v10  ;;  %v1664_v14 = vld [vmem:[%s2070_s21 + $0x20] sm:$0xff]  ;;  %v1663_v16 = vld [vmem:[%s2070_s21 + $0x18] sm:$0xff]  ;;  %v1662_v18 = vld [vmem:[%s2070_s21 + $0x10] sm:$0xff]  ;;  %s1637_s7 = sshll.u32 (%p1900_p6), %s1243_s10, 3 }
  0x6e   : > { %v1688_v15 = vld [vmem:[%s2070_s21 + $0xe0] sm:$0xff]  ;;  %v1687_v17 = vld [vmem:[%s2070_s21 + $0xd8] sm:$0xff]  ;;  %v1686_v19 = vld [vmem:[%s2070_s21 + $0xd0] sm:$0xff]  ;;  %1772 = vset.pattern.permute.xlu0 %v1831_v61  ;;  %1773 = vset.pattern.permute.xlu1 %v1831_v61  ;;  %s1245_s23 = scalar_lea.vmem (%p1900_p6), %s2313_s3, %s1637_s7 }
  0x6f   : > { %v1661_v20 = vld [vmem:[%s2070_s21 + $0x8] sm:$0xff]  ;;  %v1647_v23 = vld [vmem:[%s2311_s1 + $0x38] sm:$0xf0]  ;;  %v1660_v24 = vld [vmem:[%s2070_s21] sm:$0xff]  ;;  %1774 = vset.pattern.permute.xlu2 %v1831_v61 }
  0x70   : > { %1698 = vmatpush.bf16.msra.mxu1 %v1666_v9  ;;  %1699 = vmatpush.bf16.msra.mxu2 %v1666_v9  ;;  %v1685_v21 = vld [vmem:[%s2070_s21 + $0xc8] sm:$0xff]  ;;  %v1469_v25 = vld [vmem:[%s2311_s1 + $0x78] sm:$0xf]  ;;  %v1409_v29 = vld [vmem:[%s2311_s1] sm:$0xf] }
  0x71   : > { %992 = vmatpush.bf16.msra.mxu0 %v1666_v9  ;;  %1079 = vmatpush.bf16.msra.mxu3 %v1690_v11  ;;  %v1429_v22 = vld [vmem:[%s2311_s1 + $0x28] sm:$0xf]  ;;  %v1657_v26 = vld [vmem:[%s2311_s1 + $0x88] sm:$0xf0]  ;;  %v1683_v27 = vld [vmem:[%s2070_s21 + $0xb8] sm:$0xff] }
  0x72   : > { %v1675_v28 = vld [vmem:[%s2070_s21 + $0x78] sm:$0xff]  ;;  %v1684_v30 = vld [vmem:[%s2070_s21 + $0xc0] sm:$0xff]  ;;  %v1430_v31 = vor.u32 %v1647_v23, %v1429_v22  ;;  %v1470_v32 = vor.u32 %v1657_v26, %v1469_v25  ;;  %v1642_v33 = vld [vmem:[%s2311_s1 + $0x10] sm:$0xf0] }
  0x73   : > { %v1641_v34 = vld [vmem:[%s2311_s1 + $0xc] sm:$0xf]  ;;  %v1419_v35 = vld [vmem:[%s2311_s1 + $0x1c] sm:$0xf0]  ;;  %v1695_v36 = vld [vmem:[%s2070_s21 + $0x118] sm:$0xff]  ;;  %v1410_v39 = vor.u32 %v1642_v33, %v1409_v29 }
  0x74   : > { %1700 = vmatpush.bf16.msra.mxu1 %v1665_v12  ;;  %1701 = vmatpush.bf16.msra.mxu2 %v1665_v12  ;;  %v1682_v37 = vld [vmem:[%s2070_s21 + $0xb0] sm:$0xff]  ;;  %v1422_v40 = vor.u32 %v1641_v34, %v1419_v35  ;;  %v1681_v42 = vld [vmem:[%s2070_s21 + $0xa8] sm:$0xff]  ;;  %v1680_v45 = vld [vmem:[%s2070_s21 + $0xa0] sm:$0xff] }
  0x75   : > { %993 = vmatpush.bf16.msra.mxu0 %v1665_v12  ;;  %1080 = vmatpush.bf16.msra.mxu3 %v1689_v13  ;;  %v1674_v38 = vld [vmem:[%s2070_s21 + $0x70] sm:$0xff]  ;;  %v1673_v43 = vld [vmem:[%s2070_s21 + $0x68] sm:$0xff]  ;;  %v1672_v46 = vld [vmem:[%s2070_s21 + $0x60] sm:$0xff] }
  0x76   : > { %v1694_v41 = vld [vmem:[%s2070_s21 + $0x110] sm:$0xff]  ;;  %v1693_v44 = vld [vmem:[%s2070_s21 + $0x108] sm:$0xff]  ;;  %v1652_v48 = vld [vmem:[%s2311_s1 + $0x60] sm:$0xf0] }
  0x77   : > { %v1449_v47 = vld [vmem:[%s2311_s1 + $0x50] sm:$0xf]  ;;  %v1692_v49 = vld [vmem:[%s2070_s21 + $0x100] sm:$0xff]  ;;  %v1679_v50 = vld [vmem:[%s2070_s21 + $0x98] sm:$0xff] }
  0x78   : > { %1702 = vmatpush.bf16.msra.mxu1 %v1664_v14  ;;  %1703 = vmatpush.bf16.msra.mxu2 %v1664_v14  ;;  %v1671_v51 = vld [vmem:[%s2070_s21 + $0x58] sm:$0xff]  ;;  %v1425_v52 = vld [vmem:[%s2311_s1 + $0x10] sm:$0xf]  ;;  %v1450_v53 = vor.u32 %v1652_v48, %v1449_v47  ;;  %v1644_v54 = vld [vmem:[%s2311_s1 + $0x20] sm:$0xf0] }
  0x79   : > { %994 = vmatpush.bf16.msra.mxu0 %v1664_v14  ;;  %1081 = vmatpush.bf16.msra.mxu3 %v1688_v15  ;;  %v1646_v55 = vld [vmem:[%s2311_s1 + $0x34] sm:$0xf]  ;;  %v1439_v56 = vld [vmem:[%s2311_s1 + $0x44] sm:$0xf0]  ;;  %v1426_v59 = vor.u32 %v1644_v54, %v1425_v52  ;;  %v1163_v62 = vld [vmem:[%s2312_s2] sm:$0xff] }
  0x7a   : > { %v1678_v57 = vld [vmem:[%s2070_s21 + $0x90] sm:$0xff]  ;;  %v1442_v60 = vor.u32 %v1646_v55, %v1439_v56  ;;  %v1677_v63 = vld [vmem:[%s2070_s21 + $0x88] sm:$0xff]  ;;  %1173 = vperm.xlu0 %1772, %v1163_v62   ;;  %v1676_v1 = vld [vmem:[%s2070_s21 + $0x80] sm:$0xff] }
  0x7b   : > { %v1670_v58 = vld [vmem:[%s2070_s21 + $0x50] sm:$0xff]  ;;  %v1669_v0 = vld [vmem:[%s2070_s21 + $0x48] sm:$0xff]  ;;  %v1668_v2 = vld [vmem:[%s2070_s21 + $0x40] sm:$0xff] }
  0x7c   : > { %1704 = vmatpush.bf16.msra.mxu1 %v1663_v16  ;;  %1705 = vmatpush.bf16.msra.mxu2 %v1663_v16  ;;  %v1417_v3 = vld [vmem:[%s2311_s1 + $0x8] sm:$0xf]  ;;  %v1643_v4 = vld [vmem:[%s2311_s1 + $0x18] sm:$0xf0]  ;;  %v1640_v6 = vld [vmem:[%s2311_s1 + $0x4] sm:$0xf] }
  0x7d   : > { %995 = vmatpush.bf16.msra.mxu0 %v1663_v16  ;;  %1082 = vmatpush.bf16.msra.mxu3 %v1687_v17  ;;  %v1418_v5 = vor.u32 %v1643_v4, %v1417_v3  ;;  %v1411_v7 = vld [vmem:[%s2311_s1 + $0x14] sm:$0xf0]  ;;  %v1164_v8 = vld [vmem:[%s2312_s2 + $0x8] sm:$0xff]  ;;  %v1651_v12 = vld [vmem:[%s2311_s1 + $0x5c] sm:$0xf] }
  0x7e   : > { %v1445_v9 = vld [vmem:[%s2311_s1 + $0x38] sm:$0xf]  ;;  %v1414_v10 = vor.u32 %v1640_v6, %v1411_v7  ;;  %v1649_v11 = vld [vmem:[%s2311_s1 + $0x48] sm:$0xf0]  ;;  %v1459_v13 = vld [vmem:[%s2311_s1 + $0x6c] sm:$0xf0] }
  0x7f   : > { %v1446_v14 = vor.u32 %v1649_v11, %v1445_v9  ;;  %v1462_v15 = vor.u32 %v1651_v12, %v1459_v13  ;;  %v1165_v16 = vld [vmem:[%s2312_s2 + $0x10] sm:$0xff]  ;;  %v1431_v22 = vld [vmem:[%s2311_s1 + $0x3c] sm:$0xf0]  ;;  %v1656_v26 = vld [vmem:[%s2311_s1 + $0x84] sm:$0xf] }
  0x80   : > { %1706 = vmatpush.bf16.msra.mxu1 %v1662_v18  ;;  %1707 = vmatpush.bf16.msra.mxu2 %v1662_v18  ;;  %v1437_v17 = vld [vmem:[%s2311_s1 + $0x30] sm:$0xf]  ;;  %v1465_v23 = vld [vmem:[%s2311_s1 + $0x60] sm:$0xf]  ;;  %v1654_v25 = vld [vmem:[%s2311_s1 + $0x70] sm:$0xf0] }
  0x81   : > { %996 = vmatpush.bf16.msra.mxu0 %v1662_v18  ;;  %1083 = vmatpush.bf16.msra.mxu3 %v1686_v19  ;;  %v1648_v18 = vld [vmem:[%s2311_s1 + $0x40] sm:$0xf0]  ;;  %v1166_v19 = vld [vmem:[%s2312_s2 + $0x18] sm:$0xff]  ;;  %v1653_v34 = vld [vmem:[%s2311_s1 + $0x68] sm:$0xf0] }
  0x82   : > { %1178 = vperm.xlu0 %1772, %v1164_v8   ;;  %1183 = vperm.xlu1 %1773, %v1165_v16   ;;  %v1457_v33 = vld [vmem:[%s2311_s1 + $0x58] sm:$0xf]  ;;  %v1168_v35 = vld [vmem:[%s2312_s2 + $0x28] sm:$0xff]  ;;  %v1471_v47 = vld [vmem:[%s2311_s1 + $0x8c] sm:$0xf0] }
  0x84   : > { %1708 = vmatpush.bf16.msra.mxu1 %v1661_v20  ;;  %1709 = vmatpush.bf16.msra.mxu2 %v1661_v20 }
  0x85   : > { %997 = vmatpush.bf16.msra.mxu0 %v1661_v20  ;;  %1084 = vmatpush.bf16.msra.mxu3 %v1685_v21  ;;  %v1438_v20 = vor.u32 %v1648_v18, %v1437_v17  ;;  %v1645_v21 = vld [vmem:[%s2311_s1 + $0x2c] sm:$0xf] }
  0x88   : > { %1710 = vmatpush.bf16.msra.mxu1 %v1660_v24  ;;  %1711 = vmatpush.bf16.msra.mxu2 %v1660_v24 }
  0x89   : > { %998 = vmatpush.bf16.msra.mxu0 %v1660_v24  ;;  %1085 = vmatpush.bf16.msra.mxu3 %v1684_v30  ;;  %v1434_v24 = vor.u32 %v1645_v21, %v1431_v22  ;;  %v1170_v30 = vld [vmem:[%s2312_s2 + $0x38] sm:$0xff] }
  0x8a   : > { %1188 = vperm.xlu1 %1773, %v1166_v19  }
  0x8b   : > { %1004 = vmatmul.bf16.vlgmr.msra.gmra.mxu1 %v1430_v31  ;;  %1014 = vmatmul.bf16.vlgmr.msra.gmra.mxu2 %v1470_v32  ;;  %v1169_v31 = vld [vmem:[%s2312_s2 + $0x30] sm:$0xff]  ;;  %v1167_v32 = vld [vmem:[%s2312_s2 + $0x20] sm:$0xff] }
  0x8c   : > { %1049 = vmatpush.bf16.msrb.mxu2 %v1683_v27  ;;  %1020 = vmatpush.bf16.msrb.mxu1 %v1675_v28  ;;  %v1479_v27 = vld [vmem:[%s2311_s1 + $0x94] sm:$0xf0]  ;;  %v1466_v28 = vor.u32 %v1654_v25, %v1465_v23 }
  0x8d   : > { %1111 = vmatpush.bf16.msrb.mxu0 %v1695_v36  ;;  %1086 = vmatmul.bf16.vlgmr.msra.gmra.mxu3 %v1422_v40  ;;  %v1482_v29 = vor.u32 %v1656_v26, %v1479_v27  ;;  %v1458_v36 = vor.u32 %v1653_v34, %v1457_v33  ;;  %v1485_v40 = vld [vmem:[%s2311_s1 + $0x88] sm:$0xf] }
  0x8e   : > { %999 = vmatmul.bf16.vlgmr.msra.gmra.mxu0 %v1410_v39  ;;  %1203 = vperm.xlu0 %1772, %v1169_v31  }
  0x8f   : > { %1193 = vperm.xlu2 %1774, %v1167_v32  }
  0x90   : > { %1050 = vmatpush.bf16.msrb.mxu2 %v1682_v37  ;;  %1021 = vmatpush.bf16.msrb.mxu1 %v1674_v38  ;;  %v1650_v37 = vld [vmem:[%s2311_s1 + $0x54] sm:$0xf]  ;;  %v1451_v38 = vld [vmem:[%s2311_s1 + $0x64] sm:$0xf0] }
  0x91   : > { %1112 = vmatpush.bf16.msrb.mxu0 %v1694_v41  ;;  %v1454_v39 = vor.u32 %v1650_v37, %v1451_v38  ;;  %v1659_v41 = vld [vmem:[%s2311_s1 + $0x98] sm:$0xf0] }
  0x92   : > { %1208 = vperm.xlu1 %1773, %v1170_v30  }
  0x94   : > { %1051 = vmatpush.bf16.msrb.mxu2 %v1681_v42  ;;  %1022 = vmatpush.bf16.msrb.mxu1 %v1673_v43  ;;  %v1486_v42 = vor.u32 %v1659_v41, %v1485_v40  ;;  %v1477_v43 = vld [vmem:[%s2311_s1 + $0x80] sm:$0xf] }
  0x95   : > { %1113 = vmatpush.bf16.msrb.mxu0 %v1693_v44  ;;  %v1658_v44 = vld [vmem:[%s2311_s1 + $0x90] sm:$0xf0] }
  0x97   : > { %1198 = vperm.xlu2 %1774, %v1168_v35  }
  0x98   : > { %1052 = vmatpush.bf16.msrb.mxu2 %v1680_v45  ;;  %1023 = vmatpush.bf16.msrb.mxu1 %v1672_v46  ;;  %v1478_v45 = vor.u32 %v1658_v44, %v1477_v43  ;;  %v1655_v46 = vld [vmem:[%s2311_s1 + $0x7c] sm:$0xf] }
  0x99   : > { %1114 = vmatpush.bf16.msrb.mxu0 %v1692_v49  ;;  %v1474_v48 = vor.u32 %v1655_v46, %v1471_v47 }
  0x9b   : > { %1009 = vmatmul.bf16.gmra.mxu1 %v1450_v53 }
  0x9c   : > { %1053 = vmatpush.bf16.msrb.mxu2 %v1679_v50  ;;  %1024 = vmatpush.bf16.msrb.mxu1 %v1671_v51 }
  0x9d   : > { %1091 = vmatmul.bf16.gmra.mxu3 %v1442_v60 }
  0x9e   : > { %1631 = vmatmul.msk.bf16.vlgmr.msrb.gmra.mxu0 %vm978_vm0, %v1426_v59 }
  0xa0   : > { %1054 = vmatpush.bf16.msrb.mxu2 %v1678_v57  ;;  %1025 = vmatpush.bf16.msrb.mxu1 %v1670_v58 }
  0xa4   : > { %1055 = vmatpush.bf16.msrb.mxu2 %v1677_v63  ;;  %1026 = vmatpush.bf16.msrb.mxu1 %v1669_v0 }
  0xa8   : > { %1056 = vmatpush.bf16.msrb.mxu2 %v1676_v1  ;;  %1027 = vmatpush.bf16.msrb.mxu1 %v1668_v2 }
  0xab   : > { %1057 = vmatmul.bf16.vlgmr.msrb.gmra.mxu2 %v1418_v5  ;;  %1028 = vmatmul.bf16.vlgmr.msrb.gmra.mxu1 %v1414_v10 }
  0xad   : > { %1096 = vmatmul.bf16.gmra.mxu3 %v1462_v15 }
  0xae   : > { %1632 = vmatmul.msk.bf16.gmra.mxu0 %vm978_vm0, %v1446_v14 }
  0xbb   : > { %1062 = vmatmul.bf16.gmra.mxu2 %v1438_v20  ;;  %1033 = vmatmul.bf16.gmra.mxu1 %v1434_v24 }
  0xbd   : > { %1101 = vmatmul.bf16.gmra.mxu3 %v1482_v29 }
  0xbe   : > { %1633 = vmatmul.msk.bf16.gmra.mxu0 %vm978_vm0, %v1466_v28 }
  0xcb   : > { %1067 = vmatmul.bf16.gmra.mxu2 %v1458_v36  ;;  %1038 = vmatmul.bf16.gmra.mxu1 %v1454_v39 }
  0xce   : > { %1634 = vmatmul.msk.bf16.gmra.mxu0 %vm978_vm0, %v1486_v42 }
  0xdb   : > { %1072 = vmatmul.bf16.gmra.mxu2 %v1478_v45  ;;  %1043 = vmatmul.bf16.gmra.mxu1 %v1474_v48 }
  0xe9   : > { %v1194_v43 = vpop.permute.xlu2 %1193 }
  0xec   : > { %v1174_v1 = vpop.permute.xlu0 %1173 }
  0xf4   : > { %v1179_v13 = vpop.permute.xlu0 %1178  ;;  %v1184_v22 = vpop.permute.xlu1 %1183 }
  0xfc   : > { %v1189_v34 = vpop.permute.xlu1 %1188 }
 0x108   : > { %v1005_v49 = vpop.f32.mrf.mxu1 }
 0x10b   : > { %v1000_v50 = vpop.f32.mrf.mxu0 }
 0x10e   : > { %v2256_v54 = vpop.f32.mrf.mxu2 }
 0x110   : > { %v1007_v51 = vpop.f32.mrf.mxu1  ;;  %v1087_v55 = vpop.f32.mrf.mxu3 }
 0x113   : > { %v1002_v52 = vpop.f32.mrf.mxu0 }
 0x116   : > { %v2258_v58 = vpop.f32.mrf.mxu2 }
 0x118   : > { %v1010_v53 = vpop.f32.mrf.mxu1  ;;  %v1089_v61 = vpop.f32.mrf.mxu3 }
 0x11b   : > { %v1116_v57 = vpop.f32.mrf.mxu0 }
 0x120   : > { %v1012_v56 = vpop.f32.mrf.mxu1  ;;  %v1092_v8 = vpop.f32.mrf.mxu3 }
 0x123   : > { %v1118_v63 = vpop.f32.mrf.mxu0 }
 0x128   : > { %v1029_v59 = vpop.f32.mrf.mxu1  ;;  %v1094_v21 = vpop.f32.mrf.mxu3 }
 0x129   : > { %v1030_v60 = vadd.f32 %v1029_v59, %v1000_v50 }
 0x12b   : > { %v1121_v11 = vpop.f32.mrf.mxu0 }
 0x12e   : > { %v1058_v62 = vpop.f32.mrf.mxu2 }
 0x12f   : > { %v1059_v0 = vadd.f32 %v1058_v62, %v1030_v60 }
 0x130   : > { %v1031_v3 = vpop.f32.mrf.mxu1  ;;  %v1097_v33 = vpop.f32.mrf.mxu3 }
 0x131   : > { %v1088_v2 = vadd.f32 %v1087_v55, %v1059_v0  ;;  %v1032_v5 = vadd.f32 %v1031_v3, %v1002_v52 }
 0x133   : > { %v1117_v4 = vadd.f32 %v1116_v57, %v1088_v2  ;;  %v1123_v24 = vpop.f32.mrf.mxu0  ;;  %v1199_v57 = vpop.permute.xlu2 %1198 }
 0x135   : > { %v1211_v6 = vadd.f32 %v1174_v1, %v1117_v4 }
 0x136   : > { %v1060_v7 = vpop.f32.mrf.mxu2 }
 0x137   : > { %v1219_v9 = vmax.f32 %v1211_v6, 0.0  ;;  %v1061_v10 = vadd.f32 %v1060_v7, %v1032_v5  ;;  %v1204_v6 = vpop.permute.xlu0 %1203 }
 0x138   : > { %v1034_v14 = vpop.f32.mrf.mxu1  ;;  %v1099_v47 = vpop.f32.mrf.mxu3 }
 0x139   : > { %1227 = vst [vmem:[%s2262_s6] sm:$0xff] %v1219_v9  ;;  %v1090_v12 = vadd.f32 %v1089_v61, %v1061_v10  ;;  %v1035_v16 = vadd.f32 %v1034_v14, %v1005_v49 }
 0x13b   : > { %v1119_v15 = vadd.f32 %v1118_v63, %v1090_v12  ;;  %v1126_v37 = vpop.f32.mrf.mxu0 }
 0x13d   : > { %v1212_v17 = vadd.f32 %v1179_v13, %v1119_v15  ;;  %v1209_v15 = vpop.permute.xlu1 %1208 }
 0x13e   : > { %v1063_v18 = vpop.f32.mrf.mxu2 }
 0x13f   : > { %v1220_v19 = vmax.f32 %v1212_v17, 0.0  ;;  %v1064_v20 = vadd.f32 %v1063_v18, %v1035_v16 }
 0x140   : > { %v1036_v25 = vpop.f32.mrf.mxu1  ;;  %v1102_v63 = vpop.f32.mrf.mxu3 }
 0x141   : > { %1228 = vst [vmem:[%s2262_s6 + $0x8] sm:$0xff] %v1220_v19  ;;  %v1093_v23 = vadd.f32 %v1092_v8, %v1064_v20  ;;  %v1037_v27 = vadd.f32 %v1036_v25, %v1007_v51 }
 0x143   : > { %v1122_v26 = vadd.f32 %v1121_v11, %v1093_v23  ;;  %v1128_v50 = vpop.f32.mrf.mxu0 }
 0x145   : > { %v1213_v28 = vadd.f32 %v1184_v22, %v1122_v26 }
 0x146   : > { %v1065_v29 = vpop.f32.mrf.mxu2 }
 0x147   : > { %v1221_v30 = vmax.f32 %v1213_v28, 0.0  ;;  %v1066_v31 = vadd.f32 %v1065_v29, %v1037_v27 }
 0x148   : > { %v1039_v35 = vpop.f32.mrf.mxu1  ;;  %v1290_v18 = vld [vmem:[%s2262_s6 + $0x8] sm:$0xff] (%p1900_p6) }
 0x149   : > { %1229 = vst [vmem:[%s2262_s6 + $0x10] sm:$0xff] %v1221_v30  ;;  %v1095_v32 = vadd.f32 %v1094_v21, %v1066_v31  ;;  %v1040_v38 = vadd.f32 %v1039_v35, %v1010_v53 }
 0x14a   : > { %1291 = vst [vmem:[%s1245_s23 + $0x10] sm:$0xff] (%p1900_p6), %v1290_v18 }
 0x14b   : > { %v1124_v36 = vadd.f32 %v1123_v24, %v1095_v32 }
 0x14d   : > { %v1214_v39 = vadd.f32 %v1189_v34, %v1124_v36 }
 0x14e   : > { %v1068_v40 = vpop.f32.mrf.mxu2 }
 0x14f   : > { %v1222_v41 = vmax.f32 %v1214_v39, 0.0  ;;  %v1069_v42 = vadd.f32 %v1068_v40, %v1040_v38 }
 0x150   : > { %v1041_v45 = vpop.f32.mrf.mxu1  ;;  %v1292_v19 = vld [vmem:[%s2262_s6 + $0x10] sm:$0xff] (%p1900_p6) }
 0x151   : > { %1230 = vst [vmem:[%s2262_s6 + $0x18] sm:$0xff] %v1222_v41  ;;  %v1098_v44 = vadd.f32 %v1097_v33, %v1069_v42  ;;  %v1042_v48 = vadd.f32 %v1041_v45, %v1012_v56  ;;  %v1131_v56 = vpop.f32.mrf.mxu0 }
 0x152   : > { %1293 = vst [vmem:[%s1245_s23 + $0x20] sm:$0xff] (%p1900_p6), %v1292_v19 }
 0x153   : > { %v1127_v46 = vadd.f32 %v1126_v37, %v1098_v44 }
 0x155   : > { %v1215_v49 = vadd.f32 %v1194_v43, %v1127_v46 }
 0x156   : > { %v1070_v51 = vpop.f32.mrf.mxu2 }
 0x157   : > { %v1223_v52 = vmax.f32 %v1215_v49, 0.0  ;;  %v1071_v55 = vadd.f32 %v1070_v51, %v1042_v48 }
 0x158   : > { %v1044_v59 = vpop.f32.mrf.mxu1  ;;  %v1294_v20 = vld [vmem:[%s2262_s6 + $0x18] sm:$0xff] (%p1900_p6) }
 0x159   : > { %1231 = vst [vmem:[%s2262_s6 + $0x20] sm:$0xff] %v1223_v52  ;;  %v1100_v53 = vadd.f32 %v1099_v47, %v1071_v55  ;;  %v1045_v61 = vadd.f32 %v1044_v59, %v2256_v54  ;;  %v1104_v54 = vpop.f32.mrf.mxu3  ;;  %v1133_v13 = vpop.f32.mrf.mxu0 }
 0x15a   : > { %1295 = vst [vmem:[%s1245_s23 + $0x30] sm:$0xff] (%p1900_p6), %v1294_v20 }
 0x15b   : > { %v1129_v60 = vadd.f32 %v1128_v50, %v1100_v53 }
 0x15d   : > { %v1216_v62 = vadd.f32 %v1199_v57, %v1129_v60 }
 0x15e   : > { %v1073_v0 = vpop.f32.mrf.mxu2 }
 0x15f   : > { %v1224_v1 = vmax.f32 %v1216_v62, 0.0  ;;  %v1074_v2 = vadd.f32 %v1073_v0, %v1045_v61 }
 0x160   : > { %v1046_v5 = vpop.f32.mrf.mxu1  ;;  %v1296_v21 = vld [vmem:[%s2262_s6 + $0x20] sm:$0xff] (%p1900_p6) }
 0x161   : > { %1232 = vst [vmem:[%s2262_s6 + $0x28] sm:$0xff] %v1224_v1  ;;  %v1103_v3 = vadd.f32 %v1102_v63, %v1074_v2  ;;  %v1047_v7 = vadd.f32 %v1046_v5, %v2258_v58  ;;  %v1288_v58 = vld [vmem:[%s2262_s6] sm:$0xff] (%p1900_p6) }
 0x162   : > { %1289 = vst [vmem:[%s1245_s23] sm:$0xff] (%p1900_p6), %v1288_v58 }
 0x163   : > { %v1132_v4 = vadd.f32 %v1131_v56, %v1103_v3  ;;  %1297 = vst [vmem:[%s1245_s23 + $0x40] sm:$0xff] (%p1900_p6), %v1296_v21 }
 0x165   : > { %v1217_v8 = vadd.f32 %v1204_v6, %v1132_v4 }
 0x166   : > { %v1075_v9 = vpop.f32.mrf.mxu2 }
 0x167   : > { %v1225_v10 = vmax.f32 %v1217_v8, 0.0  ;;  %v1076_v11 = vadd.f32 %v1075_v9, %v1047_v7 }
 0x168   : > { %v1298_v22 = vld [vmem:[%s2262_s6 + $0x28] sm:$0xff] (%p1900_p6) }
 0x169   : > { %1233 = vst [vmem:[%s2262_s6 + $0x30] sm:$0xff] %v1225_v10  ;;  %v1105_v12 = vadd.f32 %v1104_v54, %v1076_v11 }
 0x16a   : > { %1299 = vst [vmem:[%s1245_s23 + $0x50] sm:$0xff] (%p1900_p6), %v1298_v22 }
 0x16b   : > { %v1134_v14 = vadd.f32 %v1133_v13, %v1105_v12 }
 0x16d   : > { %v1218_v16 = vadd.f32 %v1209_v15, %v1134_v14  ;;  %1241 = sbr.rel (!%p1900_p6) target bundleno = 378 (0x17a), region = 85 }
 0x16f   : > { %v1226_v17 = vmax.f32 %v1218_v16, 0.0 }
 0x170   : > { %v1300_v23 = vld [vmem:[%s2262_s6 + $0x30] sm:$0xff] (%p1900_p6) }
 0x171   : > { %1234 = vst [vmem:[%s2262_s6 + $0x38] sm:$0xff] %v1226_v17 }
 0x172   : > { %1301 = vst [vmem:[%s1245_s23 + $0x60] sm:$0xff] %v1300_v23 }
 0x178   : > { %v1302_v24 = vld [vmem:[%s2262_s6 + $0x38] sm:$0xff] }
 0x179   : > { %1303 = vst [vmem:[%s1245_s23 + $0x70] sm:$0xff] %v1302_v24 }
 0x17a PF: > { %s13_s18 = sadd.s32 1, %s1829_s18   ;;  %s2315_s12 = smov %s1809_s13 }
 0x17b   : > { %p10_p12 = scmp.ge.s32.totalorder %s13_s18, 6   ;;  %s2316_s13 = smov %s1908_s27 }
 0x17c   : > { %s2317_s14 = smov %s1821_s16  ;;  %s2318_s15 = smov %s1825_s17 }
 0x17d   : > { %s2319_s16 = smov %s2322_s19  ;;  %s2320_s17 = smov %s2326_s20 }
 0x17e   :  { %12 = sbr.rel (!%p10_p12) target bundleno = 4 (0x4), region = 157 }

// kernel: style_loss.13
= control target key start
LH: loop header
LB: loop body
LE: loop exit
PB: predicated region body
PF: predicated region fallthrough
CT: control target
= control target key end

     0   :  { %vm14_vm0 = vcmask 523264   ;;  %s473_s0 = inlined_call_operand.vmem [shape: bf16[2,64,64], index: 0, kind: input, shape index: {}]   ;;  %s474_s1 = inlined_call_operand.hbm [shape: f32[1,1], index: 1, kind: output, shape index: {}]  }
   0x1   :  { %v347_v0 = vld [vmem:[%s473_s0 + $0x18] sm:$0xff] }
   0x2   :  { %v351_v1 = vld [vmem:[%s473_s0 + $0x38] sm:$0xff]  ;;  %v87_v2 = vsel %vm14_vm0, %v347_v0, 0 }
   0x3   :  { %v172_v3 = vsel %vm14_vm0, %v351_v1, 0  ;;  %93 = vmatpush.bf16.xpose.msra.mxu0 %v87_v2  ;;  %352 = vmatpush.bf16.xpose.msra.mxu2 %v87_v2 }
   0x4   :  { %6 = vsyncpa [#allocation5], 0  ;;  %178 = vmatpush.bf16.xpose.msra.mxu1 %v172_v3  ;;  %356 = vmatpush.bf16.xpose.msra.mxu3 %v172_v3  ;;  %v346_v4 = vld [vmem:[%s473_s0 + $0x10] sm:$0xff]  ;;  %v345_v8 = vld [vmem:[%s473_s0 + $0x8] sm:$0xff]  ;;  %v378_v13 = vmov 0.0   ;;  %s286_s23 = sshll.u32 %s474_s1, 4  ;;  %s287_s23 = int_to_ptr.hbm [resolvable:$true] %s286_s23 }
   0x5   :  { %v350_v5 = vld [vmem:[%s473_s0 + $0x30] sm:$0xff]  ;;  %v84_v6 = vsel %vm14_vm0, %v346_v4, 0  ;;  %v349_v9 = vld [vmem:[%s473_s0 + $0x28] sm:$0xff]  ;;  %v81_v10 = vsel %vm14_vm0, %v345_v8, 0  ;;  %v344_v12 = vld [vmem:[%s473_s0] sm:$0xff]  ;;  %15 = vst.msk [vmem:[#allocation2] sm:$0xff] %vm14_vm0, %v378_v13 }
   0x6   :  { %v169_v7 = vsel %vm14_vm0, %v350_v5, 0  ;;  %v166_v11 = vsel %vm14_vm0, %v349_v9, 0  ;;  %v348_v14 = vld [vmem:[%s473_s0 + $0x20] sm:$0xff]  ;;  %16 = vst.msk [vmem:[#allocation2 + $0x8] sm:$0xff] %vm14_vm0, %v378_v13  ;;  %v78_v15 = vsel %vm14_vm0, %v344_v12, 0  ;;  %s379_s26 = smov [#allocation4]  }
   0x7   :  { %17 = vst.msk [vmem:[#allocation2 + $0x10] sm:$0xff] %vm14_vm0, %v378_v13  ;;  %v163_v16 = vsel %vm14_vm0, %v348_v14, 0 }
   0x8   :  { %18 = vst.msk [vmem:[#allocation2 + $0x18] sm:$0xff] %vm14_vm0, %v378_v13 }
   0x9   :  { %19 = vst.msk [vmem:[#allocation2 + $0x20] sm:$0xff] %vm14_vm0, %v378_v13 }
   0xa   :  { %20 = vst.msk [vmem:[#allocation2 + $0x28] sm:$0xff] %vm14_vm0, %v378_v13 }
   0xb   :  { %94 = vmatpush.bf16.xpose.msra.mxu0 %v84_v6  ;;  %353 = vmatpush.bf16.xpose.msra.mxu2 %v84_v6  ;;  %21 = vst.msk [vmem:[#allocation2 + $0x30] sm:$0xff] %vm14_vm0, %v378_v13 }
   0xc   :  { %179 = vmatpush.bf16.xpose.msra.mxu1 %v169_v7  ;;  %357 = vmatpush.bf16.xpose.msra.mxu3 %v169_v7  ;;  %22 = vst.msk [vmem:[#allocation2 + $0x38] sm:$0xff] %vm14_vm0, %v378_v13  ;;  %v48_v17 = vld [vmem:[#allocation2] sm:$0xff] }
   0xd   :  { %23 = vst.msk [vmem:[#allocation3] sm:$0xff] %vm14_vm0, %v378_v13  ;;  %v49_v26 = vld [vmem:[#allocation2 + $0x8] sm:$0xff] }
   0xe   :  { %24 = vst.msk [vmem:[#allocation3 + $0x8] sm:$0xff] %vm14_vm0, %v378_v13  ;;  %v50_v38 = vld [vmem:[#allocation2 + $0x10] sm:$0xff] }
   0xf   :  { %25 = vst.msk [vmem:[#allocation3 + $0x10] sm:$0xff] %vm14_vm0, %v378_v13  ;;  %v51_v50 = vld [vmem:[#allocation2 + $0x18] sm:$0xff] }
  0x10   :  { %26 = vst.msk [vmem:[#allocation3 + $0x18] sm:$0xff] %vm14_vm0, %v378_v13  ;;  %v52_v23 = vld [vmem:[#allocation2 + $0x20] sm:$0xff] }
  0x11   :  { %27 = vst.msk [vmem:[#allocation3 + $0x20] sm:$0xff] %vm14_vm0, %v378_v13  ;;  %v53_v35 = vld [vmem:[#allocation2 + $0x28] sm:$0xff] }
  0x12   :  { %28 = vst.msk [vmem:[#allocation3 + $0x28] sm:$0xff] %vm14_vm0, %v378_v13  ;;  %v54_v47 = vld [vmem:[#allocation2 + $0x30] sm:$0xff] }
  0x13   :  { %95 = vmatpush.bf16.xpose.msra.mxu0 %v81_v10  ;;  %354 = vmatpush.bf16.xpose.msra.mxu2 %v81_v10  ;;  %29 = vst.msk [vmem:[#allocation3 + $0x30] sm:$0xff] %vm14_vm0, %v378_v13  ;;  %v55_v2 = vld [vmem:[#allocation2 + $0x38] sm:$0xff] }
  0x14   :  { %180 = vmatpush.bf16.xpose.msra.mxu1 %v166_v11  ;;  %358 = vmatpush.bf16.xpose.msra.mxu3 %v166_v11  ;;  %30 = vst.msk [vmem:[#allocation3 + $0x38] sm:$0xff] %vm14_vm0, %v378_v13  ;;  %v134_v18 = vld [vmem:[#allocation3] sm:$0xff] }
  0x15   :  { %v135_v29 = vld [vmem:[#allocation3 + $0x8] sm:$0xff] }
  0x16   :  { %v136_v41 = vld [vmem:[#allocation3 + $0x10] sm:$0xff] }
  0x17   :  { %v137_v53 = vld [vmem:[#allocation3 + $0x18] sm:$0xff] }
  0x18   :  { %v138_v24 = vld [vmem:[#allocation3 + $0x20] sm:$0xff] }
  0x19   :  { %v139_v36 = vld [vmem:[#allocation3 + $0x28] sm:$0xff] }
  0x1a   :  { %v140_v48 = vld [vmem:[#allocation3 + $0x30] sm:$0xff] }
  0x1b   :  { %96 = vmatpush.bf16.xpose.msra.mxu0 %v78_v15  ;;  %355 = vmatpush.bf16.xpose.msra.mxu2 %v78_v15 }
  0x1c   :  { %181 = vmatpush.bf16.xpose.msra.mxu1 %v163_v16  ;;  %359 = vmatpush.bf16.xpose.msra.mxu3 %v163_v16 }
  0x22   :  { %320 = vmatmul.msk.bf16.vlgmr.msra.gmra.mxu0 %vm14_vm0, %v344_v12  ;;  %322 = vmatmul.msk.bf16.vlgmr.msra.gmra.mxu2 %vm14_vm0, %v346_v4 }
  0x23   :  { %340 = vmatmul.msk.bf16.vlgmr.msra.gmra.mxu1 %vm14_vm0, %v348_v14  ;;  %342 = vmatmul.msk.bf16.vlgmr.msra.gmra.mxu3 %vm14_vm0, %v350_v5  ;;  %v141_v5 = vld [vmem:[#allocation3 + $0x38] sm:$0xff] }
  0x32   :  { %321 = vmatmul.msk.bf16.gmra.mxu0 %vm14_vm0, %v345_v8  ;;  %323 = vmatmul.msk.bf16.gmra.mxu2 %vm14_vm0, %v347_v0 }
  0x33   :  { %341 = vmatmul.msk.bf16.gmra.mxu1 %vm14_vm0, %v349_v9  ;;  %343 = vmatmul.msk.bf16.gmra.mxu3 %vm14_vm0, %v351_v1 }
  0x9f   :  { %v98_v19 = vpop.f32.mrf.mxu0 }
  0xa0   :  { %v118_v20 = vadd.f32 %v98_v19, %v48_v17  ;;  %v183_v21 = vpop.f32.mrf.mxu1 }
  0xa1   :  { %v203_v22 = vadd.f32 %v183_v21, %v134_v18 }
  0xa2   :  { %126 = vst.msk [vmem:[#allocation2] sm:$0xff] %vm14_vm0, %v118_v20 }
  0xa3   :  { %211 = vst.msk [vmem:[#allocation3] sm:$0xff] %vm14_vm0, %v203_v22 }
  0xa5   :  { %v108_v25 = vpop.f32.mrf.mxu2 }
  0xa6   :  { %v122_v27 = vadd.f32 %v108_v25, %v52_v23  ;;  %v193_v28 = vpop.f32.mrf.mxu3 }
  0xa7   :  { %v207_v30 = vadd.f32 %v193_v28, %v138_v24  ;;  %v100_v31 = vpop.f32.mrf.mxu0 }
  0xa8   :  { %130 = vst.msk [vmem:[#allocation2 + $0x20] sm:$0xff] %vm14_vm0, %v122_v27  ;;  %v119_v32 = vadd.f32 %v100_v31, %v49_v26  ;;  %v185_v33 = vpop.f32.mrf.mxu1 }
  0xa9   :  { %215 = vst.msk [vmem:[#allocation3 + $0x20] sm:$0xff] %vm14_vm0, %v207_v30  ;;  %v204_v34 = vadd.f32 %v185_v33, %v135_v29  ;;  %v222_v60 = vld [vmem:[#allocation2] sm:$0xff] }
  0xaa   :  { %127 = vst.msk [vmem:[#allocation2 + $0x8] sm:$0xff] %vm14_vm0, %v119_v32  ;;  %v230_v61 = vld [vmem:[#allocation3] sm:$0xff] }
  0xab   :  { %212 = vst.msk [vmem:[#allocation3 + $0x8] sm:$0xff] %vm14_vm0, %v204_v34  ;;  %v238_v3 = vsub.f32 %v222_v60, %v230_v61 }
  0xad   :  { %v110_v37 = vpop.f32.mrf.mxu2  ;;  %v246_v13 = vmul.f32 %v238_v3, %v238_v3 }
  0xae   :  { %v123_v39 = vadd.f32 %v110_v37, %v53_v35  ;;  %v195_v40 = vpop.f32.mrf.mxu3 }
  0xaf   :  { %v208_v42 = vadd.f32 %v195_v40, %v139_v36  ;;  %v103_v43 = vpop.f32.mrf.mxu0  ;;  %v226_v10 = vld [vmem:[#allocation2 + $0x20] sm:$0xff]  ;;  %v254_v25 = vsel %vm14_vm0, %v246_v13, 0.0 }
  0xb0   :  { %131 = vst.msk [vmem:[#allocation2 + $0x28] sm:$0xff] %vm14_vm0, %v123_v39  ;;  %v120_v44 = vadd.f32 %v103_v43, %v50_v38  ;;  %v188_v45 = vpop.f32.mrf.mxu1  ;;  %v234_v11 = vld [vmem:[#allocation3 + $0x20] sm:$0xff] }
  0xb1   :  { %216 = vst.msk [vmem:[#allocation3 + $0x28] sm:$0xff] %vm14_vm0, %v208_v42  ;;  %v205_v46 = vadd.f32 %v188_v45, %v136_v41  ;;  %v223_v54 = vld [vmem:[#allocation2 + $0x8] sm:$0xff]  ;;  %v242_v18 = vsub.f32 %v226_v10, %v234_v11 }
  0xb2   :  { %128 = vst.msk [vmem:[#allocation2 + $0x10] sm:$0xff] %vm14_vm0, %v120_v44  ;;  %v231_v55 = vld [vmem:[#allocation3 + $0x8] sm:$0xff] }
  0xb3   :  { %213 = vst.msk [vmem:[#allocation3 + $0x10] sm:$0xff] %vm14_vm0, %v205_v46  ;;  %v239_v0 = vsub.f32 %v223_v54, %v231_v55  ;;  %v250_v30 = vmul.f32 %v242_v18, %v242_v18 }
  0xb5   :  { %v113_v49 = vpop.f32.mrf.mxu2  ;;  %v247_v7 = vmul.f32 %v239_v0, %v239_v0  ;;  %v261_v39 = vsel %vm14_vm0, %v250_v30, 0.0 }
  0xb6   :  { %v124_v51 = vadd.f32 %v113_v49, %v54_v47  ;;  %v198_v52 = vpop.f32.mrf.mxu3 }
  0xb7   :  { %v209_v56 = vadd.f32 %v198_v52, %v140_v48  ;;  %v105_v57 = vpop.f32.mrf.mxu0  ;;  %v227_v15 = vld [vmem:[#allocation2 + $0x28] sm:$0xff]  ;;  %v255_v19 = vsel %vm14_vm0, %v247_v7, 0.0 }
  0xb8   :  { %132 = vst.msk [vmem:[#allocation2 + $0x30] sm:$0xff] %vm14_vm0, %v124_v51  ;;  %v121_v58 = vadd.f32 %v105_v57, %v51_v50  ;;  %v190_v59 = vpop.f32.mrf.mxu1  ;;  %v235_v16 = vld [vmem:[#allocation3 + $0x28] sm:$0xff]  ;;  %v256_v27 = vadd.f32 %v255_v19, %v254_v25 }
  0xb9   :  { %217 = vst.msk [vmem:[#allocation3 + $0x30] sm:$0xff] %vm14_vm0, %v209_v56  ;;  %v206_v62 = vadd.f32 %v190_v59, %v137_v53  ;;  %v224_v63 = vld [vmem:[#allocation2 + $0x10] sm:$0xff]  ;;  %v243_v24 = vsub.f32 %v227_v15, %v235_v16 }
  0xba   :  { %129 = vst.msk [vmem:[#allocation2 + $0x18] sm:$0xff] %vm14_vm0, %v121_v58  ;;  %v232_v1 = vld [vmem:[#allocation3 + $0x10] sm:$0xff] }
  0xbb   :  { %214 = vst.msk [vmem:[#allocation3 + $0x18] sm:$0xff] %vm14_vm0, %v206_v62  ;;  %v240_v4 = vsub.f32 %v224_v63, %v232_v1  ;;  %v251_v33 = vmul.f32 %v243_v24, %v243_v24 }
  0xbd   :  { %v115_v6 = vpop.f32.mrf.mxu2  ;;  %v248_v14 = vmul.f32 %v240_v4, %v240_v4  ;;  %v263_v42 = vsel %vm14_vm0, %v251_v33, 0.0 }
  0xbe   :  { %v125_v8 = vadd.f32 %v115_v6, %v55_v2  ;;  %v200_v9 = vpop.f32.mrf.mxu3 }
  0xbf   :  { %v210_v12 = vadd.f32 %v200_v9, %v141_v5  ;;  %v228_v20 = vld [vmem:[#allocation2 + $0x30] sm:$0xff]  ;;  %v257_v26 = vsel %vm14_vm0, %v248_v14, 0.0 }
  0xc0   :  { %133 = vst.msk [vmem:[#allocation2 + $0x38] sm:$0xff] %vm14_vm0, %v125_v8  ;;  %v236_v22 = vld [vmem:[#allocation3 + $0x30] sm:$0xff]  ;;  %v258_v31 = vadd.f32 %v257_v26, %v256_v27 }
  0xc1   :  { %218 = vst.msk [vmem:[#allocation3 + $0x38] sm:$0xff] %vm14_vm0, %v210_v12  ;;  %v225_v17 = vld [vmem:[#allocation2 + $0x18] sm:$0xff]  ;;  %v244_v28 = vsub.f32 %v228_v20, %v236_v22 }
  0xc2   :  { %v233_v21 = vld [vmem:[#allocation3 + $0x18] sm:$0xff] }
  0xc3   :  { %v241_v23 = vsub.f32 %v225_v17, %v233_v21  ;;  %v252_v38 = vmul.f32 %v244_v28, %v244_v28 }
  0xc5   :  { %v249_v29 = vmul.f32 %v241_v23, %v241_v23  ;;  %v265_v44 = vsel %vm14_vm0, %v252_v38, 0.0 }
  0xc7   :  { %v229_v32 = vld [vmem:[#allocation2 + $0x38] sm:$0xff]  ;;  %v259_v34 = vsel %vm14_vm0, %v249_v29, 0.0 }
  0xc8   :  { %v237_v35 = vld [vmem:[#allocation3 + $0x38] sm:$0xff]  ;;  %v260_v36 = vadd.f32 %v259_v34, %v258_v31 }
  0xc9   :  { %v245_v37 = vsub.f32 %v229_v32, %v237_v35 }
  0xca   :  { %v262_v40 = vadd.f32 %v261_v39, %v260_v36 }
  0xcb   :  { %v253_v41 = vmul.f32 %v245_v37, %v245_v37 }
  0xcc   :  { %v264_v43 = vadd.f32 %v263_v42, %v262_v40 }
  0xcd   :  { %v267_v46 = vsel %vm14_vm0, %v253_v41, 0.0 }
  0xce   :  { %v266_v45 = vadd.f32 %v265_v44, %v264_v43 }
  0xd0   :  { %v268_v47 = vadd.f32 %v267_v46, %v266_v45 }
  0xd2   :  { %269 = vadd.xlane.f32.xlu0 %v268_v47 }
 0x145   :  { %v270_v48 = vpop.xlane.xlu0 %269 }
 0x146   :  { %v271_v49 = vrot.slane %v270_v48, 4 }
 0x148   :  { %v272_v50 = vadd.f32 %v271_v49, %v270_v48 }
 0x14a   :  { %v273_v51 = vrot.slane %v272_v50, 2 }
 0x14c   :  { %v274_v52 = vadd.f32 %v273_v51, %v272_v50 }
 0x14e   :  { %v275_v53 = vrot.slane %v274_v52, 1 }
 0x150   :  { %v276_v54 = vadd.f32 %v275_v53, %v274_v52 }
 0x152   :  { %360 = vpush %v276_v54 }
 0x183   :  { %s361_s24 = spop %360 }
 0x184   :  { %s278_s25 = smul.f32 9.094947e-13, %s361_s24 }
 0x186   :  { %280 = sst [smem:[#allocation4]] %s278_s25 }
 0x187   :  { %289 = dma.smem_to_hbm %s379_s26, 16, %s287_s23, [#allocation5]  }
 0x188   :  { %376 = dma.done.wait [#allocation5], 16  }
 0x189   :  { %377 = vsyncadd [#allocation5], 4294967280 }
 0x18a   :  { %294 = sfence }
 0x18b   :  { %295 = vsyncpa [#allocation5], 1 }

// kernel: style_loss.10
= control target key start
LH: loop header
LB: loop body
LE: loop exit
PB: predicated region body
PF: predicated region fallthrough
CT: control target
= control target key end

     0   :  { %s1891_s12 = smov 0   ;;  %s1893_s13 = smov 0   ;;  %s2364_s0 = inlined_call_operand.vmem [shape: bf16[2,576,64], index: 0, kind: input, shape index: {}]   ;;  %s2365_s1 = inlined_call_operand.vmem [shape: bf16[128,576], index: 1, kind: input, shape index: {}]   ;;  %s2366_s2 = inlined_call_operand.vmem [shape: f32[128,1], index: 2, kind: input, shape index: {}]   ;;  %s2367_s3 = inlined_call_operand.vmem [shape: f32[2,128,64], index: 3, kind: output, shape index: {}]  }
   0x1   :  { %s1895_s14 = smov 0  }
   0x2 LB: > { %s32_s15 = sadd.s32 1, %s1863_s13  ;;  %p1396_p0 = scmp.ge.s32.totalorder %s1867_s14, 1  ;;  %s1867_s14 = sphi %s1895_s14, %s13_s14   ;;  %s1863_s13 = sphi %s1893_s13, %s2369_s13   ;;  %s1859_s12 = sphi %s1891_s12, %s2368_s12  }
   0x3   : > { %p34_p1 = scmp.ge.s32.totalorder %s32_s15, 2  ;;  %p181_p2 = scmp.lt.s32.totalorder %s1867_s14, 3 }
   0x5   : > { %s2371_s15 = smov (%p34_p1, %s32_s15), 0  ;;  %p182_p3 = pnand %p1396_p0, %p181_p2 }
   0x6   : > { %p221_p4 = scmp.lt.s32.totalorder (!%p182_p3), %s1859_s12, 1 }
   0x7   : > { %185 = sbr.rel (%p182_p3) target bundleno = 353 (0x161), region = 32 }
   0xc   : > { %s2373_s12 = smov (!%p221_p4, %s1859_s12), 1  ;;  %v1442_v7 = vld [vmem:[%s2365_s1 + $0x50] sm:$0xf]  ;;  %v1727_v8 = vld [vmem:[%s2365_s1 + $0x60] sm:$0xf0]  ;;  %v1869_v54 = vmov 0  }
   0xd   : > { %s1815_s16 = smul.u32 288, %s2373_s12  ;;  %v1482_v9 = vld [vmem:[%s2365_s1 + $0xa0] sm:$0xf]  ;;  %v1737_v11 = vld [vmem:[%s2365_s1 + $0xb0] sm:$0xf0]  ;;  %v1443_v18 = vor.u32 %v1727_v8, %v1442_v7  ;;  %1842 = vset.pattern.permute.xlu0 %v1869_v54  ;;  %1843 = vset.pattern.permute.xlu1 %v1869_v54  ;;  %vm252_vm0 = vcmask 523264  }
   0xe   : > { %v1522_v12 = vld [vmem:[%s2365_s1 + $0xf0] sm:$0xf]  ;;  %v1747_v13 = vld [vmem:[%s2365_s1 + $0x100] sm:$0xf0]  ;;  %v1402_v14 = vld [vmem:[%s2365_s1] sm:$0xf]  ;;  %v1483_v19 = vor.u32 %v1737_v11, %v1482_v9  ;;  %1844 = vset.pattern.permute.xlu2 %v1869_v54 }
   0xf   : > { %s1915_s19 = scalar_lea.vmem %s2364_s0, %s1815_s16  ;;  %v1717_v15 = vld [vmem:[%s2365_s1 + $0x10] sm:$0xf0]  ;;  %v1523_v20 = vor.u32 %v1747_v13, %v1522_v12  ;;  %v1462_v35 = vld [vmem:[%s2365_s1 + $0x78] sm:$0xf]  ;;  %v1732_v36 = vld [vmem:[%s2365_s1 + $0x88] sm:$0xf0] }
  0x10   : > { %v1762_v0 = vld [vmem:[%s1915_s19 + $0x38] sm:$0xff]  ;;  %v1761_v1 = vld [vmem:[%s1915_s19 + $0x30] sm:$0xff]  ;;  %v1760_v2 = vld [vmem:[%s1915_s19 + $0x28] sm:$0xff]  ;;  %v1403_v21 = vor.u32 %v1717_v15, %v1402_v14  ;;  %v1463_v46 = vor.u32 %v1732_v36, %v1462_v35  ;;  %s1714_s29 = sshll.u32 %s2373_s12, 7 }
  0x11   : > { %1791 = vmatpush.bf16.msra.mxu1 %v1762_v0  ;;  %1792 = vmatpush.bf16.msra.mxu2 %v1762_v0  ;;  %v1759_v3 = vld [vmem:[%s1915_s19 + $0x20] sm:$0xff]  ;;  %v1758_v4 = vld [vmem:[%s1915_s19 + $0x18] sm:$0xff]  ;;  %v1757_v5 = vld [vmem:[%s1915_s19 + $0x10] sm:$0xff]  ;;  %s2295_s5 = scalar_lea.vmem %s2367_s3, %s1714_s29 }
  0x12   : > { %1793 = vmatpush.bf16.msra.mxu3 %v1762_v0  ;;  %846 = vmatpush.bf16.msra.mxu0 %v1762_v0  ;;  %v1756_v6 = vld [vmem:[%s1915_s19 + $0x8] sm:$0xff]  ;;  %v1755_v10 = vld [vmem:[%s1915_s19] sm:$0xff]  ;;  %v1778_v16 = vld [vmem:[%s1915_s19 + $0xb8] sm:$0xff] }
  0x13   : > { %v1770_v17 = vld [vmem:[%s1915_s19 + $0x78] sm:$0xff]  ;;  %v1777_v24 = vld [vmem:[%s1915_s19 + $0xb0] sm:$0xff]  ;;  %v1776_v28 = vld [vmem:[%s1915_s19 + $0xa8] sm:$0xff] }
  0x14   : > { %v1786_v22 = vld [vmem:[%s1915_s19 + $0xf8] sm:$0xff]  ;;  %v1769_v25 = vld [vmem:[%s1915_s19 + $0x70] sm:$0xff]  ;;  %v1768_v29 = vld [vmem:[%s1915_s19 + $0x68] sm:$0xff] }
  0x15   : > { %1794 = vmatpush.bf16.msra.mxu1 %v1761_v1  ;;  %1795 = vmatpush.bf16.msra.mxu2 %v1761_v1  ;;  %v1790_v23 = vld [vmem:[%s1915_s19 + $0x118] sm:$0xff]  ;;  %v1785_v26 = vld [vmem:[%s1915_s19 + $0xf0] sm:$0xff]  ;;  %v1784_v30 = vld [vmem:[%s1915_s19 + $0xe8] sm:$0xff] }
  0x16   : > { %1796 = vmatpush.bf16.msra.mxu3 %v1761_v1  ;;  %847 = vmatpush.bf16.msra.mxu0 %v1761_v1  ;;  %v1789_v27 = vld [vmem:[%s1915_s19 + $0x110] sm:$0xff]  ;;  %v1788_v31 = vld [vmem:[%s1915_s19 + $0x108] sm:$0xff]  ;;  %v1775_v32 = vld [vmem:[%s1915_s19 + $0xa0] sm:$0xff] }
  0x17   : > { %v1767_v33 = vld [vmem:[%s1915_s19 + $0x60] sm:$0xff]  ;;  %v1502_v37 = vld [vmem:[%s2365_s1 + $0xc8] sm:$0xf]  ;;  %v1742_v38 = vld [vmem:[%s2365_s1 + $0xd8] sm:$0xf0] }
  0x18   : > { %v1783_v34 = vld [vmem:[%s1915_s19 + $0xe0] sm:$0xff]  ;;  %v1542_v39 = vld [vmem:[%s2365_s1 + $0x118] sm:$0xf]  ;;  %v1752_v40 = vld [vmem:[%s2365_s1 + $0x128] sm:$0xf0]  ;;  %v1503_v47 = vor.u32 %v1742_v38, %v1502_v37 }
  0x19   : > { %1797 = vmatpush.bf16.msra.mxu1 %v1760_v2  ;;  %1798 = vmatpush.bf16.msra.mxu2 %v1760_v2  ;;  %v1422_v41 = vld [vmem:[%s2365_s1 + $0x28] sm:$0xf]  ;;  %v1722_v42 = vld [vmem:[%s2365_s1 + $0x38] sm:$0xf0]  ;;  %v1787_v43 = vld [vmem:[%s1915_s19 + $0x100] sm:$0xff]  ;;  %v1543_v48 = vor.u32 %v1752_v40, %v1542_v39 }
  0x1a   : > { %1799 = vmatpush.bf16.msra.mxu3 %v1760_v2  ;;  %848 = vmatpush.bf16.msra.mxu0 %v1760_v2  ;;  %v1774_v44 = vld [vmem:[%s1915_s19 + $0x98] sm:$0xff]  ;;  %v1423_v49 = vor.u32 %v1722_v42, %v1422_v41  ;;  %v1773_v51 = vld [vmem:[%s1915_s19 + $0x90] sm:$0xff]  ;;  %v1772_v55 = vld [vmem:[%s1915_s19 + $0x88] sm:$0xff] }
  0x1b   : > { %v1766_v45 = vld [vmem:[%s1915_s19 + $0x58] sm:$0xff]  ;;  %v1765_v52 = vld [vmem:[%s1915_s19 + $0x50] sm:$0xff]  ;;  %v1764_v56 = vld [vmem:[%s1915_s19 + $0x48] sm:$0xff] }
  0x1c   : > { %v1782_v50 = vld [vmem:[%s1915_s19 + $0xd8] sm:$0xff]  ;;  %v1781_v53 = vld [vmem:[%s1915_s19 + $0xd0] sm:$0xff]  ;;  %v1780_v57 = vld [vmem:[%s1915_s19 + $0xc8] sm:$0xff] }
  0x1d   : > { %1800 = vmatpush.bf16.msra.mxu1 %v1759_v3  ;;  %1801 = vmatpush.bf16.msra.mxu2 %v1759_v3  ;;  %v1771_v58 = vld [vmem:[%s1915_s19 + $0x80] sm:$0xff]  ;;  %v1404_v62 = vld [vmem:[%s2365_s1 + $0x14] sm:$0xf0]  ;;  %v1410_v63 = vld [vmem:[%s2365_s1 + $0x8] sm:$0xf] }
  0x1e   : > { %1802 = vmatpush.bf16.msra.mxu3 %v1759_v3  ;;  %849 = vmatpush.bf16.msra.mxu0 %v1759_v3  ;;  %v1763_v59 = vld [vmem:[%s1915_s19 + $0x40] sm:$0xff]  ;;  %v1718_v0 = vld [vmem:[%s2365_s1 + $0x18] sm:$0xf0]  ;;  %v1716_v1 = vld [vmem:[%s2365_s1 + $0xc] sm:$0xf] }
  0x1f   : > { %v1779_v60 = vld [vmem:[%s1915_s19 + $0xc0] sm:$0xff]  ;;  %v1418_v3 = vld [vmem:[%s2365_s1 + $0x10] sm:$0xf]  ;;  %v1720_v11 = vld [vmem:[%s2365_s1 + $0x2c] sm:$0xf] }
  0x20   : > { %v1715_v61 = vld [vmem:[%s2365_s1 + $0x4] sm:$0xf]  ;;  %v1412_v2 = vld [vmem:[%s2365_s1 + $0x1c] sm:$0xf0]  ;;  %v1430_v13 = vld [vmem:[%s2365_s1 + $0x30] sm:$0xf] }
  0x21   : > { %1803 = vmatpush.bf16.msra.mxu1 %v1758_v4  ;;  %1804 = vmatpush.bf16.msra.mxu2 %v1758_v4  ;;  %v1415_v7 = vor.u32 %v1716_v1, %v1412_v2  ;;  %v1142_v9 = vld [vmem:[%s2366_s2] sm:$0xff]  ;;  %v1721_v15 = vld [vmem:[%s2365_s1 + $0x34] sm:$0xf]  ;;  %v1730_v37 = vld [vmem:[%s2365_s1 + $0x7c] sm:$0xf] }
  0x22   : > { %1805 = vmatpush.bf16.msra.mxu3 %v1758_v4  ;;  %850 = vmatpush.bf16.msra.mxu0 %v1758_v4  ;;  %v1719_v4 = vld [vmem:[%s2365_s1 + $0x20] sm:$0xf0]  ;;  %v1424_v12 = vld [vmem:[%s2365_s1 + $0x3c] sm:$0xf0]  ;;  %v1464_v38 = vld [vmem:[%s2365_s1 + $0x8c] sm:$0xf0] }
  0x23   : > { %v1419_v8 = vor.u32 %v1719_v4, %v1418_v3  ;;  %1160 = vperm.xlu0 %1842, %v1142_v9   ;;  %v1723_v14 = vld [vmem:[%s2365_s1 + $0x40] sm:$0xf0]  ;;  %v1470_v39 = vld [vmem:[%s2365_s1 + $0x80] sm:$0xf]  ;;  %v1733_v40 = vld [vmem:[%s2365_s1 + $0x90] sm:$0xf0] }
  0x24   : > { %v1731_v41 = vld [vmem:[%s2365_s1 + $0x84] sm:$0xf]  ;;  %v1472_v42 = vld [vmem:[%s2365_s1 + $0x94] sm:$0xf0]  ;;  %v1490_v54 = vld [vmem:[%s2365_s1 + $0xa8] sm:$0xf] }
  0x25   : > { %1806 = vmatpush.bf16.msra.mxu1 %v1757_v5  ;;  %1807 = vmatpush.bf16.msra.mxu2 %v1757_v5  ;;  %v1151_v1 = vld [vmem:[%s2366_s2 + $0x48] sm:$0xff]  ;;  %v1154_v2 = vld [vmem:[%s2366_s2 + $0x60] sm:$0xff]  ;;  %v1518_v9 = vld [vmem:[%s2365_s1 + $0xd8] sm:$0xf] }
  0x26   : > { %1808 = vmatpush.bf16.msra.mxu3 %v1757_v5  ;;  %851 = vmatpush.bf16.msra.mxu0 %v1757_v5  ;;  %v1407_v5 = vor.u32 %v1715_v61, %v1404_v62  ;;  %v1740_v3 = vld [vmem:[%s2365_s1 + $0xcc] sm:$0xf]  ;;  %v1504_v4 = vld [vmem:[%s2365_s1 + $0xdc] sm:$0xf0] }
  0x29   : > { %1809 = vmatpush.bf16.msra.mxu1 %v1756_v6  ;;  %1810 = vmatpush.bf16.msra.mxu2 %v1756_v6 }
  0x2a   : > { %1811 = vmatpush.bf16.msra.mxu3 %v1756_v6  ;;  %852 = vmatpush.bf16.msra.mxu0 %v1756_v6  ;;  %v1411_v6 = vor.u32 %v1718_v0, %v1410_v63  ;;  %v1147_v0 = vld [vmem:[%s2366_s2 + $0x28] sm:$0xff] }
  0x2d   : > { %1812 = vmatpush.bf16.msra.mxu1 %v1755_v10  ;;  %1813 = vmatpush.bf16.msra.mxu2 %v1755_v10 }
  0x2e   : > { %1814 = vmatpush.bf16.msra.mxu3 %v1755_v10  ;;  %853 = vmatpush.bf16.msra.mxu0 %v1755_v10  ;;  %v1143_v10 = vld [vmem:[%s2366_s2 + $0x8] sm:$0xff] }
  0x2f   : > { %1165 = vperm.xlu0 %1842, %v1143_v10   ;;  %v1744_v10 = vld [vmem:[%s2365_s1 + $0xe8] sm:$0xf0] }
  0x30   : > { %864 = vmatmul.bf16.vlgmr.msra.gmra.mxu1 %v1443_v18  ;;  %874 = vmatmul.bf16.vlgmr.msra.gmra.mxu2 %v1483_v19  ;;  %v1724_v18 = vld [vmem:[%s2365_s1 + $0x48] sm:$0xf0]  ;;  %v1427_v19 = vor.u32 %v1720_v11, %v1424_v12  ;;  %v1507_v11 = vor.u32 %v1740_v3, %v1504_v4 }
  0x31   : > { %944 = vmatpush.bf16.msrb.mxu2 %v1778_v16  ;;  %895 = vmatpush.bf16.msrb.mxu1 %v1770_v17  ;;  %v1432_v16 = vld [vmem:[%s2365_s1 + $0x44] sm:$0xf0]  ;;  %v1438_v17 = vld [vmem:[%s2365_s1 + $0x38] sm:$0xf] }
  0x32   : > { %884 = vmatmul.bf16.vlgmr.msra.gmra.mxu3 %v1523_v20  ;;  %854 = vmatmul.bf16.vlgmr.msra.gmra.mxu0 %v1403_v21  ;;  %v1431_v20 = vor.u32 %v1723_v14, %v1430_v13  ;;  %v1435_v21 = vor.u32 %v1721_v15, %v1432_v16  ;;  %v1519_v14 = vor.u32 %v1744_v10, %v1518_v9  ;;  %v1152_v15 = vld [vmem:[%s2366_s2 + $0x50] sm:$0xff]  ;;  %v1157_v16 = vld [vmem:[%s2366_s2 + $0x78] sm:$0xff] }
  0x33   : > { %993 = vmatpush.bf16.msrb.mxu3 %v1786_v22  ;;  %1046 = vmatpush.bf16.msrb.mxu0 %v1790_v23  ;;  %v1439_v22 = vor.u32 %v1724_v18, %v1438_v17  ;;  %v1144_v23 = vld [vmem:[%s2366_s2 + $0x10] sm:$0xff]  ;;  %v1150_v17 = vld [vmem:[%s2366_s2 + $0x40] sm:$0xff]  ;;  %v1155_v18 = vld [vmem:[%s2366_s2 + $0x68] sm:$0xff] }
  0x34   : > { %1170 = vperm.xlu1 %1843, %v1144_v23   ;;  %v1746_v23 = vld [vmem:[%s2365_s1 + $0xfc] sm:$0xf] }
  0x35   : > { %945 = vmatpush.bf16.msrb.mxu2 %v1777_v24  ;;  %896 = vmatpush.bf16.msrb.mxu1 %v1769_v25  ;;  %v1145_v24 = vld [vmem:[%s2366_s2 + $0x18] sm:$0xff]  ;;  %v1725_v25 = vld [vmem:[%s2365_s1 + $0x54] sm:$0xf] }
  0x37   : > { %994 = vmatpush.bf16.msrb.mxu3 %v1785_v26  ;;  %1047 = vmatpush.bf16.msrb.mxu0 %v1789_v27  ;;  %v1444_v26 = vld [vmem:[%s2365_s1 + $0x64] sm:$0xf0]  ;;  %v1450_v27 = vld [vmem:[%s2365_s1 + $0x58] sm:$0xf] }
  0x39   : > { %946 = vmatpush.bf16.msrb.mxu2 %v1776_v28  ;;  %897 = vmatpush.bf16.msrb.mxu1 %v1768_v29  ;;  %v1728_v28 = vld [vmem:[%s2365_s1 + $0x68] sm:$0xf0]  ;;  %v1726_v29 = vld [vmem:[%s2365_s1 + $0x5c] sm:$0xf] }
  0x3b   : > { %995 = vmatpush.bf16.msrb.mxu3 %v1784_v30  ;;  %1048 = vmatpush.bf16.msrb.mxu0 %v1788_v31  ;;  %v1452_v30 = vld [vmem:[%s2365_s1 + $0x6c] sm:$0xf0]  ;;  %v1458_v31 = vld [vmem:[%s2365_s1 + $0x60] sm:$0xf] }
  0x3c   : > { %1175 = vperm.xlu1 %1843, %v1145_v24   ;;  %v1455_v35 = vor.u32 %v1726_v29, %v1452_v30  ;;  %v1532_v24 = vld [vmem:[%s2365_s1 + $0x10c] sm:$0xf0] }
  0x3d   : > { %947 = vmatpush.bf16.msrb.mxu2 %v1775_v32  ;;  %898 = vmatpush.bf16.msrb.mxu1 %v1767_v33  ;;  %v1729_v32 = vld [vmem:[%s2365_s1 + $0x70] sm:$0xf0]  ;;  %v1447_v33 = vor.u32 %v1725_v25, %v1444_v26  ;;  %v1538_v25 = vld [vmem:[%s2365_s1 + $0x100] sm:$0xf]  ;;  %v1535_v30 = vor.u32 %v1746_v23, %v1532_v24 }
  0x3e   : > { %v1459_v36 = vor.u32 %v1729_v32, %v1458_v31  ;;  %v1749_v26 = vld [vmem:[%s2365_s1 + $0x110] sm:$0xf0] }
  0x3f   : > { %996 = vmatpush.bf16.msrb.mxu3 %v1783_v34  ;;  %1049 = vmatpush.bf16.msrb.mxu0 %v1787_v43  ;;  %v1451_v34 = vor.u32 %v1728_v28, %v1450_v27  ;;  %v1478_v43 = vld [vmem:[%s2365_s1 + $0x88] sm:$0xf]  ;;  %v1539_v31 = vor.u32 %v1749_v26, %v1538_v25 }
  0x40   : > { %869 = vmatmul.bf16.gmra.mxu1 %v1463_v46  ;;  %879 = vmatmul.bf16.gmra.mxu2 %v1503_v47  ;;  %v1471_v46 = vor.u32 %v1733_v40, %v1470_v39  ;;  %v1475_v47 = vor.u32 %v1731_v41, %v1472_v42  ;;  %v1544_v39 = vld [vmem:[%s2365_s1 + $0x12c] sm:$0xf0]  ;;  %v1550_v40 = vld [vmem:[%s2365_s1 + $0x120] sm:$0xf]  ;;  %v1753_v41 = vld [vmem:[%s2365_s1 + $0x130] sm:$0xf0] }
  0x41   : > { %948 = vmatpush.bf16.msrb.mxu2 %v1774_v44  ;;  %899 = vmatpush.bf16.msrb.mxu1 %v1766_v45  ;;  %v1734_v44 = vld [vmem:[%s2365_s1 + $0x98] sm:$0xf0]  ;;  %v1467_v45 = vor.u32 %v1730_v37, %v1464_v38  ;;  %v1751_v42 = vld [vmem:[%s2365_s1 + $0x124] sm:$0xf] }
  0x42   : > { %889 = vmatmul.bf16.gmra.mxu3 %v1543_v48  ;;  %859 = vmatmul.bf16.gmra.mxu0 %v1423_v49  ;;  %v1479_v48 = vor.u32 %v1734_v44, %v1478_v43  ;;  %v1148_v49 = vld [vmem:[%s2366_s2 + $0x30] sm:$0xff]  ;;  %v1750_v38 = vld [vmem:[%s2365_s1 + $0x11c] sm:$0xf]  ;;  %v1552_v43 = vld [vmem:[%s2365_s1 + $0x134] sm:$0xf0] }
  0x43   : > { %997 = vmatpush.bf16.msrb.mxu3 %v1782_v50  ;;  %v1146_v50 = vld [vmem:[%s2366_s2 + $0x20] sm:$0xff]  ;;  %1190 = vperm.xlu0 %1842, %v1148_v49   ;;  %v1153_v44 = vld [vmem:[%s2366_s2 + $0x58] sm:$0xff]  ;;  %v1547_v49 = vor.u32 %v1750_v38, %v1544_v39 }
  0x44   : > { %1180 = vperm.xlu2 %1844, %v1146_v50   ;;  %v1551_v50 = vor.u32 %v1753_v41, %v1550_v40 }
  0x45   : > { %949 = vmatpush.bf16.msrb.mxu2 %v1773_v51  ;;  %900 = vmatpush.bf16.msrb.mxu1 %v1765_v52  ;;  %v1149_v51 = vld [vmem:[%s2366_s2 + $0x38] sm:$0xff]  ;;  %v1735_v52 = vld [vmem:[%s2365_s1 + $0xa4] sm:$0xf] }
  0x46   : > { %1195 = vperm.xlu1 %1843, %v1149_v51  }
  0x47   : > { %998 = vmatpush.bf16.msrb.mxu3 %v1781_v53  ;;  %v1484_v53 = vld [vmem:[%s2365_s1 + $0xb4] sm:$0xf0] }
  0x49   : > { %950 = vmatpush.bf16.msrb.mxu2 %v1772_v55  ;;  %901 = vmatpush.bf16.msrb.mxu1 %v1764_v56  ;;  %v1738_v55 = vld [vmem:[%s2365_s1 + $0xb8] sm:$0xf0]  ;;  %v1736_v56 = vld [vmem:[%s2365_s1 + $0xac] sm:$0xf] }
  0x4a   : > { %v1491_v61 = vor.u32 %v1738_v55, %v1490_v54  ;;  %v1156_v55 = vld [vmem:[%s2366_s2 + $0x70] sm:$0xff] }
  0x4b   : > { %999 = vmatpush.bf16.msrb.mxu3 %v1780_v57  ;;  %v1492_v57 = vld [vmem:[%s2365_s1 + $0xbc] sm:$0xf0]  ;;  %1205 = vperm.xlu0 %1842, %v1151_v1  }
  0x4c   : > { %v1495_v62 = vor.u32 %v1736_v56, %v1492_v57  ;;  %1185 = vperm.xlu2 %1844, %v1147_v0  }
  0x4d   : > { %951 = vmatpush.bf16.msrb.mxu2 %v1771_v58  ;;  %902 = vmatpush.bf16.msrb.mxu1 %v1763_v59  ;;  %v1498_v58 = vld [vmem:[%s2365_s1 + $0xb0] sm:$0xf]  ;;  %v1739_v59 = vld [vmem:[%s2365_s1 + $0xc0] sm:$0xf0] }
  0x4e   : > { %v1499_v63 = vor.u32 %v1739_v59, %v1498_v58  ;;  %1210 = vperm.xlu1 %1843, %v1152_v15  }
  0x4f   : > { %1000 = vmatpush.bf16.msrb.mxu3 %v1779_v60  ;;  %v1487_v60 = vor.u32 %v1735_v52, %v1484_v53  ;;  %v1555_v52 = vor.u32 %v1751_v42, %v1552_v43 }
  0x50   : > { %903 = vmatmul.bf16.vlgmr.msrb.gmra.mxu1 %v1407_v5  ;;  %952 = vmatmul.bf16.vlgmr.msrb.gmra.mxu2 %v1411_v6  ;;  %v1510_v5 = vld [vmem:[%s2365_s1 + $0xd0] sm:$0xf]  ;;  %v1743_v6 = vld [vmem:[%s2365_s1 + $0xe0] sm:$0xf0] }
  0x51   : > { %v1511_v12 = vor.u32 %v1743_v6, %v1510_v5 }
  0x52   : > { %1001 = vmatmul.bf16.vlgmr.msrb.gmra.mxu3 %v1415_v7  ;;  %1704 = vmatmul.msk.bf16.vlgmr.msrb.gmra.mxu0 %vm252_vm0, %v1419_v8  ;;  %v1741_v7 = vld [vmem:[%s2365_s1 + $0xd4] sm:$0xf]  ;;  %v1512_v8 = vld [vmem:[%s2365_s1 + $0xe4] sm:$0xf0] }
  0x53   : > { %1220 = vperm.xlu0 %1842, %v1154_v2   ;;  %v1515_v13 = vor.u32 %v1741_v7, %v1512_v8 }
  0x54   : > { %1200 = vperm.xlu2 %1844, %v1150_v17  }
  0x56   : > { %1225 = vperm.xlu1 %1843, %v1155_v18  }
  0x5b   : > { %1235 = vperm.xlu0 %1842, %v1157_v16  }
  0x5c   : > { %1215 = vperm.xlu2 %1844, %v1153_v44  }
  0x60   : > { %908 = vmatmul.bf16.gmra.mxu1 %v1427_v19  ;;  %957 = vmatmul.bf16.gmra.mxu2 %v1431_v20  ;;  %v1745_v19 = vld [vmem:[%s2365_s1 + $0xf4] sm:$0xf]  ;;  %v1524_v20 = vld [vmem:[%s2365_s1 + $0x104] sm:$0xf0] }
  0x61   : > { %v1527_v27 = vor.u32 %v1745_v19, %v1524_v20 }
  0x62   : > { %1006 = vmatmul.bf16.gmra.mxu3 %v1435_v21  ;;  %1705 = vmatmul.msk.bf16.gmra.mxu0 %vm252_vm0, %v1439_v22  ;;  %v1530_v21 = vld [vmem:[%s2365_s1 + $0xf8] sm:$0xf]  ;;  %v1748_v22 = vld [vmem:[%s2365_s1 + $0x108] sm:$0xf0] }
  0x63   : > { %v1531_v28 = vor.u32 %v1748_v22, %v1530_v21 }
  0x64   : > { %1230 = vperm.xlu2 %1844, %v1156_v55  }
  0x70   : > { %913 = vmatmul.bf16.gmra.mxu1 %v1447_v33  ;;  %962 = vmatmul.bf16.gmra.mxu2 %v1451_v34  ;;  %v1870_v34 = vmov 0.0  }
  0x71   : > { %253 = vst.msk [vmem:[#allocation2] sm:$0xff] %vm252_vm0, %v1870_v34 }
  0x72   : > { %1011 = vmatmul.bf16.gmra.mxu3 %v1455_v35  ;;  %1706 = vmatmul.msk.bf16.gmra.mxu0 %vm252_vm0, %v1459_v36  ;;  %254 = vst.msk [vmem:[#allocation2 + $0x8] sm:$0xff] %vm252_vm0, %v1870_v34 }
  0x73   : > { %255 = vst.msk [vmem:[#allocation2 + $0x10] sm:$0xff] %vm252_vm0, %v1870_v34 }
  0x74   : > { %256 = vst.msk [vmem:[#allocation2 + $0x18] sm:$0xff] %vm252_vm0, %v1870_v34 }
  0x75   : > { %257 = vst.msk [vmem:[#allocation2 + $0x20] sm:$0xff] %vm252_vm0, %v1870_v34 }
  0x76   : > { %258 = vst.msk [vmem:[#allocation2 + $0x28] sm:$0xff] %vm252_vm0, %v1870_v34 }
  0x77   : > { %259 = vst.msk [vmem:[#allocation2 + $0x30] sm:$0xff] %vm252_vm0, %v1870_v34 }
  0x78   : > { %260 = vst.msk [vmem:[#allocation2 + $0x38] sm:$0xff] %vm252_vm0, %v1870_v34  ;;  %v269_v7 = vld [vmem:[#allocation2] sm:$0xff] }
  0x79   : > { %261 = vst.msk [vmem:[#allocation2 + $0x40] sm:$0xff] %vm252_vm0, %v1870_v34  ;;  %v270_v17 = vld [vmem:[#allocation2 + $0x8] sm:$0xff] }
  0x7a   : > { %262 = vst.msk [vmem:[#allocation2 + $0x48] sm:$0xff] %vm252_vm0, %v1870_v34 }
  0x7b   : > { %263 = vst.msk [vmem:[#allocation2 + $0x50] sm:$0xff] %vm252_vm0, %v1870_v34 }
  0x7c   : > { %264 = vst.msk [vmem:[#allocation2 + $0x58] sm:$0xff] %vm252_vm0, %v1870_v34 }
  0x7d   : > { %265 = vst.msk [vmem:[#allocation2 + $0x60] sm:$0xff] %vm252_vm0, %v1870_v34 }
  0x7e   : > { %266 = vst.msk [vmem:[#allocation2 + $0x68] sm:$0xff] %vm252_vm0, %v1870_v34 }
  0x7f   : > { %267 = vst.msk [vmem:[#allocation2 + $0x70] sm:$0xff] %vm252_vm0, %v1870_v34 }
  0x80   : > { %918 = vmatmul.bf16.gmra.mxu1 %v1467_v45  ;;  %967 = vmatmul.bf16.gmra.mxu2 %v1471_v46  ;;  %v1558_v45 = vld [vmem:[%s2365_s1 + $0x128] sm:$0xf]  ;;  %v1754_v46 = vld [vmem:[%s2365_s1 + $0x138] sm:$0xf0]  ;;  %268 = vst.msk [vmem:[#allocation2 + $0x78] sm:$0xff] %vm252_vm0, %v1870_v34 }
  0x81   : > { %v1559_v53 = vor.u32 %v1754_v46, %v1558_v45 }
  0x82   : > { %1016 = vmatmul.bf16.gmra.mxu3 %v1475_v47  ;;  %1707 = vmatmul.msk.bf16.gmra.mxu0 %vm252_vm0, %v1479_v48 }
  0x90   : > { %923 = vmatmul.bf16.gmra.mxu1 %v1487_v60  ;;  %972 = vmatmul.bf16.gmra.mxu2 %v1491_v61 }
  0x92   : > { %1021 = vmatmul.bf16.gmra.mxu3 %v1495_v62  ;;  %1708 = vmatmul.msk.bf16.gmra.mxu0 %vm252_vm0, %v1499_v63 }
  0x95   : > { %v1161_v18 = vpop.permute.xlu0 %1160 }
  0xa0   : > { %928 = vmatmul.bf16.gmra.mxu1 %v1507_v11  ;;  %977 = vmatmul.bf16.gmra.mxu2 %v1511_v12 }
  0xa2   : > { %1026 = vmatmul.bf16.gmra.mxu3 %v1515_v13  ;;  %1709 = vmatmul.msk.bf16.gmra.mxu0 %vm252_vm0, %v1519_v14 }
  0xad   : > { %v2217_v29 = vpop.f32.mrf.mxu1 }
  0xaf   : > { %v855_v32 = vpop.f32.mrf.mxu0 }
  0xb0   : > { %933 = vmatmul.bf16.gmra.mxu1 %v1527_v27  ;;  %982 = vmatmul.bf16.gmra.mxu2 %v1531_v28 }
  0xb2   : > { %1031 = vmatmul.bf16.gmra.mxu3 %v1535_v30  ;;  %1710 = vmatmul.msk.bf16.gmra.mxu0 %vm252_vm0, %v1539_v31 }
  0xb3   : > { %v2220_v33 = vpop.f32.mrf.mxu2 }
  0xb5   : > { %v2223_v35 = vpop.f32.mrf.mxu3  ;;  %v2226_v36 = vpop.f32.mrf.mxu1 }
  0xb7   : > { %v857_v37 = vpop.f32.mrf.mxu0 }
  0xbb   : > { %v2261_v47 = vpop.f32.mrf.mxu2 }
  0xbd   : > { %v2264_v48 = vpop.f32.mrf.mxu3  ;;  %v2267_v51 = vpop.f32.mrf.mxu1 }
  0xbf   : > { %v860_v54 = vpop.f32.mrf.mxu0 }
  0xc0   : > { %938 = vmatmul.bf16.gmra.mxu1 %v1547_v49  ;;  %987 = vmatmul.bf16.gmra.mxu2 %v1551_v50 }
  0xc2   : > { %1036 = vmatmul.bf16.gmra.mxu3 %v1555_v52  ;;  %1711 = vmatmul.msk.bf16.gmra.mxu0 %vm252_vm0, %v1559_v53  ;;  %v272_v52 = vld [vmem:[#allocation2 + $0x18] sm:$0xff]  ;;  %v1171_v53 = vpop.permute.xlu1 %1170 }
  0xc3   : > { %v2279_v56 = vpop.f32.mrf.mxu2 }
  0xc5   : > { %v2281_v57 = vpop.f32.mrf.mxu3  ;;  %v2283_v58 = vpop.f32.mrf.mxu1 }
  0xc7   : > { %v862_v59 = vpop.f32.mrf.mxu0 }
  0xcb   : > { %v2285_v60 = vpop.f32.mrf.mxu2 }
  0xcd   : > { %v2287_v61 = vpop.f32.mrf.mxu3  ;;  %v904_v62 = vpop.f32.mrf.mxu1 }
  0xce   : > { %v905_v0 = vadd.f32 %v904_v62, %v855_v32  ;;  %v271_v32 = vld [vmem:[#allocation2 + $0x10] sm:$0xff] }
  0xcf   : > { %v1051_v63 = vpop.f32.mrf.mxu0 }
  0xd3   : > { %v953_v1 = vpop.f32.mrf.mxu2 }
  0xd4   : > { %v954_v2 = vadd.f32 %v953_v1, %v905_v0 }
  0xd5   : > { %v1002_v3 = vpop.f32.mrf.mxu3  ;;  %v906_v4 = vpop.f32.mrf.mxu1 }
  0xd6   : > { %v1003_v5 = vadd.f32 %v1002_v3, %v954_v2  ;;  %v907_v10 = vadd.f32 %v906_v4, %v857_v37  ;;  %v1166_v37 = vpop.permute.xlu0 %1165 }
  0xd7   : > { %v1053_v6 = vpop.f32.mrf.mxu0 }
  0xd8   : > { %v1052_v8 = vadd.f32 %v1051_v63, %v1003_v5 }
  0xda   : > { %v1091_v9 = vadd.f32 %v1052_v8, %v269_v7  ;;  %v273_v7 = vld [vmem:[#allocation2 + $0x20] sm:$0xff] }
  0xdb   : > { %v955_v11 = vpop.f32.mrf.mxu2 }
  0xdc   : > { %1107 = vst.msk [vmem:[#allocation2] sm:$0xff] %vm252_vm0, %v1091_v9  ;;  %v956_v12 = vadd.f32 %v955_v11, %v907_v10  ;;  %v1176_v9 = vpop.permute.xlu1 %1175 }
  0xdd   : > { %v1004_v13 = vpop.f32.mrf.mxu3  ;;  %v909_v14 = vpop.f32.mrf.mxu1 }
  0xde   : > { %v1005_v15 = vadd.f32 %v1004_v13, %v956_v12  ;;  %v910_v21 = vadd.f32 %v909_v14, %v860_v54 }
  0xdf   : > { %v1056_v16 = vpop.f32.mrf.mxu0 }
  0xe0   : > { %v1054_v19 = vadd.f32 %v1053_v6, %v1005_v15 }
  0xe2   : > { %v1092_v20 = vadd.f32 %v1054_v19, %v270_v17 }
  0xe3   : > { %v1126_v22 = vld [vmem:[#allocation2] sm:$0xff]  ;;  %v958_v23 = vpop.f32.mrf.mxu2 }
  0xe4   : > { %1108 = vst.msk [vmem:[#allocation2 + $0x8] sm:$0xff] %vm252_vm0, %v1092_v20  ;;  %v1238_v24 = vadd.f32 %v1161_v18, %v1126_v22  ;;  %v959_v25 = vadd.f32 %v958_v23, %v910_v21  ;;  %v274_v20 = vld [vmem:[#allocation2 + $0x28] sm:$0xff]  ;;  %v1181_v21 = vpop.permute.xlu2 %1180 }
  0xe5   : > { %v1007_v26 = vpop.f32.mrf.mxu3  ;;  %v911_v27 = vpop.f32.mrf.mxu1 }
  0xe6   : > { %v1254_v28 = vmax.f32 %v1238_v24, 0.0  ;;  %v1008_v30 = vadd.f32 %v1007_v26, %v959_v25  ;;  %v912_v39 = vadd.f32 %v911_v27, %v862_v59 }
  0xe7   : > { %v1058_v31 = vpop.f32.mrf.mxu0 }
  0xe8   : > { %1270 = vst.msk [vmem:[%s2295_s5] sm:$0xff] %vm252_vm0, %v1254_v28  ;;  %v1057_v34 = vadd.f32 %v1056_v16, %v1008_v30 }
  0xea   : > { %v1093_v38 = vadd.f32 %v1057_v34, %v271_v32 }
  0xeb   : > { %v1127_v40 = vld [vmem:[#allocation2 + $0x8] sm:$0xff]  ;;  %v960_v41 = vpop.f32.mrf.mxu2 }
  0xec   : > { %1109 = vst.msk [vmem:[#allocation2 + $0x10] sm:$0xff] %vm252_vm0, %v1093_v38  ;;  %v1239_v42 = vadd.f32 %v1166_v37, %v1127_v40  ;;  %v961_v43 = vadd.f32 %v960_v41, %v912_v39  ;;  %v275_v37 = vld [vmem:[#allocation2 + $0x30] sm:$0xff]  ;;  %v1186_v39 = vpop.permute.xlu2 %1185 }
  0xed   : > { %v1009_v44 = vpop.f32.mrf.mxu3  ;;  %v914_v45 = vpop.f32.mrf.mxu1 }
  0xee   : > { %v1255_v46 = vmax.f32 %v1239_v42, 0.0  ;;  %v1010_v49 = vadd.f32 %v1009_v44, %v961_v43  ;;  %v915_v59 = vadd.f32 %v914_v45, %v2217_v29 }
  0xef   : > { %v1061_v50 = vpop.f32.mrf.mxu0 }
  0xf0   : > { %1271 = vst.msk [vmem:[%s2295_s5 + $0x8] sm:$0xff] %vm252_vm0, %v1255_v46  ;;  %v1059_v54 = vadd.f32 %v1058_v31, %v1010_v49 }
  0xf2   : > { %v1094_v55 = vadd.f32 %v1059_v54, %v272_v52 }
  0xf3   : > { %v1128_v62 = vld [vmem:[#allocation2 + $0x10] sm:$0xff]  ;;  %v963_v63 = vpop.f32.mrf.mxu2 }
  0xf4   : > { %1110 = vst.msk [vmem:[#allocation2 + $0x18] sm:$0xff] %vm252_vm0, %v1094_v55  ;;  %v1240_v0 = vadd.f32 %v1171_v53, %v1128_v62  ;;  %v964_v1 = vadd.f32 %v963_v63, %v915_v59  ;;  %v276_v53 = vld [vmem:[#allocation2 + $0x38] sm:$0xff]  ;;  %v1191_v55 = vpop.permute.xlu0 %1190 }
  0xf5   : > { %v1012_v2 = vpop.f32.mrf.mxu3  ;;  %v916_v3 = vpop.f32.mrf.mxu1 }
  0xf6   : > { %v1256_v4 = vmax.f32 %v1240_v0, 0.0  ;;  %v1013_v5 = vadd.f32 %v1012_v2, %v964_v1  ;;  %v917_v29 = vadd.f32 %v916_v3, %v2226_v36 }
  0xf7   : > { %v1063_v6 = vpop.f32.mrf.mxu0 }
  0xf8   : > { %1272 = vst.msk [vmem:[%s2295_s5 + $0x10] sm:$0xff] %vm252_vm0, %v1256_v4  ;;  %v1062_v8 = vadd.f32 %v1061_v50, %v1013_v5 }
  0xfa   : > { %v1095_v10 = vadd.f32 %v1062_v8, %v273_v7  ;;  %v277_v7 = vld [vmem:[#allocation2 + $0x40] sm:$0xff] }
  0xfb   : > { %v1129_v11 = vld [vmem:[#allocation2 + $0x18] sm:$0xff]  ;;  %v965_v12 = vpop.f32.mrf.mxu2 }
  0xfc   : > { %1111 = vst.msk [vmem:[#allocation2 + $0x20] sm:$0xff] %vm252_vm0, %v1095_v10  ;;  %v1241_v13 = vadd.f32 %v1176_v9, %v1129_v11  ;;  %v966_v14 = vadd.f32 %v965_v12, %v917_v29  ;;  %v1196_v9 = vpop.permute.xlu1 %1195 }
  0xfd   : > { %v1014_v15 = vpop.f32.mrf.mxu3  ;;  %v919_v16 = vpop.f32.mrf.mxu1 }
  0xfe   : > { %v1257_v17 = vmax.f32 %v1241_v13, 0.0  ;;  %v1015_v18 = vadd.f32 %v1014_v15, %v966_v14  ;;  %v920_v36 = vadd.f32 %v919_v16, %v2267_v51 }
  0xff   : > { %v1066_v19 = vpop.f32.mrf.mxu0 }
 0x100   : > { %1273 = vst.msk [vmem:[%s2295_s5 + $0x18] sm:$0xff] %vm252_vm0, %v1257_v17  ;;  %v1064_v22 = vadd.f32 %v1063_v6, %v1015_v18 }
 0x102   : > { %v1096_v23 = vadd.f32 %v1064_v22, %v274_v20 }
 0x103   : > { %v1130_v24 = vld [vmem:[#allocation2 + $0x20] sm:$0xff]  ;;  %v968_v25 = vpop.f32.mrf.mxu2 }
 0x104   : > { %1112 = vst.msk [vmem:[#allocation2 + $0x28] sm:$0xff] %vm252_vm0, %v1096_v23  ;;  %v1242_v26 = vadd.f32 %v1181_v21, %v1130_v24  ;;  %v969_v27 = vadd.f32 %v968_v25, %v920_v36  ;;  %v1201_v21 = vpop.permute.xlu2 %1200 }
 0x105   : > { %v1017_v28 = vpop.f32.mrf.mxu3  ;;  %v921_v30 = vpop.f32.mrf.mxu1 }
 0x106   : > { %v1258_v31 = vmax.f32 %v1242_v26, 0.0  ;;  %v1018_v32 = vadd.f32 %v1017_v28, %v969_v27  ;;  %v922_v51 = vadd.f32 %v921_v30, %v2283_v58 }
 0x107   : > { %v1068_v34 = vpop.f32.mrf.mxu0 }
 0x108   : > { %1274 = vst.msk [vmem:[%s2295_s5 + $0x20] sm:$0xff] %vm252_vm0, %v1258_v31  ;;  %v1067_v38 = vadd.f32 %v1066_v19, %v1018_v32  ;;  %v278_v19 = vld [vmem:[#allocation2 + $0x48] sm:$0xff]  ;;  %v279_v31 = vld [vmem:[#allocation2 + $0x50] sm:$0xff] }
 0x10a   : > { %v1097_v40 = vadd.f32 %v1067_v38, %v275_v37 }
 0x10b   : > { %v1131_v41 = vld [vmem:[#allocation2 + $0x28] sm:$0xff]  ;;  %v970_v42 = vpop.f32.mrf.mxu2 }
 0x10c   : > { %1113 = vst.msk [vmem:[#allocation2 + $0x30] sm:$0xff] %vm252_vm0, %v1097_v40  ;;  %v1243_v43 = vadd.f32 %v1186_v39, %v1131_v41  ;;  %v971_v44 = vadd.f32 %v970_v42, %v922_v51 }
 0x10d   : > { %v1019_v45 = vpop.f32.mrf.mxu3  ;;  %v924_v46 = vpop.f32.mrf.mxu1 }
 0x10e   : > { %v1259_v49 = vmax.f32 %v1243_v43, 0.0  ;;  %v1020_v50 = vadd.f32 %v1019_v45, %v971_v44  ;;  %v925_v58 = vadd.f32 %v924_v46, %v2220_v33  ;;  %v280_v46 = vld [vmem:[#allocation2 + $0x58] sm:$0xff] }
 0x10f   : > { %v1071_v52 = vpop.f32.mrf.mxu0 }
 0x110   : > { %1275 = vst.msk [vmem:[%s2295_s5 + $0x28] sm:$0xff] %vm252_vm0, %v1259_v49  ;;  %v1069_v54 = vadd.f32 %v1068_v34, %v1020_v50 }
 0x112   : > { %v1098_v59 = vadd.f32 %v1069_v54, %v276_v53 }
 0x113   : > { %v1132_v62 = vld [vmem:[#allocation2 + $0x30] sm:$0xff]  ;;  %v973_v63 = vpop.f32.mrf.mxu2 }
 0x114   : > { %1114 = vst.msk [vmem:[#allocation2 + $0x38] sm:$0xff] %vm252_vm0, %v1098_v59  ;;  %v1244_v0 = vadd.f32 %v1191_v55, %v1132_v62  ;;  %v974_v1 = vadd.f32 %v973_v63, %v925_v58 }
 0x115   : > { %v1022_v2 = vpop.f32.mrf.mxu3  ;;  %v926_v3 = vpop.f32.mrf.mxu1 }
 0x116   : > { %v1260_v4 = vmax.f32 %v1244_v0, 0.0  ;;  %v1023_v5 = vadd.f32 %v1022_v2, %v974_v1  ;;  %v927_v33 = vadd.f32 %v926_v3, %v2261_v47  ;;  %v281_v2 = vld [vmem:[#allocation2 + $0x60] sm:$0xff] }
 0x117   : > { %v1073_v6 = vpop.f32.mrf.mxu0 }
 0x118   : > { %1276 = vst.msk [vmem:[%s2295_s5 + $0x30] sm:$0xff] %vm252_vm0, %v1260_v4  ;;  %v1072_v8 = vadd.f32 %v1071_v52, %v1023_v5  ;;  %v1211_v52 = vpop.permute.xlu1 %1210  ;;  %v1216_v4 = vpop.permute.xlu2 %1215 }
 0x11a   : > { %v1099_v10 = vadd.f32 %v1072_v8, %v277_v7 }
 0x11b   : > { %v1133_v29 = vld [vmem:[#allocation2 + $0x38] sm:$0xff]  ;;  %v975_v11 = vpop.f32.mrf.mxu2 }
 0x11c   : > { %1115 = vst.msk [vmem:[#allocation2 + $0x40] sm:$0xff] %vm252_vm0, %v1099_v10  ;;  %v1245_v12 = vadd.f32 %v1196_v9, %v1133_v29  ;;  %v976_v13 = vadd.f32 %v975_v11, %v927_v33 }
 0x11d   : > { %v1024_v14 = vpop.f32.mrf.mxu3  ;;  %v929_v15 = vpop.f32.mrf.mxu1 }
 0x11e   : > { %v1261_v16 = vmax.f32 %v1245_v12, 0.0  ;;  %v1025_v17 = vadd.f32 %v1024_v14, %v976_v13  ;;  %v930_v47 = vadd.f32 %v929_v15, %v2279_v56  ;;  %v1206_v56 = vpop.permute.xlu0 %1205  ;;  %v282_v13 = vld [vmem:[#allocation2 + $0x68] sm:$0xff] }
 0x11f   : > { %v1076_v18 = vpop.f32.mrf.mxu0 }
 0x120   : > { %1277 = vst.msk [vmem:[%s2295_s5 + $0x38] sm:$0xff] %vm252_vm0, %v1261_v16  ;;  %v1074_v20 = vadd.f32 %v1073_v6, %v1025_v17 }
 0x122   : > { %v1100_v22 = vadd.f32 %v1074_v20, %v278_v19 }
 0x123   : > { %v1134_v23 = vld [vmem:[#allocation2 + $0x40] sm:$0xff]  ;;  %v978_v36 = vpop.f32.mrf.mxu2 }
 0x124   : > { %1116 = vst.msk [vmem:[#allocation2 + $0x48] sm:$0xff] %vm252_vm0, %v1100_v22  ;;  %v1246_v24 = vadd.f32 %v1201_v21, %v1134_v23  ;;  %v979_v25 = vadd.f32 %v978_v36, %v930_v47  ;;  %v283_v36 = vld [vmem:[#allocation2 + $0x70] sm:$0xff] }
 0x125   : > { %v1027_v26 = vpop.f32.mrf.mxu3  ;;  %v931_v27 = vpop.f32.mrf.mxu1 }
 0x126   : > { %v1262_v28 = vmax.f32 %v1246_v24, 0.0  ;;  %v1028_v30 = vadd.f32 %v1027_v26, %v979_v25  ;;  %v932_v38 = vadd.f32 %v931_v27, %v2285_v60  ;;  %v1226_v27 = vpop.permute.xlu1 %1225 }
 0x127   : > { %v1078_v32 = vpop.f32.mrf.mxu0 }
 0x128   : > { %1278 = vst.msk [vmem:[%s2295_s5 + $0x40] sm:$0xff] %vm252_vm0, %v1262_v28  ;;  %v1077_v34 = vadd.f32 %v1076_v18, %v1028_v30 }
 0x12a   : > { %v1101_v37 = vadd.f32 %v1077_v34, %v279_v31 }
 0x12b   : > { %v1135_v39 = vld [vmem:[#allocation2 + $0x48] sm:$0xff]  ;;  %v980_v40 = vpop.f32.mrf.mxu2 }
 0x12c   : > { %v1247_v51 = vadd.f32 %v1206_v56, %v1135_v39  ;;  %1117 = vst.msk [vmem:[#allocation2 + $0x50] sm:$0xff] %vm252_vm0, %v1101_v37  ;;  %v981_v41 = vadd.f32 %v980_v40, %v932_v38  ;;  %v284_v39 = vld [vmem:[#allocation2 + $0x78] sm:$0xff] }
 0x12d   : > { %v1029_v42 = vpop.f32.mrf.mxu3  ;;  %v934_v43 = vpop.f32.mrf.mxu1 }
 0x12e   : > { %v1263_v44 = vmax.f32 %v1247_v51, 0.0  ;;  %v1030_v45 = vadd.f32 %v1029_v42, %v981_v41  ;;  %v935_v60 = vadd.f32 %v934_v43, %v2223_v35  ;;  %v1231_v41 = vpop.permute.xlu2 %1230 }
 0x12f   : > { %v1081_v50 = vpop.f32.mrf.mxu0 }
 0x130   : > { %1279 = vst.msk [vmem:[%s2295_s5 + $0x48] sm:$0xff] %vm252_vm0, %v1263_v44  ;;  %v1079_v49 = vadd.f32 %v1078_v32, %v1030_v45 }
 0x132   : > { %v1102_v53 = vadd.f32 %v1079_v49, %v280_v46 }
 0x133   : > { %v1136_v54 = vld [vmem:[#allocation2 + $0x50] sm:$0xff]  ;;  %v983_v55 = vpop.f32.mrf.mxu2 }
 0x134   : > { %1118 = vst.msk [vmem:[#allocation2 + $0x58] sm:$0xff] %vm252_vm0, %v1102_v53  ;;  %v1248_v59 = vadd.f32 %v1211_v52, %v1136_v54  ;;  %v984_v58 = vadd.f32 %v983_v55, %v935_v60 }
 0x135   : > { %v1032_v62 = vpop.f32.mrf.mxu3  ;;  %v936_v63 = vpop.f32.mrf.mxu1 }
 0x136   : > { %v1264_v0 = vmax.f32 %v1248_v59, 0.0  ;;  %v1033_v1 = vadd.f32 %v1032_v62, %v984_v58  ;;  %v937_v6 = vadd.f32 %v936_v63, %v2264_v48  ;;  %v1221_v48 = vpop.permute.xlu0 %1220 }
 0x137   : > { %v1083_v7 = vpop.f32.mrf.mxu0 }
 0x138   : > { %1280 = vst.msk [vmem:[%s2295_s5 + $0x50] sm:$0xff] %vm252_vm0, %v1264_v0  ;;  %v1082_v3 = vadd.f32 %v1081_v50, %v1033_v1 }
 0x13a   : > { %v1103_v5 = vadd.f32 %v1082_v3, %v281_v2 }
 0x13b   : > { %v1137_v35 = vld [vmem:[#allocation2 + $0x58] sm:$0xff]  ;;  %v985_v8 = vpop.f32.mrf.mxu2 }
 0x13c   : > { %v1249_v9 = vadd.f32 %v1216_v4, %v1137_v35  ;;  %1119 = vst.msk [vmem:[#allocation2 + $0x60] sm:$0xff] %vm252_vm0, %v1103_v5  ;;  %v986_v10 = vadd.f32 %v985_v8, %v937_v6 }
 0x13d   : > { %v1034_v33 = vpop.f32.mrf.mxu3  ;;  %v939_v29 = vpop.f32.mrf.mxu1 }
 0x13e   : > { %v1265_v11 = vmax.f32 %v1249_v9, 0.0  ;;  %v1035_v12 = vadd.f32 %v1034_v33, %v986_v10  ;;  %v940_v16 = vadd.f32 %v939_v29, %v2281_v57  ;;  %v1236_v44 = vpop.permute.xlu0 %1235 }
 0x13f   : > { %v1086_v22 = vpop.f32.mrf.mxu0 }
 0x140   : > { %1281 = vst.msk [vmem:[%s2295_s5 + $0x58] sm:$0xff] %vm252_vm0, %v1265_v11  ;;  %v1084_v14 = vadd.f32 %v1083_v7, %v1035_v12 }
 0x142   : > { %v1104_v15 = vadd.f32 %v1084_v14, %v282_v13 }
 0x143   : > { %v1138_v17 = vld [vmem:[#allocation2 + $0x60] sm:$0xff]  ;;  %v988_v18 = vpop.f32.mrf.mxu2 }
 0x144   : > { %v1250_v19 = vadd.f32 %v1221_v48, %v1138_v17  ;;  %1120 = vst.msk [vmem:[#allocation2 + $0x68] sm:$0xff] %vm252_vm0, %v1104_v15  ;;  %v989_v20 = vadd.f32 %v988_v18, %v940_v16 }
 0x145   : > { %v1037_v21 = vpop.f32.mrf.mxu3  ;;  %v941_v24 = vpop.f32.mrf.mxu1 }
 0x146   : > { %v1266_v47 = vmax.f32 %v1250_v19, 0.0  ;;  %v1038_v23 = vadd.f32 %v1037_v21, %v989_v20  ;;  %v942_v57 = vadd.f32 %v941_v24, %v2287_v61 }
 0x147   : > { %v1088_v56 = vpop.f32.mrf.mxu0 }
 0x148   : > { %1282 = vst.msk [vmem:[%s2295_s5 + $0x60] sm:$0xff] %vm252_vm0, %v1266_v47  ;;  %v1087_v25 = vadd.f32 %v1086_v22, %v1038_v23 }
 0x14a   : > { %v1105_v26 = vadd.f32 %v1087_v25, %v283_v36 }
 0x14b   : > { %v1139_v28 = vld [vmem:[#allocation2 + $0x68] sm:$0xff]  ;;  %v990_v30 = vpop.f32.mrf.mxu2 }
 0x14c   : > { %v1251_v31 = vadd.f32 %v1226_v27, %v1139_v28  ;;  %1121 = vst.msk [vmem:[#allocation2 + $0x70] sm:$0xff] %vm252_vm0, %v1105_v26  ;;  %v991_v32 = vadd.f32 %v990_v30, %v942_v57 }
 0x14d   : > { %v1039_v34 = vpop.f32.mrf.mxu3 }
 0x14e   : > { %v1267_v37 = vmax.f32 %v1251_v31, 0.0  ;;  %v1040_v38 = vadd.f32 %v1039_v34, %v991_v32 }
 0x150   : > { %1283 = vst.msk [vmem:[%s2295_s5 + $0x68] sm:$0xff] %vm252_vm0, %v1267_v37  ;;  %v1089_v40 = vadd.f32 %v1088_v56, %v1040_v38 }
 0x152   : > { %v1106_v51 = vadd.f32 %v1089_v40, %v284_v39 }
 0x153   : > { %v1140_v61 = vld [vmem:[#allocation2 + $0x70] sm:$0xff] }
 0x154   : > { %v1252_v42 = vadd.f32 %v1231_v41, %v1140_v61  ;;  %1122 = vst.msk [vmem:[#allocation2 + $0x78] sm:$0xff] %vm252_vm0, %v1106_v51 }
 0x156   : > { %v1268_v43 = vmax.f32 %v1252_v42, 0.0 }
 0x158   : > { %1284 = vst.msk [vmem:[%s2295_s5 + $0x70] sm:$0xff] %vm252_vm0, %v1268_v43 }
 0x15b   : > { %v1141_v45 = vld [vmem:[#allocation2 + $0x78] sm:$0xff] }
 0x15c   : > { %v1253_v46 = vadd.f32 %v1236_v44, %v1141_v45 }
 0x15e   : > { %v1269_v49 = vmax.f32 %v1253_v46, 0.0 }
 0x160   : > { %1285 = vst.msk [vmem:[%s2295_s5 + $0x78] sm:$0xff] %vm252_vm0, %v1269_v49 }
 0x161 PF: > { %s13_s14 = sadd.s32 1, %s1867_s14   ;;  %s2368_s12 = smov %s1863_s13 }
 0x162   : > { %p10_p5 = scmp.ge.s32.totalorder %s13_s14, 4   ;;  %s2369_s13 = smov %s2371_s15 }
 0x164   :  { %12 = sbr.rel (!%p10_p5) target bundleno = 2 (0x2), region = 73 }

// kernel: style_loss.14
= control target key start
LH: loop header
LB: loop body
LE: loop exit
PB: predicated region body
PF: predicated region fallthrough
CT: control target
= control target key end

     0   :  { %vm134_vm0 = vcmask 523264   ;;  %s765_s0 = inlined_call_operand.vmem [shape: bf16[2,128,64], index: 0, kind: input, shape index: {}]   ;;  %s766_s1 = inlined_call_operand.hbm [shape: f32[1,1], index: 1, kind: output, shape index: {}]  }
   0x1   :  { %v669_v0 = vld [vmem:[%s765_s0 + $0x38] sm:$0xff] }
   0x2   :  { %v674_v1 = vld [vmem:[%s765_s0 + $0x78] sm:$0xff]  ;;  %v157_v2 = vsel %vm134_vm0, %v669_v0, 0 }
   0x3   :  { %v318_v3 = vsel %vm134_vm0, %v674_v1, 0  ;;  %159 = vmatpush.bf16.xpose.msra.mxu0 %v157_v2 }
   0x4   :  { %320 = vmatpush.bf16.xpose.msra.mxu1 %v318_v3 }
   0x5   :  { %6 = vsyncpa [#allocation5], 0  ;;  %622 = vmatpush.bf16.xpose.msra.mxu2 %v157_v2  ;;  %630 = vmatpush.bf16.xpose.msra.mxu3 %v318_v3  ;;  %v683_v4 = vld [vmem:[%s765_s0 + $0x30] sm:$0xff]  ;;  %v611_v8 = vld [vmem:[%s765_s0 + $0x28] sm:$0xff]  ;;  %s500_s10 = sshll.u32 %s766_s1, 4  ;;  %s655_s13 = smov [#allocation4]   ;;  %s501_s10 = int_to_ptr.hbm [resolvable:$true] %s500_s10 }
   0x6   :  { %v688_v5 = vld [vmem:[%s765_s0 + $0x70] sm:$0xff]  ;;  %v154_v6 = vsel %vm134_vm0, %v683_v4, 0  ;;  %v619_v9 = vld [vmem:[%s765_s0 + $0x68] sm:$0xff]  ;;  %v151_v10 = vsel %vm134_vm0, %v611_v8, 0  ;;  %v610_v12 = vld [vmem:[%s765_s0 + $0x20] sm:$0xff] }
   0x7   :  { %v315_v7 = vsel %vm134_vm0, %v688_v5, 0  ;;  %v312_v11 = vsel %vm134_vm0, %v619_v9, 0  ;;  %v618_v13 = vld [vmem:[%s765_s0 + $0x60] sm:$0xff]  ;;  %v148_v14 = vsel %vm134_vm0, %v610_v12, 0  ;;  %v609_v16 = vld [vmem:[%s765_s0 + $0x18] sm:$0xff]  ;;  %v608_v20 = vld [vmem:[%s765_s0 + $0x10] sm:$0xff] }
   0x8   :  { %v309_v15 = vsel %vm134_vm0, %v618_v13, 0  ;;  %v617_v17 = vld [vmem:[%s765_s0 + $0x58] sm:$0xff]  ;;  %v145_v18 = vsel %vm134_vm0, %v609_v16, 0  ;;  %v616_v21 = vld [vmem:[%s765_s0 + $0x50] sm:$0xff]  ;;  %v142_v22 = vsel %vm134_vm0, %v608_v20, 0  ;;  %v607_v24 = vld [vmem:[%s765_s0 + $0x8] sm:$0xff] }
   0x9   :  { %v306_v19 = vsel %vm134_vm0, %v617_v17, 0  ;;  %v303_v23 = vsel %vm134_vm0, %v616_v21, 0  ;;  %v615_v25 = vld [vmem:[%s765_s0 + $0x48] sm:$0xff]  ;;  %v139_v26 = vsel %vm134_vm0, %v607_v24, 0  ;;  %v606_v28 = vld [vmem:[%s765_s0] sm:$0xff] }
   0xa   :  { %v300_v27 = vsel %vm134_vm0, %v615_v25, 0  ;;  %v614_v29 = vld [vmem:[%s765_s0 + $0x40] sm:$0xff]  ;;  %v136_v30 = vsel %vm134_vm0, %v606_v28, 0 }
   0xb   :  { %160 = vmatpush.bf16.xpose.msra.mxu0 %v154_v6  ;;  %v297_v31 = vsel %vm134_vm0, %v614_v29, 0 }
   0xc   :  { %321 = vmatpush.bf16.xpose.msra.mxu1 %v315_v7 }
   0xd   :  { %623 = vmatpush.bf16.xpose.msra.mxu2 %v154_v6  ;;  %631 = vmatpush.bf16.xpose.msra.mxu3 %v315_v7 }
  0x13   :  { %161 = vmatpush.bf16.xpose.msra.mxu0 %v151_v10 }
  0x14   :  { %322 = vmatpush.bf16.xpose.msra.mxu1 %v312_v11 }
  0x15   :  { %624 = vmatpush.bf16.xpose.msra.mxu2 %v151_v10  ;;  %632 = vmatpush.bf16.xpose.msra.mxu3 %v312_v11 }
  0x1b   :  { %162 = vmatpush.bf16.xpose.msra.mxu0 %v148_v14 }
  0x1c   :  { %323 = vmatpush.bf16.xpose.msra.mxu1 %v309_v15 }
  0x1d   :  { %625 = vmatpush.bf16.xpose.msra.mxu2 %v148_v14  ;;  %633 = vmatpush.bf16.xpose.msra.mxu3 %v309_v15 }
  0x23   :  { %163 = vmatpush.bf16.xpose.msra.mxu0 %v145_v18 }
  0x24   :  { %324 = vmatpush.bf16.xpose.msra.mxu1 %v306_v19 }
  0x25   :  { %626 = vmatpush.bf16.xpose.msra.mxu2 %v145_v18  ;;  %634 = vmatpush.bf16.xpose.msra.mxu3 %v306_v19 }
  0x2b   :  { %164 = vmatpush.bf16.xpose.msra.mxu0 %v142_v22 }
  0x2c   :  { %325 = vmatpush.bf16.xpose.msra.mxu1 %v303_v23 }
  0x2d   :  { %627 = vmatpush.bf16.xpose.msra.mxu2 %v142_v22  ;;  %635 = vmatpush.bf16.xpose.msra.mxu3 %v303_v23 }
  0x33   :  { %165 = vmatpush.bf16.xpose.msra.mxu0 %v139_v26 }
  0x34   :  { %326 = vmatpush.bf16.xpose.msra.mxu1 %v300_v27 }
  0x35   :  { %628 = vmatpush.bf16.xpose.msra.mxu2 %v139_v26  ;;  %636 = vmatpush.bf16.xpose.msra.mxu3 %v300_v27 }
  0x3b   :  { %166 = vmatpush.bf16.xpose.msra.mxu0 %v136_v30 }
  0x3c   :  { %327 = vmatpush.bf16.xpose.msra.mxu1 %v297_v31 }
  0x3d   :  { %629 = vmatpush.bf16.xpose.msra.mxu2 %v136_v30  ;;  %637 = vmatpush.bf16.xpose.msra.mxu3 %v297_v31 }
  0x42   :  { %558 = vmatmul.msk.bf16.vlgmr.msra.gmra.mxu0 %vm134_vm0, %v606_v28 }
  0x43   :  { %598 = vmatmul.msk.bf16.vlgmr.msra.gmra.mxu1 %vm134_vm0, %v614_v29 }
  0x44   :  { %562 = vmatmul.msk.bf16.vlgmr.msra.gmra.mxu2 %vm134_vm0, %v610_v12  ;;  %602 = vmatmul.msk.bf16.vlgmr.msra.gmra.mxu3 %vm134_vm0, %v618_v13 }
  0x52   :  { %559 = vmatmul.msk.bf16.gmra.mxu0 %vm134_vm0, %v607_v24 }
  0x53   :  { %599 = vmatmul.msk.bf16.gmra.mxu1 %vm134_vm0, %v615_v25 }
  0x54   :  { %563 = vmatmul.msk.bf16.gmra.mxu2 %vm134_vm0, %v611_v8  ;;  %603 = vmatmul.msk.bf16.gmra.mxu3 %vm134_vm0, %v619_v9 }
  0x62   :  { %560 = vmatmul.msk.bf16.gmra.mxu0 %vm134_vm0, %v608_v20 }
  0x63   :  { %600 = vmatmul.msk.bf16.gmra.mxu1 %vm134_vm0, %v616_v21 }
  0x64   :  { %564 = vmatmul.msk.bf16.gmra.mxu2 %vm134_vm0, %v683_v4  ;;  %604 = vmatmul.msk.bf16.gmra.mxu3 %vm134_vm0, %v688_v5 }
  0x72   :  { %561 = vmatmul.msk.bf16.gmra.mxu0 %vm134_vm0, %v609_v16 }
  0x73   :  { %601 = vmatmul.msk.bf16.gmra.mxu1 %vm134_vm0, %v617_v17 }
  0x74   :  { %565 = vmatmul.msk.bf16.gmra.mxu2 %vm134_vm0, %v669_v0  ;;  %605 = vmatmul.msk.bf16.gmra.mxu3 %vm134_vm0, %v674_v1 }
  0xbf   :  { %v168_v32 = vpop.f32.mrf.mxu0 }
  0xc0   :  { %v329_v33 = vpop.f32.mrf.mxu1 }
  0xc1   :  { %v436_v55 = vsub.f32 %v168_v32, %v329_v33 }
  0xc3   :  { %v452_v59 = vmul.f32 %v436_v55, %v436_v55 }
  0xc7   :  { %v188_v34 = vpop.f32.mrf.mxu2  ;;  %v349_v35 = vpop.f32.mrf.mxu3 }
  0xc8   :  { %v170_v36 = vpop.f32.mrf.mxu0  ;;  %v331_v37 = vpop.f32.mrf.mxu1  ;;  %v444_v14 = vsub.f32 %v188_v34, %v349_v35 }
  0xc9   :  { %v437_v54 = vsub.f32 %v170_v36, %v331_v37 }
  0xca   :  { %v460_v22 = vmul.f32 %v444_v14, %v444_v14 }
  0xcb   :  { %v453_v57 = vmul.f32 %v437_v54, %v437_v54 }
  0xcd   :  { %v468_v2 = vadd.f32 %v453_v57, %v452_v59 }
  0xcf   :  { %v190_v38 = vpop.f32.mrf.mxu2  ;;  %v351_v39 = vpop.f32.mrf.mxu3 }
  0xd0   :  { %v173_v40 = vpop.f32.mrf.mxu0  ;;  %v334_v41 = vpop.f32.mrf.mxu1  ;;  %v445_v19 = vsub.f32 %v190_v38, %v351_v39 }
  0xd1   :  { %v438_v56 = vsub.f32 %v173_v40, %v334_v41 }
  0xd2   :  { %v461_v25 = vmul.f32 %v445_v19, %v445_v19 }
  0xd3   :  { %v454_v60 = vmul.f32 %v438_v56, %v438_v56 }
  0xd5   :  { %v469_v5 = vadd.f32 %v468_v2, %v454_v60 }
  0xd7   :  { %v193_v42 = vpop.f32.mrf.mxu2  ;;  %v354_v43 = vpop.f32.mrf.mxu3 }
  0xd8   :  { %v175_v44 = vpop.f32.mrf.mxu0  ;;  %v336_v45 = vpop.f32.mrf.mxu1  ;;  %v446_v23 = vsub.f32 %v193_v42, %v354_v43 }
  0xd9   :  { %v439_v58 = vsub.f32 %v175_v44, %v336_v45 }
  0xda   :  { %v462_v28 = vmul.f32 %v446_v23, %v446_v23 }
  0xdb   :  { %v455_v3 = vmul.f32 %v439_v58, %v439_v58 }
  0xdd   :  { %v470_v8 = vadd.f32 %v469_v5, %v455_v3 }
  0xdf   :  { %v195_v46 = vpop.f32.mrf.mxu2  ;;  %v356_v47 = vpop.f32.mrf.mxu3 }
  0xe0   :  { %v178_v48 = vpop.f32.mrf.mxu0  ;;  %v339_v49 = vpop.f32.mrf.mxu1  ;;  %v447_v26 = vsub.f32 %v195_v46, %v356_v47 }
  0xe1   :  { %v440_v61 = vsub.f32 %v178_v48, %v339_v49 }
  0xe2   :  { %v463_v31 = vmul.f32 %v447_v26, %v447_v26 }
  0xe3   :  { %v456_v6 = vmul.f32 %v440_v61, %v440_v61 }
  0xe5   :  { %v471_v10 = vadd.f32 %v470_v8, %v456_v6 }
  0xe7   :  { %v198_v50 = vpop.f32.mrf.mxu2  ;;  %v359_v51 = vpop.f32.mrf.mxu3 }
  0xe8   :  { %v180_v52 = vpop.f32.mrf.mxu0  ;;  %v341_v53 = vpop.f32.mrf.mxu1  ;;  %v448_v29 = vsub.f32 %v198_v50, %v359_v51 }
  0xe9   :  { %v441_v4 = vsub.f32 %v180_v52, %v341_v53 }
  0xea   :  { %v464_v36 = vmul.f32 %v448_v29, %v448_v29 }
  0xeb   :  { %v457_v9 = vmul.f32 %v441_v4, %v441_v4 }
  0xed   :  { %v472_v15 = vadd.f32 %v471_v10, %v457_v9 }
  0xef   :  { %v200_v62 = vpop.f32.mrf.mxu2  ;;  %v361_v63 = vpop.f32.mrf.mxu3 }
  0xf0   :  { %v183_v0 = vpop.f32.mrf.mxu0  ;;  %v344_v1 = vpop.f32.mrf.mxu1  ;;  %v449_v32 = vsub.f32 %v200_v62, %v361_v63 }
  0xf1   :  { %v442_v7 = vsub.f32 %v183_v0, %v344_v1 }
  0xf2   :  { %v465_v38 = vmul.f32 %v449_v32, %v449_v32 }
  0xf3   :  { %v458_v11 = vmul.f32 %v442_v7, %v442_v7 }
  0xf5   :  { %v473_v20 = vadd.f32 %v472_v15, %v458_v11 }
  0xf7   :  { %v203_v17 = vpop.f32.mrf.mxu2  ;;  %v364_v18 = vpop.f32.mrf.mxu3 }
  0xf8   :  { %v185_v12 = vpop.f32.mrf.mxu0  ;;  %v346_v13 = vpop.f32.mrf.mxu1  ;;  %v450_v37 = vsub.f32 %v203_v17, %v364_v18 }
  0xf9   :  { %v443_v16 = vsub.f32 %v185_v12, %v346_v13 }
  0xfa   :  { %v466_v44 = vmul.f32 %v450_v37, %v450_v37 }
  0xfb   :  { %v459_v21 = vmul.f32 %v443_v16, %v443_v16 }
  0xfd   :  { %v474_v24 = vadd.f32 %v473_v20, %v459_v21 }
  0xff   :  { %v475_v27 = vadd.f32 %v474_v24, %v460_v22  ;;  %v205_v34 = vpop.f32.mrf.mxu2  ;;  %v366_v35 = vpop.f32.mrf.mxu3 }
 0x100   :  { %v451_v39 = vsub.f32 %v205_v34, %v366_v35 }
 0x101   :  { %v476_v30 = vadd.f32 %v475_v27, %v461_v25 }
 0x102   :  { %v467_v43 = vmul.f32 %v451_v39, %v451_v39 }
 0x103   :  { %v477_v33 = vadd.f32 %v476_v30, %v462_v28 }
 0x105   :  { %v478_v40 = vadd.f32 %v477_v33, %v463_v31 }
 0x107   :  { %v479_v41 = vadd.f32 %v478_v40, %v464_v36 }
 0x109   :  { %v480_v42 = vadd.f32 %v479_v41, %v465_v38 }
 0x10b   :  { %v481_v45 = vadd.f32 %v480_v42, %v466_v44 }
 0x10d   :  { %v482_v46 = vadd.f32 %v481_v45, %v467_v43 }
 0x10f   :  { %483 = vadd.xlane.f32.xlu0 %v482_v46 }
 0x182   :  { %v484_v47 = vpop.xlane.xlu0 %483 }
 0x183   :  { %v485_v48 = vrot.slane %v484_v47, 4 }
 0x185   :  { %v486_v49 = vadd.f32 %v485_v48, %v484_v47 }
 0x187   :  { %v487_v50 = vrot.slane %v486_v49, 2 }
 0x189   :  { %v488_v51 = vadd.f32 %v487_v50, %v486_v49 }
 0x18b   :  { %v489_v52 = vrot.slane %v488_v51, 1 }
 0x18d   :  { %v490_v53 = vadd.f32 %v489_v52, %v488_v51 }
 0x18f   :  { %638 = vpush %v490_v53 }
 0x1c0   :  { %s639_s11 = spop %638 }
 0x1c1   :  { %s492_s12 = smul.f32 5.684342e-14, %s639_s11 }
 0x1c3   :  { %494 = sst [smem:[#allocation4]] %s492_s12 }
 0x1c4   :  { %503 = dma.smem_to_hbm %s655_s13, 16, %s501_s10, [#allocation5]  }
 0x1c5   :  { %653 = dma.done.wait [#allocation5], 16  }
 0x1c6   :  { %654 = vsyncadd [#allocation5], 4294967280 }
 0x1c7   :  { %508 = sfence }
 0x1c8   :  { %509 = vsyncpa [#allocation5], 1 }

// kernel: style_loss.11
= control target key start
LH: loop header
LB: loop body
LE: loop exit
PB: predicated region body
PF: predicated region fallthrough
CT: control target
= control target key end

     0   :  { %s1638_s12 = smov 0   ;;  %s1640_s13 = smov 0   ;;  %s2040_s0 = inlined_call_operand.vmem [shape: bf16[2,1152,64], index: 0, kind: input, shape index: {}]   ;;  %s2041_s1 = inlined_call_operand.vmem [shape: bf16[128,1152], index: 1, kind: input, shape index: {}]   ;;  %s2042_s2 = inlined_call_operand.vmem [shape: f32[128,1], index: 2, kind: input, shape index: {}]   ;;  %s2043_s3 = inlined_call_operand.vmem [shape: f32[2,128,64], index: 3, kind: output, shape index: {}]  }
   0x1   :  { %s1642_s14 = smov 0   ;;  %s1644_s15 = smov 0  }
   0x2   :  { %s1646_s16 = smov 0   ;;  %s1648_s17 = smov 0  }
   0x3   :  { %s1650_s18 = smov 0  }
   0x4 LB: > { %s25_s19 = sadd.s32 1, %s1606_s16  ;;  %s32_s20 = sadd.s32 1, %s1610_s17  ;;  %s1614_s18 = sphi %s1650_s18, %s13_s18   ;;  %s1610_s17 = sphi %s1648_s17, %s2049_s17   ;;  %s1606_s16 = sphi %s1646_s16, %s2048_s16   ;;  %s1602_s15 = sphi %s1644_s15, %s2047_s15   ;;  %s1598_s14 = sphi %s1642_s14, %s2046_s14   ;;  %s1594_s13 = sphi %s1640_s13, %s2045_s13   ;;  %s1590_s12 = sphi %s1638_s12, %s2044_s12  }
   0x5   : > { %p26_p0 = scmp.ge.s32.totalorder %s25_s19, 3  ;;  %s69_s21 = sadd.s32 1, %s1594_s13 }
   0x6   : > { %p76_p1 = scmp.ne.s32.totalorder %s1594_s13, %s1590_s12  ;;  %p77_p2 = scmp.eq.s32.totalorder %s1614_s18, 0 }
   0x7   : > { %s2051_s19 = smov (%p26_p0, %s25_s19), 0  ;;  %s2053_s20 = smov (!%p26_p0, %s32_s20), %s1610_s17 }
   0x8   : > { %s66_s22 = ssub.s32 %s1606_s16, %s2051_s19  ;;  %p78_p3 = por %p77_p2, %p76_p1 }
   0x9   : > { %p34_p4 = scmp.ge.s32.totalorder %s2053_s20, 2  ;;  %p67_p5 = scmp.eq.s32.totalorder %s66_s22, 0 }
   0xa   : > { %p1188_p6 = scmp.ge.s32.totalorder %s1614_s18, 6 }
   0xb   : > { %s2055_s20 = smov (%p34_p4, %s2053_s20), 0 }
   0xc   : > { %s1687_s23 = scalar_select %p67_p5, %s1594_s13, %s69_s21  }
   0xd   : > { %154 = sbr.rel (%p1188_p6) target bundleno = 55 (0x37), region = 20 }
  0x12   : > { %173 = sbr.rel (!%p78_p3) target bundleno = 55 (0x37), region = 28  ;;  %s175_s24 = sand.u32 (%p78_p3), 1, %s1594_s13  }
  0x13   : > { %s1422_s25 = smul.u32 (%p78_p3), 12, %s1606_s16 }
  0x14   : > { %s1496_s26 = smul.u32 (%p78_p3), 192, %s175_s24 }
  0x15   : > { %s1695_s29 = scalar_lea.vmem (%p78_p3), %s2041_s1, %s1422_s25 }
  0x16   : > { %v195_v0 = vld [vmem:[%s1695_s29] sm:$0xff] (%p78_p3)  ;;  %v199_v2 = vld [vmem:[%s1695_s29 + $0x48] sm:$0xff] (%p78_p3)  ;;  %s1700_s30 = scalar_lea.vmem (%p78_p3), [#allocation3], %s1496_s26  ;;  %v203_v4 = vld [vmem:[%s1695_s29 + $0x90] sm:$0xff] (%p78_p3) }
  0x17   : > { %v197_v1 = vld [vmem:[%s1695_s29 + $0x24] sm:$0xff]  ;;  %196 = vst [vmem:[%s1700_s30] sm:$0xff] %v195_v0  ;;  %v201_v3 = vld [vmem:[%s1695_s29 + $0x6c] sm:$0xff]  ;;  %v205_v5 = vld [vmem:[%s1695_s29 + $0xb4] sm:$0xff] }
  0x18   : > { %198 = vst [vmem:[%s1700_s30 + $0xc] sm:$0xff] %v197_v1  ;;  %v207_v6 = vld [vmem:[%s1695_s29 + $0xd8] sm:$0xff]  ;;  %v211_v8 = vld [vmem:[%s1695_s29 + $0x120] sm:$0xff]  ;;  %v215_v10 = vld [vmem:[%s1695_s29 + $0x168] sm:$0xff] }
  0x19   : > { %200 = vst [vmem:[%s1700_s30 + $0x18] sm:$0xff] %v199_v2  ;;  %v209_v7 = vld [vmem:[%s1695_s29 + $0xfc] sm:$0xff]  ;;  %v213_v9 = vld [vmem:[%s1695_s29 + $0x144] sm:$0xff]  ;;  %v217_v11 = vld [vmem:[%s1695_s29 + $0x18c] sm:$0xff] }
  0x1a   : > { %202 = vst [vmem:[%s1700_s30 + $0x24] sm:$0xff] %v201_v3  ;;  %v219_v12 = vld [vmem:[%s1695_s29 + $0x1b0] sm:$0xff]  ;;  %v223_v14 = vld [vmem:[%s1695_s29 + $0x1f8] sm:$0xff]  ;;  %v1190_v16 = vld [vmem:[%s1695_s29 + $0x8] sm:$0xf] }
  0x1b   : > { %204 = vst [vmem:[%s1700_s30 + $0x30] sm:$0xff] %v203_v4  ;;  %v221_v13 = vld [vmem:[%s1695_s29 + $0x1d4] sm:$0xff]  ;;  %v225_v15 = vld [vmem:[%s1695_s29 + $0x21c] sm:$0xff]  ;;  %v1192_v17 = vld [vmem:[%s1695_s29 + $0x2c] sm:$0xf] }
  0x1c   : > { %206 = vst [vmem:[%s1700_s30 + $0x3c] sm:$0xff] %v205_v5  ;;  %v1194_v18 = vld [vmem:[%s1695_s29 + $0x50] sm:$0xf]  ;;  %v1196_v19 = vld [vmem:[%s1695_s29 + $0x74] sm:$0xf] }
  0x1d   : > { %208 = vst [vmem:[%s1700_s30 + $0x48] sm:$0xff] %v207_v6  ;;  %v1198_v20 = vld [vmem:[%s1695_s29 + $0x98] sm:$0xf]  ;;  %v1200_v21 = vld [vmem:[%s1695_s29 + $0xbc] sm:$0xf] }
  0x1e   : > { %210 = vst [vmem:[%s1700_s30 + $0x54] sm:$0xff] %v209_v7  ;;  %v1202_v22 = vld [vmem:[%s1695_s29 + $0xe0] sm:$0xf]  ;;  %v1204_v23 = vld [vmem:[%s1695_s29 + $0x104] sm:$0xf] }
  0x1f   : > { %212 = vst [vmem:[%s1700_s30 + $0x60] sm:$0xff] %v211_v8  ;;  %v1206_v24 = vld [vmem:[%s1695_s29 + $0x128] sm:$0xf]  ;;  %v1208_v25 = vld [vmem:[%s1695_s29 + $0x14c] sm:$0xf] }
  0x20   : > { %214 = vst [vmem:[%s1700_s30 + $0x6c] sm:$0xff] %v213_v9  ;;  %v1210_v26 = vld [vmem:[%s1695_s29 + $0x170] sm:$0xf]  ;;  %v1212_v27 = vld [vmem:[%s1695_s29 + $0x194] sm:$0xf] }
  0x21   : > { %216 = vst [vmem:[%s1700_s30 + $0x78] sm:$0xff] %v215_v10  ;;  %v1214_v28 = vld [vmem:[%s1695_s29 + $0x1b8] sm:$0xf]  ;;  %v1216_v29 = vld [vmem:[%s1695_s29 + $0x1dc] sm:$0xf] }
  0x22   : > { %218 = vst [vmem:[%s1700_s30 + $0x84] sm:$0xff] %v217_v11  ;;  %v1218_v30 = vld [vmem:[%s1695_s29 + $0x200] sm:$0xf]  ;;  %v1220_v31 = vld [vmem:[%s1695_s29 + $0x224] sm:$0xf] }
  0x23   : > { %220 = vst [vmem:[%s1700_s30 + $0x90] sm:$0xff] %v219_v12 }
  0x24   : > { %222 = vst [vmem:[%s1700_s30 + $0x9c] sm:$0xff] %v221_v13 }
  0x25   : > { %224 = vst [vmem:[%s1700_s30 + $0xa8] sm:$0xff] %v223_v14 }
  0x26   : > { %226 = vst [vmem:[%s1700_s30 + $0xb4] sm:$0xff] %v225_v15 }
  0x27   : > { %1191 = vst [vmem:[%s1700_s30 + $0x8] sm:$0xf] %v1190_v16 }
  0x28   : > { %1193 = vst [vmem:[%s1700_s30 + $0x14] sm:$0xf] %v1192_v17 }
  0x29   : > { %1195 = vst [vmem:[%s1700_s30 + $0x20] sm:$0xf] %v1194_v18 }
  0x2a   : > { %1197 = vst [vmem:[%s1700_s30 + $0x2c] sm:$0xf] %v1196_v19 }
  0x2b   : > { %1199 = vst [vmem:[%s1700_s30 + $0x38] sm:$0xf] %v1198_v20 }
  0x2c   : > { %1201 = vst [vmem:[%s1700_s30 + $0x44] sm:$0xf] %v1200_v21 }
  0x2d   : > { %1203 = vst [vmem:[%s1700_s30 + $0x50] sm:$0xf] %v1202_v22 }
  0x2e   : > { %1205 = vst [vmem:[%s1700_s30 + $0x5c] sm:$0xf] %v1204_v23 }
  0x2f   : > { %1207 = vst [vmem:[%s1700_s30 + $0x68] sm:$0xf] %v1206_v24 }
  0x30   : > { %1209 = vst [vmem:[%s1700_s30 + $0x74] sm:$0xf] %v1208_v25 }
  0x31   : > { %1211 = vst [vmem:[%s1700_s30 + $0x80] sm:$0xf] %v1210_v26 }
  0x32   : > { %1213 = vst [vmem:[%s1700_s30 + $0x8c] sm:$0xf] %v1212_v27 }
  0x33   : > { %1215 = vst [vmem:[%s1700_s30 + $0x98] sm:$0xf] %v1214_v28 }
  0x34   : > { %1217 = vst [vmem:[%s1700_s30 + $0xa4] sm:$0xf] %v1216_v29 }
  0x35   : > { %1219 = vst [vmem:[%s1700_s30 + $0xb0] sm:$0xf] %v1218_v30 }
  0x36   : > { %1221 = vst [vmem:[%s1700_s30 + $0xbc] sm:$0xf] %v1220_v31 }
  0x37 PF: > { %p1222_p7 = scmp.ge.s32.totalorder %s1614_s18, 1  ;;  %p271_p8 = scmp.lt.s32.totalorder %s1614_s18, 7 }
  0x39   : > { %p272_p9 = pnand %p1222_p7, %p271_p8 }
  0x3a   : > { %s278_s4 = sand.u32 (!%p272_p9), 1, %s1590_s12   ;;  %s316_s5 = smul.u32 (!%p272_p9), 48, %s1598_s14 }
  0x3b   : > { %275 = sbr.rel (%p272_p9) target bundleno = 510 (0x1fe), region = 54  ;;  %p317_p10 = scmp.lt.s32.totalorder (!%p272_p9), %s1602_s15, 1 }
  0x3c   : > { %s1497_s6 = smul.u32 (!%p272_p9), 192, %s278_s4  ;;  %p319_p11 = scmp.lt.s32.totalorder (!%p272_p9), %s316_s5, 143 }
  0x3d   : > { %p1226_p12 = scmp.ne.s32.totalorder (!%p272_p9), %s1598_s14, 0 }
  0x3e   : > { %s1779_s12 = scalar_lea.vmem (!%p272_p9), [#allocation3], %s1497_s6 }
  0x40   : > { %s2057_s15 = smov (!%p317_p10, %s1602_s15), 1  ;;  %s2059_s5 = smov (!%p319_p11, %s316_s5), 143 }
  0x41   : > { %s1498_s7 = smul.u32 144, %s2057_s15  ;;  %s1423_s8 = sshll.u32 %s2057_s15, 7 }
  0x42   : > { %s1772_s11 = scalar_lea.vmem %s2043_s3, %s1423_s8  ;;  %341 = sbr.rel (%p1226_p12) target bundleno = 88 (0x58), region = 62 }
  0x43   : > { %s325_s21 = sadd.s32 %s1498_s7, %s2059_s5 }
  0x44   : > { %s1223_s22 = sshll.u32 %s325_s21, 2 }
  0x45   : > { %s1777_s26 = scalar_lea.vmem %s2040_s0, %s1223_s22 }
  0x47   : > { %vm342_vm0 = vcmask 523264   ;;  %v1616_v32 = vmov 0.0  }
  0x48   : > { %343 = vst.msk [vmem:[#allocation2] sm:$0xff] %vm342_vm0, %v1616_v32 }
  0x49   : > { %344 = vst.msk [vmem:[#allocation2 + $0x8] sm:$0xff] %vm342_vm0, %v1616_v32 }
  0x4a   : > { %345 = vst.msk [vmem:[#allocation2 + $0x10] sm:$0xff] %vm342_vm0, %v1616_v32 }
  0x4b   : > { %346 = vst.msk [vmem:[#allocation2 + $0x18] sm:$0xff] %vm342_vm0, %v1616_v32 }
  0x4c   : > { %347 = vst.msk [vmem:[#allocation2 + $0x20] sm:$0xff] %vm342_vm0, %v1616_v32 }
  0x4d   : > { %348 = vst.msk [vmem:[#allocation2 + $0x28] sm:$0xff] %vm342_vm0, %v1616_v32 }
  0x4e   : > { %349 = vst.msk [vmem:[#allocation2 + $0x30] sm:$0xff] %vm342_vm0, %v1616_v32 }
  0x4f   : > { %350 = vst.msk [vmem:[#allocation2 + $0x38] sm:$0xff] %vm342_vm0, %v1616_v32 }
  0x50   : > { %351 = vst.msk [vmem:[#allocation2 + $0x40] sm:$0xff] %vm342_vm0, %v1616_v32 }
  0x51   : > { %352 = vst.msk [vmem:[#allocation2 + $0x48] sm:$0xff] %vm342_vm0, %v1616_v32 }
  0x52   : > { %353 = vst.msk [vmem:[#allocation2 + $0x50] sm:$0xff] %vm342_vm0, %v1616_v32 }
  0x53   : > { %354 = vst.msk [vmem:[#allocation2 + $0x58] sm:$0xff] %vm342_vm0, %v1616_v32 }
  0x54   : > { %355 = vst.msk [vmem:[#allocation2 + $0x60] sm:$0xff] %vm342_vm0, %v1616_v32 }
  0x55   : > { %356 = vst.msk [vmem:[#allocation2 + $0x68] sm:$0xff] %vm342_vm0, %v1616_v32 }
  0x56   : > { %357 = vst.msk [vmem:[#allocation2 + $0x70] sm:$0xff] %vm342_vm0, %v1616_v32 }
  0x57   : > { %358 = vst.msk [vmem:[#allocation2 + $0x78] sm:$0xff] %vm342_vm0, %v1616_v32 }
  0x58 PF: > { %v1455_v33 = vld [vmem:[%s1777_s26 + $0x38] sm:$0xff]  ;;  %v1454_v36 = vld [vmem:[%s1777_s26 + $0x30] sm:$0xff]  ;;  %v1453_v39 = vld [vmem:[%s1777_s26 + $0x28] sm:$0xff]  ;;  %vm890_vm1 = vcmask 523264   ;;  %p1419_p13 = scmp.ne.s32.totalorder %s1598_s14, 2 }
  0x59   : > { %v1800_v34 = vld [vmem:[%s1777_s26 + $0x78] sm:$0xff]  ;;  %727 = vmatpush.bf16.msra.mxu0 %v1455_v33  ;;  %1472 = vmatpush.bf16.msra.mxu3 %v1455_v33  ;;  %v1809_v37 = vld [vmem:[%s1777_s26 + $0x70] sm:$0xff]  ;;  %v1461_v40 = vld [vmem:[%s1777_s26 + $0x68] sm:$0xff] }
  0x5a   : > { %v1803_v35 = vld [vmem:[%s1777_s26 + $0xb8] sm:$0xff]  ;;  %776 = vmatpush.bf16.msra.mxu1 %v1800_v34  ;;  %v1812_v38 = vld [vmem:[%s1777_s26 + $0xb0] sm:$0xff]  ;;  %v1819_v41 = vld [vmem:[%s1777_s26 + $0xa8] sm:$0xff] }
  0x5b   : > { %825 = vmatpush.bf16.msra.mxu2 %v1803_v35  ;;  %v1452_v42 = vld [vmem:[%s1777_s26 + $0x20] sm:$0xff]  ;;  %v1451_v45 = vld [vmem:[%s1777_s26 + $0x18] sm:$0xff]  ;;  %v1450_v48 = vld [vmem:[%s1777_s26 + $0x10] sm:$0xff] }
  0x5c   : > { %v1460_v43 = vld [vmem:[%s1777_s26 + $0x60] sm:$0xff]  ;;  %v1459_v46 = vld [vmem:[%s1777_s26 + $0x58] sm:$0xff]  ;;  %v1458_v49 = vld [vmem:[%s1777_s26 + $0x50] sm:$0xff] }
  0x5d   : > { %728 = vmatpush.bf16.msra.mxu0 %v1454_v36  ;;  %1473 = vmatpush.bf16.msra.mxu3 %v1454_v36  ;;  %v1825_v44 = vld [vmem:[%s1777_s26 + $0xa0] sm:$0xff]  ;;  %v1831_v47 = vld [vmem:[%s1777_s26 + $0x98] sm:$0xff]  ;;  %v1837_v50 = vld [vmem:[%s1777_s26 + $0x90] sm:$0xff] }
  0x5e   : > { %777 = vmatpush.bf16.msra.mxu1 %v1809_v37  ;;  %v1449_v51 = vld [vmem:[%s1777_s26 + $0x8] sm:$0xff]  ;;  %v1448_v54 = vld [vmem:[%s1777_s26] sm:$0xff]  ;;  %v1301_v59 = vld [vmem:[%s1779_s12 + $0x90] sm:$0xf] }
  0x5f   : > { %826 = vmatpush.bf16.msra.mxu2 %v1812_v38  ;;  %v1457_v52 = vld [vmem:[%s1777_s26 + $0x48] sm:$0xff]  ;;  %v1456_v55 = vld [vmem:[%s1777_s26 + $0x40] sm:$0xff]  ;;  %v1443_v60 = vld [vmem:[%s1779_s12 + $0x98] sm:$0xf0] }
  0x60   : > { %v1843_v53 = vld [vmem:[%s1777_s26 + $0x88] sm:$0xff]  ;;  %v1848_v56 = vld [vmem:[%s1777_s26 + $0x80] sm:$0xff]  ;;  %v1231_v62 = vld [vmem:[%s1779_s12 + $0xc] sm:$0xf0]  ;;  %v1302_v2 = vor.u32 %v1443_v60, %v1301_v59 }
  0x61   : > { %729 = vmatpush.bf16.msra.mxu0 %v1453_v39  ;;  %1474 = vmatpush.bf16.msra.mxu3 %v1453_v39  ;;  %v1229_v57 = vld [vmem:[%s1779_s12] sm:$0xf]  ;;  %v1425_v58 = vld [vmem:[%s1779_s12 + $0x8] sm:$0xf0]  ;;  %v1424_v61 = vld [vmem:[%s1779_s12 + $0x4] sm:$0xf] }
  0x62   : > { %778 = vmatpush.bf16.msra.mxu1 %v1461_v40  ;;  %v1237_v63 = vld [vmem:[%s1779_s12 + $0x8] sm:$0xf]  ;;  %v1426_v0 = vld [vmem:[%s1779_s12 + $0x10] sm:$0xf0]  ;;  %v1230_v1 = vor.u32 %v1425_v58, %v1229_v57  ;;  %v1234_v3 = vor.u32 %v1424_v61, %v1231_v62  ;;  %v1241_v5 = vld [vmem:[%s1779_s12 + $0x18] sm:$0xf] }
  0x63   : > { %827 = vmatpush.bf16.msra.mxu2 %v1819_v41  ;;  %v1238_v4 = vor.u32 %v1426_v0, %v1237_v63  ;;  %v1428_v6 = vld [vmem:[%s1779_s12 + $0x20] sm:$0xf0]  ;;  %v1313_v7 = vld [vmem:[%s1779_s12 + $0xa8] sm:$0xf]  ;;  %v1446_v8 = vld [vmem:[%s1779_s12 + $0xb0] sm:$0xf0] }
  0x64   : > { %v1427_v9 = vld [vmem:[%s1779_s12 + $0x1c] sm:$0xf]  ;;  %v1243_v10 = vld [vmem:[%s1779_s12 + $0x24] sm:$0xf0]  ;;  %v1249_v11 = vld [vmem:[%s1779_s12 + $0x20] sm:$0xf]  ;;  %v1242_v13 = vor.u32 %v1428_v6, %v1241_v5  ;;  %v1314_v14 = vor.u32 %v1446_v8, %v1313_v7 }
  0x65   : > { %730 = vmatpush.bf16.msra.mxu0 %v1452_v42  ;;  %1475 = vmatpush.bf16.msra.mxu3 %v1452_v42  ;;  %v1429_v12 = vld [vmem:[%s1779_s12 + $0x28] sm:$0xf0]  ;;  %v1246_v15 = vor.u32 %v1427_v9, %v1243_v10  ;;  %v1253_v17 = vld [vmem:[%s1779_s12 + $0x30] sm:$0xf]  ;;  %v1431_v18 = vld [vmem:[%s1779_s12 + $0x38] sm:$0xf0] }
  0x66   : > { %779 = vmatpush.bf16.msra.mxu1 %v1460_v43  ;;  %v1250_v16 = vor.u32 %v1429_v12, %v1249_v11  ;;  %v1430_v19 = vld [vmem:[%s1779_s12 + $0x34] sm:$0xf]  ;;  %v1303_v21 = vld [vmem:[%s1779_s12 + $0x9c] sm:$0xf0]  ;;  %v1261_v23 = vld [vmem:[%s1779_s12 + $0x38] sm:$0xf]  ;;  %v1254_v25 = vor.u32 %v1431_v18, %v1253_v17 }
  0x67   : > { %828 = vmatpush.bf16.msra.mxu2 %v1825_v44  ;;  %v1442_v20 = vld [vmem:[%s1779_s12 + $0x94] sm:$0xf]  ;;  %v1255_v22 = vld [vmem:[%s1779_s12 + $0x3c] sm:$0xf0]  ;;  %v1432_v24 = vld [vmem:[%s1779_s12 + $0x40] sm:$0xf0] }
  0x68   : > { %v1306_v26 = vor.u32 %v1442_v20, %v1303_v21  ;;  %v1258_v27 = vor.u32 %v1430_v19, %v1255_v22  ;;  %v1262_v28 = vor.u32 %v1432_v24, %v1261_v23  ;;  %v1265_v29 = vld [vmem:[%s1779_s12 + $0x48] sm:$0xf]  ;;  %v1434_v30 = vld [vmem:[%s1779_s12 + $0x50] sm:$0xf0]  ;;  %v1433_v31 = vld [vmem:[%s1779_s12 + $0x4c] sm:$0xf] }
  0x69   : > { %731 = vmatpush.bf16.msra.mxu0 %v1451_v45  ;;  %1476 = vmatpush.bf16.msra.mxu3 %v1451_v45  ;;  %v1445_v32 = vld [vmem:[%s1779_s12 + $0xac] sm:$0xf]  ;;  %v1315_v33 = vld [vmem:[%s1779_s12 + $0xb4] sm:$0xf0]  ;;  %v1435_v36 = vld [vmem:[%s1779_s12 + $0x58] sm:$0xf0] }
  0x6a   : > { %780 = vmatpush.bf16.msra.mxu1 %v1459_v46  ;;  %v1318_v39 = vor.u32 %v1445_v32, %v1315_v33  ;;  %v1437_v42 = vld [vmem:[%s1779_s12 + $0x68] sm:$0xf0]  ;;  %v1444_v45 = vld [vmem:[%s1779_s12 + $0xa0] sm:$0xf0]  ;;  %v1321_v57 = vld [vmem:[%s1779_s12 + $0xb0] sm:$0xf] }
  0x6b   : > { %829 = vmatpush.bf16.msra.mxu2 %v1831_v47  ;;  %v1291_v58 = vld [vmem:[%s1779_s12 + $0x84] sm:$0xf0]  ;;  %v1297_v59 = vld [vmem:[%s1779_s12 + $0x80] sm:$0xf]  ;;  %v1441_v60 = vld [vmem:[%s1779_s12 + $0x88] sm:$0xf0] }
  0x6c   : > { %v1298_v0 = vor.u32 %v1441_v60, %v1297_v59  ;;  %v359_v5 = vld [vmem:[#allocation2] sm:$0xff]  ;;  %v361_v21 = vld [vmem:[#allocation2 + $0x10] sm:$0xff] }
  0x6d   : > { %732 = vmatpush.bf16.msra.mxu0 %v1450_v48  ;;  %1477 = vmatpush.bf16.msra.mxu3 %v1450_v48  ;;  %v1438_v48 = vld [vmem:[%s1779_s12 + $0x70] sm:$0xf0] }
  0x6e   : > { %781 = vmatpush.bf16.msra.mxu1 %v1458_v49 }
  0x6f   : > { %830 = vmatpush.bf16.msra.mxu2 %v1837_v50 }
  0x71   : > { %733 = vmatpush.bf16.msra.mxu0 %v1449_v51  ;;  %1478 = vmatpush.bf16.msra.mxu3 %v1449_v51 }
  0x72   : > { %782 = vmatpush.bf16.msra.mxu1 %v1457_v52 }
  0x73   : > { %831 = vmatpush.bf16.msra.mxu2 %v1843_v53 }
  0x75   : > { %734 = vmatpush.bf16.msra.mxu0 %v1448_v54  ;;  %1479 = vmatpush.bf16.msra.mxu3 %v1448_v54  ;;  %v1440_v54 = vld [vmem:[%s1779_s12 + $0x80] sm:$0xf0] }
  0x76   : > { %783 = vmatpush.bf16.msra.mxu1 %v1456_v55 }
  0x77   : > { %832 = vmatpush.bf16.msra.mxu2 %v1848_v56 }
  0x78   : > { %735 = vmatmul.bf16.vlgmr.msra.gmra.mxu0 %v1230_v1  ;;  %765 = vmatmul.bf16.vlgmr.msra.gmra.mxu3 %v1302_v2 }
  0x79   : > { %1480 = vmatpush.bf16.msrb.mxu3 %v1800_v34  ;;  %784 = vmatmul.bf16.vlgmr.msra.gmra.mxu1 %v1234_v3  ;;  %v1267_v34 = vld [vmem:[%s1779_s12 + $0x54] sm:$0xf0] }
  0x7a   : > { %833 = vmatmul.bf16.vlgmr.msra.gmra.mxu2 %v1238_v4 }
  0x7d   : > { %1481 = vmatpush.bf16.msrb.mxu3 %v1809_v37  ;;  %v1266_v37 = vor.u32 %v1434_v30, %v1265_v29  ;;  %v362_v29 = vld [vmem:[#allocation2 + $0x18] sm:$0xff] }
  0x81   : > { %1482 = vmatpush.bf16.msrb.mxu3 %v1461_v40 }
  0x85   : > { %1483 = vmatpush.bf16.msrb.mxu3 %v1460_v43  ;;  %v1436_v43 = vld [vmem:[%s1779_s12 + $0x64] sm:$0xf] }
  0x88   : > { %740 = vmatmul.bf16.gmra.mxu0 %v1242_v13  ;;  %770 = vmatmul.bf16.gmra.mxu3 %v1314_v14  ;;  %v360_v13 = vld [vmem:[#allocation2 + $0x8] sm:$0xff] }
  0x89   : > { %1484 = vmatpush.bf16.msrb.mxu3 %v1459_v46  ;;  %789 = vmatmul.bf16.gmra.mxu1 %v1246_v15  ;;  %v1279_v46 = vld [vmem:[%s1779_s12 + $0x6c] sm:$0xf0] }
  0x8a   : > { %838 = vmatmul.bf16.gmra.mxu2 %v1250_v16  ;;  %v1282_v51 = vor.u32 %v1436_v43, %v1279_v46 }
  0x8d   : > { %1485 = vmatpush.bf16.msrb.mxu3 %v1458_v49 }
  0x91   : > { %1486 = vmatpush.bf16.msrb.mxu3 %v1457_v52 }
  0x95   : > { %1487 = vmatpush.bf16.msrb.mxu3 %v1456_v55  ;;  %v1439_v55 = vld [vmem:[%s1779_s12 + $0x7c] sm:$0xf] }
  0x96   : > { %v1294_v63 = vor.u32 %v1439_v55, %v1291_v58 }
  0x98   : > { %745 = vmatmul.bf16.gmra.mxu0 %v1254_v25  ;;  %814 = vmatmul.bf16.vlgmr.msrb.gmra.mxu3 %v1306_v26 }
  0x99   : > { %1488 = vmatpush.bf16.msra.mxu3 %v1803_v35  ;;  %794 = vmatmul.bf16.gmra.mxu1 %v1258_v27  ;;  %v1273_v35 = vld [vmem:[%s1779_s12 + $0x50] sm:$0xf] }
  0x9a   : > { %843 = vmatmul.bf16.gmra.mxu2 %v1262_v28  ;;  %v1274_v40 = vor.u32 %v1435_v36, %v1273_v35 }
  0x9d   : > { %1489 = vmatpush.bf16.msra.mxu3 %v1812_v38  ;;  %v1270_v38 = vor.u32 %v1433_v31, %v1267_v34 }
  0xa1   : > { %1490 = vmatpush.bf16.msra.mxu3 %v1819_v41  ;;  %v1277_v41 = vld [vmem:[%s1779_s12 + $0x60] sm:$0xf] }
  0xa2   : > { %v1278_v49 = vor.u32 %v1437_v42, %v1277_v41 }
  0xa5   : > { %1491 = vmatpush.bf16.msra.mxu3 %v1825_v44  ;;  %v1309_v44 = vld [vmem:[%s1779_s12 + $0x98] sm:$0xf] }
  0xa8   : > { %750 = vmatmul.bf16.gmra.mxu0 %v1266_v37  ;;  %819 = vmatmul.bf16.gmra.mxu3 %v1318_v39  ;;  %v363_v37 = vld [vmem:[#allocation2 + $0x20] sm:$0xff] }
  0xa9   : > { %1492 = vmatpush.bf16.msra.mxu3 %v1831_v47  ;;  %799 = vmatmul.bf16.gmra.mxu1 %v1270_v38  ;;  %v1285_v47 = vld [vmem:[%s1779_s12 + $0x68] sm:$0xf] }
  0xaa   : > { %848 = vmatmul.bf16.gmra.mxu2 %v1274_v40  ;;  %v1286_v52 = vor.u32 %v1438_v48, %v1285_v47 }
  0xad   : > { %1493 = vmatpush.bf16.msra.mxu3 %v1837_v50  ;;  %v1310_v50 = vor.u32 %v1444_v45, %v1309_v44  ;;  %v364_v45 = vld [vmem:[#allocation2 + $0x28] sm:$0xff] }
  0xb1   : > { %1494 = vmatpush.bf16.msra.mxu3 %v1843_v53  ;;  %v1289_v53 = vld [vmem:[%s1779_s12 + $0x78] sm:$0xf] }
  0xb2   : > { %v1290_v61 = vor.u32 %v1440_v54, %v1289_v53  ;;  %v365_v53 = vld [vmem:[#allocation2 + $0x30] sm:$0xff] }
  0xb5   : > { %1495 = vmatpush.bf16.msra.mxu3 %v1848_v56  ;;  %v1447_v56 = vld [vmem:[%s1779_s12 + $0xb8] sm:$0xf0] }
  0xb6   : > { %v1322_v62 = vor.u32 %v1447_v56, %v1321_v57 }
  0xb8   : > { %755 = vmatmul.bf16.gmra.mxu0 %v1278_v49  ;;  %863 = vmatmul.bf16.vlgmr.msra.gmra.mxu3 %v1310_v50 }
  0xb9   : > { %804 = vmatmul.bf16.gmra.mxu1 %v1282_v51 }
  0xba   : > { %853 = vmatmul.bf16.gmra.mxu2 %v1286_v52 }
  0xc8   : > { %760 = vmatmul.bf16.gmra.mxu0 %v1290_v61  ;;  %868 = vmatmul.bf16.gmra.mxu3 %v1322_v62  ;;  %v366_v61 = vld [vmem:[#allocation2 + $0x38] sm:$0xff] }
  0xc9   : > { %809 = vmatmul.bf16.gmra.mxu1 %v1294_v63 }
  0xca   : > { %858 = vmatmul.bf16.gmra.mxu2 %v1298_v0 }
  0xf5   : > { %v736_v1 = vpop.f32.mrf.mxu0 }
  0xf6   : > { %v785_v2 = vpop.f32.mrf.mxu1 }
  0xf7   : > { %v786_v3 = vadd.f32 %v785_v2, %v736_v1 }
  0xfb   : > { %v1910_v4 = vpop.f32.mrf.mxu3 }
  0xfd   : > { %v834_v6 = vpop.f32.mrf.mxu2  ;;  %v738_v8 = vpop.f32.mrf.mxu0 }
  0xfe   : > { %v835_v7 = vadd.f32 %v834_v6, %v786_v3  ;;  %v787_v9 = vpop.f32.mrf.mxu1  ;;  %v371_v6 = vld [vmem:[#allocation2 + $0x60] sm:$0xff] }
  0xff   : > { %v788_v11 = vadd.f32 %v787_v9, %v738_v8  ;;  %v367_v8 = vld [vmem:[#allocation2 + $0x40] sm:$0xff] }
 0x100   : > { %v874_v10 = vadd.f32 %v835_v7, %v359_v5 }
 0x102   : > { %891 = vst.msk [vmem:[#allocation2] sm:$0xff] %vm890_vm1, %v874_v10 }
 0x103   : > { %v1913_v12 = vpop.f32.mrf.mxu3 }
 0x105   : > { %v836_v14 = vpop.f32.mrf.mxu2  ;;  %v741_v16 = vpop.f32.mrf.mxu0 }
 0x106   : > { %v837_v15 = vadd.f32 %v836_v14, %v788_v11  ;;  %v790_v17 = vpop.f32.mrf.mxu1 }
 0x107   : > { %v791_v19 = vadd.f32 %v790_v17, %v741_v16 }
 0x108   : > { %v875_v18 = vadd.f32 %v837_v15, %v360_v13 }
 0x10a   : > { %892 = vst.msk [vmem:[#allocation2 + $0x8] sm:$0xff] %vm890_vm1, %v875_v18 }
 0x10b   : > { %v1916_v20 = vpop.f32.mrf.mxu3 }
 0x10d   : > { %v839_v22 = vpop.f32.mrf.mxu2  ;;  %v743_v24 = vpop.f32.mrf.mxu0 }
 0x10e   : > { %v840_v23 = vadd.f32 %v839_v22, %v791_v19  ;;  %v792_v25 = vpop.f32.mrf.mxu1  ;;  %v372_v19 = vld [vmem:[#allocation2 + $0x68] sm:$0xff] }
 0x10f   : > { %v793_v27 = vadd.f32 %v792_v25, %v743_v24 }
 0x110   : > { %v876_v26 = vadd.f32 %v840_v23, %v361_v21 }
 0x112   : > { %893 = vst.msk [vmem:[#allocation2 + $0x10] sm:$0xff] %vm890_vm1, %v876_v26 }
 0x113   : > { %v1919_v28 = vpop.f32.mrf.mxu3 }
 0x115   : > { %v841_v30 = vpop.f32.mrf.mxu2  ;;  %v746_v32 = vpop.f32.mrf.mxu0 }
 0x116   : > { %v842_v31 = vadd.f32 %v841_v30, %v793_v27  ;;  %v795_v33 = vpop.f32.mrf.mxu1 }
 0x117   : > { %v796_v35 = vadd.f32 %v795_v33, %v746_v32  ;;  %v373_v32 = vld [vmem:[#allocation2 + $0x70] sm:$0xff] }
 0x118   : > { %v877_v34 = vadd.f32 %v842_v31, %v362_v29  ;;  %v369_v33 = vld [vmem:[#allocation2 + $0x50] sm:$0xff] }
 0x11a   : > { %894 = vst.msk [vmem:[#allocation2 + $0x18] sm:$0xff] %vm890_vm1, %v877_v34 }
 0x11b   : > { %v815_v36 = vpop.f32.mrf.mxu3 }
 0x11c   : > { %v816_v5 = vadd.f32 %v815_v36, %v1910_v4  ;;  %v368_v4 = vld [vmem:[#allocation2 + $0x48] sm:$0xff] }
 0x11d   : > { %v844_v39 = vpop.f32.mrf.mxu2  ;;  %v748_v40 = vpop.f32.mrf.mxu0 }
 0x11e   : > { %v845_v38 = vadd.f32 %v844_v39, %v796_v35  ;;  %v797_v41 = vpop.f32.mrf.mxu1 }
 0x11f   : > { %v798_v43 = vadd.f32 %v797_v41, %v748_v40 }
 0x120   : > { %v878_v42 = vadd.f32 %v845_v38, %v363_v37 }
 0x122   : > { %895 = vst.msk [vmem:[#allocation2 + $0x20] sm:$0xff] %vm890_vm1, %v878_v42 }
 0x123   : > { %v817_v44 = vpop.f32.mrf.mxu3 }
 0x124   : > { %v818_v17 = vadd.f32 %v817_v44, %v1913_v12 }
 0x125   : > { %v846_v46 = vpop.f32.mrf.mxu2  ;;  %v751_v48 = vpop.f32.mrf.mxu0 }
 0x126   : > { %v847_v47 = vadd.f32 %v846_v46, %v798_v43  ;;  %v800_v49 = vpop.f32.mrf.mxu1  ;;  %v374_v43 = vld [vmem:[#allocation2 + $0x78] sm:$0xff] }
 0x127   : > { %v801_v51 = vadd.f32 %v800_v49, %v751_v48 }
 0x128   : > { %v879_v50 = vadd.f32 %v847_v47, %v364_v45 }
 0x12a   : > { %896 = vst.msk [vmem:[#allocation2 + $0x28] sm:$0xff] %vm890_vm1, %v879_v50 }
 0x12b   : > { %v820_v52 = vpop.f32.mrf.mxu3 }
 0x12c   : > { %v821_v31 = vadd.f32 %v820_v52, %v1916_v20  ;;  %v370_v20 = vld [vmem:[#allocation2 + $0x58] sm:$0xff] }
 0x12d   : > { %v849_v54 = vpop.f32.mrf.mxu2  ;;  %v753_v57 = vpop.f32.mrf.mxu0 }
 0x12e   : > { %v850_v55 = vadd.f32 %v849_v54, %v801_v51  ;;  %v802_v56 = vpop.f32.mrf.mxu1 }
 0x12f   : > { %v803_v59 = vadd.f32 %v802_v56, %v753_v57 }
 0x130   : > { %v880_v58 = vadd.f32 %v850_v55, %v365_v53 }
 0x132   : > { %897 = vst.msk [vmem:[#allocation2 + $0x30] sm:$0xff] %vm890_vm1, %v880_v58 }
 0x133   : > { %v822_v60 = vpop.f32.mrf.mxu3 }
 0x134   : > { %v823_v41 = vadd.f32 %v822_v60, %v1919_v28 }
 0x135   : > { %v851_v62 = vpop.f32.mrf.mxu2  ;;  %v756_v0 = vpop.f32.mrf.mxu0 }
 0x136   : > { %v852_v63 = vadd.f32 %v851_v62, %v803_v59  ;;  %v805_v1 = vpop.f32.mrf.mxu1 }
 0x137   : > { %v806_v3 = vadd.f32 %v805_v1, %v756_v0 }
 0x138   : > { %v881_v2 = vadd.f32 %v852_v63, %v366_v61 }
 0x13a   : > { %898 = vst.msk [vmem:[#allocation2 + $0x38] sm:$0xff] %vm890_vm1, %v881_v2 }
 0x13b   : > { %v864_v7 = vpop.f32.mrf.mxu3 }
 0x13c   : > { %v865_v10 = vadd.f32 %v864_v7, %v816_v5 }
 0x13d   : > { %v854_v9 = vpop.f32.mrf.mxu2  ;;  %v758_v13 = vpop.f32.mrf.mxu0 }
 0x13e   : > { %v855_v11 = vadd.f32 %v854_v9, %v806_v3  ;;  %v886_v14 = vadd.f32 %v865_v10, %v371_v6  ;;  %v807_v15 = vpop.f32.mrf.mxu1 }
 0x13f   : > { %v808_v18 = vadd.f32 %v807_v15, %v758_v13 }
 0x140   : > { %v882_v16 = vadd.f32 %v855_v11, %v367_v8  ;;  %903 = vst.msk [vmem:[#allocation2 + $0x60] sm:$0xff] %vm890_vm1, %v886_v14 }
 0x142   : > { %899 = vst.msk [vmem:[#allocation2 + $0x40] sm:$0xff] %vm890_vm1, %v882_v16 }
 0x143   : > { %v866_v21 = vpop.f32.mrf.mxu3 }
 0x144   : > { %v867_v23 = vadd.f32 %v866_v21, %v818_v17 }
 0x145   : > { %v856_v22 = vpop.f32.mrf.mxu2  ;;  %v761_v26 = vpop.f32.mrf.mxu0 }
 0x146   : > { %v857_v24 = vadd.f32 %v856_v22, %v808_v18  ;;  %v887_v25 = vadd.f32 %v867_v23, %v372_v19  ;;  %v810_v27 = vpop.f32.mrf.mxu1 }
 0x147   : > { %v811_v30 = vadd.f32 %v810_v27, %v761_v26 }
 0x148   : > { %v883_v29 = vadd.f32 %v857_v24, %v368_v4  ;;  %904 = vst.msk [vmem:[#allocation2 + $0x68] sm:$0xff] %vm890_vm1, %v887_v25 }
 0x14a   : > { %900 = vst.msk [vmem:[#allocation2 + $0x48] sm:$0xff] %vm890_vm1, %v883_v29 }
 0x14b   : > { %v869_v12 = vpop.f32.mrf.mxu3 }
 0x14c   : > { %v870_v35 = vadd.f32 %v869_v12, %v821_v31 }
 0x14d   : > { %v859_v34 = vpop.f32.mrf.mxu2  ;;  %v763_v38 = vpop.f32.mrf.mxu0 }
 0x14e   : > { %v860_v36 = vadd.f32 %v859_v34, %v811_v30  ;;  %v888_v37 = vadd.f32 %v870_v35, %v373_v32  ;;  %v812_v40 = vpop.f32.mrf.mxu1 }
 0x14f   : > { %v813_v42 = vadd.f32 %v812_v40, %v763_v38 }
 0x150   : > { %v884_v39 = vadd.f32 %v860_v36, %v369_v33  ;;  %905 = vst.msk [vmem:[#allocation2 + $0x70] sm:$0xff] %vm890_vm1, %v888_v37 }
 0x152   : > { %901 = vst.msk [vmem:[#allocation2 + $0x50] sm:$0xff] %vm890_vm1, %v884_v39 }
 0x153   : > { %v871_v44 = vpop.f32.mrf.mxu3 }
 0x154   : > { %v872_v46 = vadd.f32 %v871_v44, %v823_v41 }
 0x155   : > { %v861_v45 = vpop.f32.mrf.mxu2 }
 0x156   : > { %v862_v47 = vadd.f32 %v861_v45, %v813_v42  ;;  %v889_v48 = vadd.f32 %v872_v46, %v374_v43  ;;  %910 = sbr.rel (%p1419_p13) target bundleno = 510 (0x1fe), region = 66 }
 0x158   : > { %v885_v49 = vadd.f32 %v862_v47, %v370_v20  ;;  %906 = vst.msk [vmem:[#allocation2 + $0x78] sm:$0xff] %vm890_vm1, %v889_v48 }
 0x15a   : > { %902 = vst.msk [vmem:[#allocation2 + $0x58] sm:$0xff] %vm890_vm1, %v885_v49 }
 0x15b   : > { %v931_v28 = vld [vmem:[%s2042_s2 + $0x20] sm:$0xff]  ;;  %v929_v50 = vld [vmem:[%s2042_s2 + $0x10] sm:$0xff]  ;;  %v1617_v52 = vmov 0   ;;  %v932_v53 = vld [vmem:[%s2042_s2 + $0x28] sm:$0xff] }
 0x15c   : > { %v927_v51 = vld [vmem:[%s2042_s2] sm:$0xff]  ;;  %1559 = vset.pattern.permute.xlu2 %v1617_v52  ;;  %1558 = vset.pattern.permute.xlu1 %v1617_v52  ;;  %v930_v54 = vld [vmem:[%s2042_s2 + $0x18] sm:$0xff]  ;;  %v928_v55 = vld [vmem:[%s2042_s2 + $0x8] sm:$0xff] }
 0x15d   : > { %1557 = vset.pattern.permute.xlu0 %v1617_v52  ;;  %965 = vperm.xlu2 %1559, %v931_v28   ;;  %v935_v57 = vld [vmem:[%s2042_s2 + $0x40] sm:$0xff]  ;;  %v934_v56 = vld [vmem:[%s2042_s2 + $0x38] sm:$0xff]  ;;  %v933_v58 = vld [vmem:[%s2042_s2 + $0x30] sm:$0xff] }
 0x15e   : > { %955 = vperm.xlu1 %1558, %v929_v50   ;;  %945 = vperm.xlu0 %1557, %v927_v51   ;;  %v938_v59 = vld [vmem:[%s2042_s2 + $0x58] sm:$0xff]  ;;  %v937_v60 = vld [vmem:[%s2042_s2 + $0x50] sm:$0xff]  ;;  %v936_v61 = vld [vmem:[%s2042_s2 + $0x48] sm:$0xff] }
 0x15f   : > { %v941_v62 = vld [vmem:[%s2042_s2 + $0x70] sm:$0xff]  ;;  %v940_v63 = vld [vmem:[%s2042_s2 + $0x68] sm:$0xff]  ;;  %v939_v0 = vld [vmem:[%s2042_s2 + $0x60] sm:$0xff] }
 0x160   : > { %v942_v1 = vld [vmem:[%s2042_s2 + $0x78] sm:$0xff]  ;;  %v915_v2 = vld [vmem:[#allocation2 + $0x20] sm:$0xff]  ;;  %v916_v7 = vld [vmem:[#allocation2 + $0x28] sm:$0xff] }
 0x161   : > { %v919_v11 = vld [vmem:[#allocation2 + $0x40] sm:$0xff]  ;;  %v922_v16 = vld [vmem:[#allocation2 + $0x58] sm:$0xff]  ;;  %v913_v17 = vld [vmem:[#allocation2 + $0x10] sm:$0xff] }
 0x162   : > { %v911_v18 = vld [vmem:[#allocation2] sm:$0xff]  ;;  %v925_v29 = vld [vmem:[#allocation2 + $0x70] sm:$0xff]  ;;  %v914_v30 = vld [vmem:[#allocation2 + $0x18] sm:$0xff] }
 0x163   : > { %v912_v31 = vld [vmem:[#allocation2 + $0x8] sm:$0xff]  ;;  %v918_v40 = vld [vmem:[#allocation2 + $0x38] sm:$0xff]  ;;  %v917_v41 = vld [vmem:[#allocation2 + $0x30] sm:$0xff] }
 0x164   : > { %v921_v47 = vld [vmem:[#allocation2 + $0x50] sm:$0xff]  ;;  %v920_v48 = vld [vmem:[#allocation2 + $0x48] sm:$0xff] }
 0x165   : > { %970 = vperm.xlu2 %1559, %v932_v53  }
 0x166   : > { %960 = vperm.xlu1 %1558, %v930_v54   ;;  %950 = vperm.xlu0 %1557, %v928_v55   ;;  %v924_v54 = vld [vmem:[#allocation2 + $0x68] sm:$0xff]  ;;  %v923_v55 = vld [vmem:[#allocation2 + $0x60] sm:$0xff] }
 0x16d   : > { %985 = vperm.xlu2 %1559, %v935_v57  }
 0x16e   : > { %980 = vperm.xlu1 %1558, %v934_v56   ;;  %975 = vperm.xlu0 %1557, %v933_v58  }
 0x175   : > { %1000 = vperm.xlu2 %1559, %v938_v59  }
 0x176   : > { %995 = vperm.xlu1 %1558, %v937_v60   ;;  %990 = vperm.xlu0 %1557, %v936_v61  }
 0x17d   : > { %1015 = vperm.xlu2 %1559, %v941_v62   ;;  %v926_v62 = vld [vmem:[#allocation2 + $0x78] sm:$0xff] }
 0x17e   : > { %1010 = vperm.xlu1 %1558, %v940_v63   ;;  %1005 = vperm.xlu0 %1557, %v939_v0  }
 0x186   : > { %1020 = vperm.xlu0 %1557, %v942_v1  }
 0x1b7   : > { %v966_v3 = vpop.permute.xlu2 %965 }
 0x1b8   : > { %v1027_v5 = vadd.f32 %v966_v3, %v915_v2 }
 0x1ba   : > { %v1043_v6 = vmax.f32 %v1027_v5, 0.0 }
 0x1bc   : > { %1059 = vst.msk [vmem:[%s1772_s11 + $0x20] sm:$0xff] %vm890_vm1, %v1043_v6 }
 0x1bf   : > { %v971_v8 = vpop.permute.xlu2 %970 }
 0x1c0   : > { %v1028_v9 = vadd.f32 %v971_v8, %v916_v7 }
 0x1c2   : > { %v1044_v10 = vmax.f32 %v1028_v9, 0.0 }
 0x1c4   : > { %1060 = vst.msk [vmem:[%s1772_s11 + $0x28] sm:$0xff] %vm890_vm1, %v1044_v10 }
 0x1c7   : > { %v986_v13 = vpop.permute.xlu2 %985 }
 0x1c8   : > { %v1031_v14 = vadd.f32 %v986_v13, %v919_v11 }
 0x1ca   : > { %v1047_v15 = vmax.f32 %v1031_v14, 0.0 }
 0x1cc   : > { %1063 = vst.msk [vmem:[%s1772_s11 + $0x40] sm:$0xff] %vm890_vm1, %v1047_v15 }
 0x1cf   : > { %v1001_v19 = vpop.permute.xlu2 %1000 }
 0x1d0   : > { %v1034_v21 = vadd.f32 %v1001_v19, %v922_v16  ;;  %v956_v4 = vpop.permute.xlu1 %955  ;;  %v946_v22 = vpop.permute.xlu0 %945 }
 0x1d1   : > { %v1025_v23 = vadd.f32 %v956_v4, %v913_v17  ;;  %v1023_v24 = vadd.f32 %v946_v22, %v911_v18 }
 0x1d2   : > { %v1050_v25 = vmax.f32 %v1034_v21, 0.0 }
 0x1d3   : > { %v1041_v26 = vmax.f32 %v1025_v23, 0.0  ;;  %v1039_v27 = vmax.f32 %v1023_v24, 0.0 }
 0x1d4   : > { %1066 = vst.msk [vmem:[%s1772_s11 + $0x58] sm:$0xff] %vm890_vm1, %v1050_v25 }
 0x1d5   : > { %1057 = vst.msk [vmem:[%s1772_s11 + $0x10] sm:$0xff] %vm890_vm1, %v1041_v26 }
 0x1d6   : > { %1055 = vst.msk [vmem:[%s1772_s11] sm:$0xff] %vm890_vm1, %v1039_v27 }
 0x1d7   : > { %v1016_v32 = vpop.permute.xlu2 %1015 }
 0x1d8   : > { %v1037_v12 = vadd.f32 %v1016_v32, %v925_v29  ;;  %v961_v33 = vpop.permute.xlu1 %960  ;;  %v951_v34 = vpop.permute.xlu0 %950 }
 0x1d9   : > { %v1026_v35 = vadd.f32 %v961_v33, %v914_v30  ;;  %v1024_v36 = vadd.f32 %v951_v34, %v912_v31 }
 0x1da   : > { %v1053_v37 = vmax.f32 %v1037_v12, 0.0 }
 0x1db   : > { %v1042_v39 = vmax.f32 %v1026_v35, 0.0  ;;  %v1040_v38 = vmax.f32 %v1024_v36, 0.0 }
 0x1dc   : > { %1069 = vst.msk [vmem:[%s1772_s11 + $0x70] sm:$0xff] %vm890_vm1, %v1053_v37 }
 0x1dd   : > { %1058 = vst.msk [vmem:[%s1772_s11 + $0x18] sm:$0xff] %vm890_vm1, %v1042_v39 }
 0x1de   : > { %1056 = vst.msk [vmem:[%s1772_s11 + $0x8] sm:$0xff] %vm890_vm1, %v1040_v38 }
 0x1e0   : > { %v981_v42 = vpop.permute.xlu1 %980  ;;  %v976_v43 = vpop.permute.xlu0 %975 }
 0x1e1   : > { %v1030_v44 = vadd.f32 %v981_v42, %v918_v40  ;;  %v1029_v20 = vadd.f32 %v976_v43, %v917_v41 }
 0x1e3   : > { %v1046_v45 = vmax.f32 %v1030_v44, 0.0  ;;  %v1045_v46 = vmax.f32 %v1029_v20, 0.0 }
 0x1e5   : > { %1062 = vst.msk [vmem:[%s1772_s11 + $0x38] sm:$0xff] %vm890_vm1, %v1046_v45 }
 0x1e6   : > { %1061 = vst.msk [vmem:[%s1772_s11 + $0x30] sm:$0xff] %vm890_vm1, %v1045_v46 }
 0x1e8   : > { %v996_v49 = vpop.permute.xlu1 %995  ;;  %v991_v28 = vpop.permute.xlu0 %990 }
 0x1e9   : > { %v1033_v50 = vadd.f32 %v996_v49, %v921_v47  ;;  %v1032_v51 = vadd.f32 %v991_v28, %v920_v48 }
 0x1eb   : > { %v1049_v52 = vmax.f32 %v1033_v50, 0.0  ;;  %v1048_v53 = vmax.f32 %v1032_v51, 0.0 }
 0x1ed   : > { %1065 = vst.msk [vmem:[%s1772_s11 + $0x50] sm:$0xff] %vm890_vm1, %v1049_v52 }
 0x1ee   : > { %1064 = vst.msk [vmem:[%s1772_s11 + $0x48] sm:$0xff] %vm890_vm1, %v1048_v53 }
 0x1f0   : > { %v1011_v57 = vpop.permute.xlu1 %1010  ;;  %v1006_v56 = vpop.permute.xlu0 %1005 }
 0x1f1   : > { %v1036_v58 = vadd.f32 %v1011_v57, %v924_v54  ;;  %v1035_v59 = vadd.f32 %v1006_v56, %v923_v55 }
 0x1f3   : > { %v1052_v60 = vmax.f32 %v1036_v58, 0.0  ;;  %v1051_v61 = vmax.f32 %v1035_v59, 0.0 }
 0x1f5   : > { %1068 = vst.msk [vmem:[%s1772_s11 + $0x68] sm:$0xff] %vm890_vm1, %v1052_v60 }
 0x1f6   : > { %1067 = vst.msk [vmem:[%s1772_s11 + $0x60] sm:$0xff] %vm890_vm1, %v1051_v61 }
 0x1f8   : > { %v1021_v63 = vpop.permute.xlu0 %1020 }
 0x1f9   : > { %v1038_v0 = vadd.f32 %v1021_v63, %v926_v62 }
 0x1fb   : > { %v1054_v1 = vmax.f32 %v1038_v0, 0.0 }
 0x1fd   : > { %1070 = vst.msk [vmem:[%s1772_s11 + $0x78] sm:$0xff] %vm890_vm1, %v1054_v1 }
 0x1fe PF: > { %s13_s18 = sadd.s32 1, %s1614_s18   ;;  %s2044_s12 = smov %s1594_s13 }
 0x1ff   : > { %p10_p0 = scmp.ge.s32.totalorder %s13_s18, 8   ;;  %s2045_s13 = smov %s1687_s23 }
 0x200   : > { %s2046_s14 = smov %s1606_s16  ;;  %s2047_s15 = smov %s1610_s17 }
 0x201   : > { %s2048_s16 = smov %s2051_s19  ;;  %s2049_s17 = smov %s2055_s20 }
 0x202   :  { %12 = sbr.rel (!%p10_p0) target bundleno = 4 (0x4), region = 110 }

// kernel: style_loss.15
= control target key start
LH: loop header
LB: loop body
LE: loop exit
PB: predicated region body
PF: predicated region fallthrough
CT: control target
= control target key end

     0   :  { %vm134_vm0 = vcmask 130048   ;;  %s765_s0 = inlined_call_operand.vmem [shape: bf16[2,128,16], index: 0, kind: input, shape index: {}]   ;;  %s766_s1 = inlined_call_operand.hbm [shape: f32[1,1], index: 1, kind: output, shape index: {}]  }
   0x1   :  { %v669_v0 = vld [vmem:[%s765_s0 + $0x38] sm:$0xff] }
   0x2   :  { %v674_v1 = vld [vmem:[%s765_s0 + $0x78] sm:$0xff]  ;;  %v157_v2 = vsel %vm134_vm0, %v669_v0, 0 }
   0x3   :  { %v318_v3 = vsel %vm134_vm0, %v674_v1, 0  ;;  %159 = vmatpush.bf16.xpose.msra.mxu0 %v157_v2 }
   0x4   :  { %320 = vmatpush.bf16.xpose.msra.mxu1 %v318_v3 }
   0x5   :  { %6 = vsyncpa [#allocation5], 0  ;;  %622 = vmatpush.bf16.xpose.msra.mxu2 %v157_v2  ;;  %630 = vmatpush.bf16.xpose.msra.mxu3 %v318_v3  ;;  %v683_v4 = vld [vmem:[%s765_s0 + $0x30] sm:$0xff]  ;;  %v611_v8 = vld [vmem:[%s765_s0 + $0x28] sm:$0xff]  ;;  %s500_s10 = sshll.u32 %s766_s1, 4  ;;  %s655_s13 = smov [#allocation4]   ;;  %s501_s10 = int_to_ptr.hbm [resolvable:$true] %s500_s10 }
   0x6   :  { %v688_v5 = vld [vmem:[%s765_s0 + $0x70] sm:$0xff]  ;;  %v154_v6 = vsel %vm134_vm0, %v683_v4, 0  ;;  %v619_v9 = vld [vmem:[%s765_s0 + $0x68] sm:$0xff]  ;;  %v151_v10 = vsel %vm134_vm0, %v611_v8, 0  ;;  %v610_v12 = vld [vmem:[%s765_s0 + $0x20] sm:$0xff] }
   0x7   :  { %v315_v7 = vsel %vm134_vm0, %v688_v5, 0  ;;  %v312_v11 = vsel %vm134_vm0, %v619_v9, 0  ;;  %v618_v13 = vld [vmem:[%s765_s0 + $0x60] sm:$0xff]  ;;  %v148_v14 = vsel %vm134_vm0, %v610_v12, 0  ;;  %v609_v16 = vld [vmem:[%s765_s0 + $0x18] sm:$0xff]  ;;  %v608_v20 = vld [vmem:[%s765_s0 + $0x10] sm:$0xff] }
   0x8   :  { %v309_v15 = vsel %vm134_vm0, %v618_v13, 0  ;;  %v617_v17 = vld [vmem:[%s765_s0 + $0x58] sm:$0xff]  ;;  %v145_v18 = vsel %vm134_vm0, %v609_v16, 0  ;;  %v616_v21 = vld [vmem:[%s765_s0 + $0x50] sm:$0xff]  ;;  %v142_v22 = vsel %vm134_vm0, %v608_v20, 0  ;;  %v607_v24 = vld [vmem:[%s765_s0 + $0x8] sm:$0xff] }
   0x9   :  { %v306_v19 = vsel %vm134_vm0, %v617_v17, 0  ;;  %v303_v23 = vsel %vm134_vm0, %v616_v21, 0  ;;  %v615_v25 = vld [vmem:[%s765_s0 + $0x48] sm:$0xff]  ;;  %v139_v26 = vsel %vm134_vm0, %v607_v24, 0  ;;  %v606_v28 = vld [vmem:[%s765_s0] sm:$0xff] }
   0xa   :  { %v300_v27 = vsel %vm134_vm0, %v615_v25, 0  ;;  %v614_v29 = vld [vmem:[%s765_s0 + $0x40] sm:$0xff]  ;;  %v136_v30 = vsel %vm134_vm0, %v606_v28, 0 }
   0xb   :  { %160 = vmatpush.bf16.xpose.msra.mxu0 %v154_v6  ;;  %v297_v31 = vsel %vm134_vm0, %v614_v29, 0 }
   0xc   :  { %321 = vmatpush.bf16.xpose.msra.mxu1 %v315_v7 }
   0xd   :  { %623 = vmatpush.bf16.xpose.msra.mxu2 %v154_v6  ;;  %631 = vmatpush.bf16.xpose.msra.mxu3 %v315_v7 }
  0x13   :  { %161 = vmatpush.bf16.xpose.msra.mxu0 %v151_v10 }
  0x14   :  { %322 = vmatpush.bf16.xpose.msra.mxu1 %v312_v11 }
  0x15   :  { %624 = vmatpush.bf16.xpose.msra.mxu2 %v151_v10  ;;  %632 = vmatpush.bf16.xpose.msra.mxu3 %v312_v11 }
  0x1b   :  { %162 = vmatpush.bf16.xpose.msra.mxu0 %v148_v14 }
  0x1c   :  { %323 = vmatpush.bf16.xpose.msra.mxu1 %v309_v15 }
  0x1d   :  { %625 = vmatpush.bf16.xpose.msra.mxu2 %v148_v14  ;;  %633 = vmatpush.bf16.xpose.msra.mxu3 %v309_v15 }
  0x23   :  { %163 = vmatpush.bf16.xpose.msra.mxu0 %v145_v18 }
  0x24   :  { %324 = vmatpush.bf16.xpose.msra.mxu1 %v306_v19 }
  0x25   :  { %626 = vmatpush.bf16.xpose.msra.mxu2 %v145_v18  ;;  %634 = vmatpush.bf16.xpose.msra.mxu3 %v306_v19 }
  0x2b   :  { %164 = vmatpush.bf16.xpose.msra.mxu0 %v142_v22 }
  0x2c   :  { %325 = vmatpush.bf16.xpose.msra.mxu1 %v303_v23 }
  0x2d   :  { %627 = vmatpush.bf16.xpose.msra.mxu2 %v142_v22  ;;  %635 = vmatpush.bf16.xpose.msra.mxu3 %v303_v23 }
  0x33   :  { %165 = vmatpush.bf16.xpose.msra.mxu0 %v139_v26 }
  0x34   :  { %326 = vmatpush.bf16.xpose.msra.mxu1 %v300_v27 }
  0x35   :  { %628 = vmatpush.bf16.xpose.msra.mxu2 %v139_v26  ;;  %636 = vmatpush.bf16.xpose.msra.mxu3 %v300_v27 }
  0x3b   :  { %166 = vmatpush.bf16.xpose.msra.mxu0 %v136_v30 }
  0x3c   :  { %327 = vmatpush.bf16.xpose.msra.mxu1 %v297_v31 }
  0x3d   :  { %629 = vmatpush.bf16.xpose.msra.mxu2 %v136_v30  ;;  %637 = vmatpush.bf16.xpose.msra.mxu3 %v297_v31 }
  0x42   :  { %558 = vmatmul.msk.bf16.vlgmr.msra.gmra.mxu0 %vm134_vm0, %v606_v28 }
  0x43   :  { %598 = vmatmul.msk.bf16.vlgmr.msra.gmra.mxu1 %vm134_vm0, %v614_v29 }
  0x44   :  { %562 = vmatmul.msk.bf16.vlgmr.msra.gmra.mxu2 %vm134_vm0, %v610_v12  ;;  %602 = vmatmul.msk.bf16.vlgmr.msra.gmra.mxu3 %vm134_vm0, %v618_v13 }
  0x52   :  { %559 = vmatmul.msk.bf16.gmra.mxu0 %vm134_vm0, %v607_v24 }
  0x53   :  { %599 = vmatmul.msk.bf16.gmra.mxu1 %vm134_vm0, %v615_v25 }
  0x54   :  { %563 = vmatmul.msk.bf16.gmra.mxu2 %vm134_vm0, %v611_v8  ;;  %603 = vmatmul.msk.bf16.gmra.mxu3 %vm134_vm0, %v619_v9 }
  0x62   :  { %560 = vmatmul.msk.bf16.gmra.mxu0 %vm134_vm0, %v608_v20 }
  0x63   :  { %600 = vmatmul.msk.bf16.gmra.mxu1 %vm134_vm0, %v616_v21 }
  0x64   :  { %564 = vmatmul.msk.bf16.gmra.mxu2 %vm134_vm0, %v683_v4  ;;  %604 = vmatmul.msk.bf16.gmra.mxu3 %vm134_vm0, %v688_v5 }
  0x72   :  { %561 = vmatmul.msk.bf16.gmra.mxu0 %vm134_vm0, %v609_v16 }
  0x73   :  { %601 = vmatmul.msk.bf16.gmra.mxu1 %vm134_vm0, %v617_v17 }
  0x74   :  { %565 = vmatmul.msk.bf16.gmra.mxu2 %vm134_vm0, %v669_v0  ;;  %605 = vmatmul.msk.bf16.gmra.mxu3 %vm134_vm0, %v674_v1 }
  0xbf   :  { %v168_v32 = vpop.f32.mrf.mxu0 }
  0xc0   :  { %v329_v33 = vpop.f32.mrf.mxu1 }
  0xc1   :  { %v436_v55 = vsub.f32 %v168_v32, %v329_v33 }
  0xc3   :  { %v452_v59 = vmul.f32 %v436_v55, %v436_v55 }
  0xc7   :  { %v188_v34 = vpop.f32.mrf.mxu2  ;;  %v349_v35 = vpop.f32.mrf.mxu3 }
  0xc8   :  { %v170_v36 = vpop.f32.mrf.mxu0  ;;  %v331_v37 = vpop.f32.mrf.mxu1  ;;  %v444_v14 = vsub.f32 %v188_v34, %v349_v35 }
  0xc9   :  { %v437_v54 = vsub.f32 %v170_v36, %v331_v37 }
  0xca   :  { %v460_v22 = vmul.f32 %v444_v14, %v444_v14 }
  0xcb   :  { %v453_v57 = vmul.f32 %v437_v54, %v437_v54 }
  0xcd   :  { %v468_v2 = vadd.f32 %v453_v57, %v452_v59 }
  0xcf   :  { %v190_v38 = vpop.f32.mrf.mxu2  ;;  %v351_v39 = vpop.f32.mrf.mxu3 }
  0xd0   :  { %v173_v40 = vpop.f32.mrf.mxu0  ;;  %v334_v41 = vpop.f32.mrf.mxu1  ;;  %v445_v19 = vsub.f32 %v190_v38, %v351_v39 }
  0xd1   :  { %v438_v56 = vsub.f32 %v173_v40, %v334_v41 }
  0xd2   :  { %v461_v25 = vmul.f32 %v445_v19, %v445_v19 }
  0xd3   :  { %v454_v60 = vmul.f32 %v438_v56, %v438_v56 }
  0xd5   :  { %v469_v5 = vadd.f32 %v468_v2, %v454_v60 }
  0xd7   :  { %v193_v42 = vpop.f32.mrf.mxu2  ;;  %v354_v43 = vpop.f32.mrf.mxu3 }
  0xd8   :  { %v175_v44 = vpop.f32.mrf.mxu0  ;;  %v336_v45 = vpop.f32.mrf.mxu1  ;;  %v446_v23 = vsub.f32 %v193_v42, %v354_v43 }
  0xd9   :  { %v439_v58 = vsub.f32 %v175_v44, %v336_v45 }
  0xda   :  { %v462_v28 = vmul.f32 %v446_v23, %v446_v23 }
  0xdb   :  { %v455_v3 = vmul.f32 %v439_v58, %v439_v58 }
  0xdd   :  { %v470_v8 = vadd.f32 %v469_v5, %v455_v3 }
  0xdf   :  { %v195_v46 = vpop.f32.mrf.mxu2  ;;  %v356_v47 = vpop.f32.mrf.mxu3 }
  0xe0   :  { %v178_v48 = vpop.f32.mrf.mxu0  ;;  %v339_v49 = vpop.f32.mrf.mxu1  ;;  %v447_v26 = vsub.f32 %v195_v46, %v356_v47 }
  0xe1   :  { %v440_v61 = vsub.f32 %v178_v48, %v339_v49 }
  0xe2   :  { %v463_v31 = vmul.f32 %v447_v26, %v447_v26 }
  0xe3   :  { %v456_v6 = vmul.f32 %v440_v61, %v440_v61 }
  0xe5   :  { %v471_v10 = vadd.f32 %v470_v8, %v456_v6 }
  0xe7   :  { %v198_v50 = vpop.f32.mrf.mxu2  ;;  %v359_v51 = vpop.f32.mrf.mxu3 }
  0xe8   :  { %v180_v52 = vpop.f32.mrf.mxu0  ;;  %v341_v53 = vpop.f32.mrf.mxu1  ;;  %v448_v29 = vsub.f32 %v198_v50, %v359_v51 }
  0xe9   :  { %v441_v4 = vsub.f32 %v180_v52, %v341_v53 }
  0xea   :  { %v464_v36 = vmul.f32 %v448_v29, %v448_v29 }
  0xeb   :  { %v457_v9 = vmul.f32 %v441_v4, %v441_v4 }
  0xed   :  { %v472_v15 = vadd.f32 %v471_v10, %v457_v9 }
  0xef   :  { %v200_v62 = vpop.f32.mrf.mxu2  ;;  %v361_v63 = vpop.f32.mrf.mxu3 }
  0xf0   :  { %v183_v0 = vpop.f32.mrf.mxu0  ;;  %v344_v1 = vpop.f32.mrf.mxu1  ;;  %v449_v32 = vsub.f32 %v200_v62, %v361_v63 }
  0xf1   :  { %v442_v7 = vsub.f32 %v183_v0, %v344_v1 }
  0xf2   :  { %v465_v38 = vmul.f32 %v449_v32, %v449_v32 }
  0xf3   :  { %v458_v11 = vmul.f32 %v442_v7, %v442_v7 }
  0xf5   :  { %v473_v20 = vadd.f32 %v472_v15, %v458_v11 }
  0xf7   :  { %v203_v17 = vpop.f32.mrf.mxu2  ;;  %v364_v18 = vpop.f32.mrf.mxu3 }
  0xf8   :  { %v185_v12 = vpop.f32.mrf.mxu0  ;;  %v346_v13 = vpop.f32.mrf.mxu1  ;;  %v450_v37 = vsub.f32 %v203_v17, %v364_v18 }
  0xf9   :  { %v443_v16 = vsub.f32 %v185_v12, %v346_v13 }
  0xfa   :  { %v466_v44 = vmul.f32 %v450_v37, %v450_v37 }
  0xfb   :  { %v459_v21 = vmul.f32 %v443_v16, %v443_v16 }
  0xfd   :  { %v474_v24 = vadd.f32 %v473_v20, %v459_v21 }
  0xff   :  { %v475_v27 = vadd.f32 %v474_v24, %v460_v22  ;;  %v205_v34 = vpop.f32.mrf.mxu2  ;;  %v366_v35 = vpop.f32.mrf.mxu3 }
 0x100   :  { %v451_v39 = vsub.f32 %v205_v34, %v366_v35 }
 0x101   :  { %v476_v30 = vadd.f32 %v475_v27, %v461_v25 }
 0x102   :  { %v467_v43 = vmul.f32 %v451_v39, %v451_v39 }
 0x103   :  { %v477_v33 = vadd.f32 %v476_v30, %v462_v28 }
 0x105   :  { %v478_v40 = vadd.f32 %v477_v33, %v463_v31 }
 0x107   :  { %v479_v41 = vadd.f32 %v478_v40, %v464_v36 }
 0x109   :  { %v480_v42 = vadd.f32 %v479_v41, %v465_v38 }
 0x10b   :  { %v481_v45 = vadd.f32 %v480_v42, %v466_v44 }
 0x10d   :  { %v482_v46 = vadd.f32 %v481_v45, %v467_v43 }
 0x10f   :  { %483 = vadd.xlane.f32.xlu0 %v482_v46 }
 0x182   :  { %v484_v47 = vpop.xlane.xlu0 %483 }
 0x183   :  { %v485_v48 = vrot.slane %v484_v47, 4 }
 0x185   :  { %v486_v49 = vadd.f32 %v485_v48, %v484_v47 }
 0x187   :  { %v487_v50 = vrot.slane %v486_v49, 2 }
 0x189   :  { %v488_v51 = vadd.f32 %v487_v50, %v486_v49 }
 0x18b   :  { %v489_v52 = vrot.slane %v488_v51, 1 }
 0x18d   :  { %v490_v53 = vadd.f32 %v489_v52, %v488_v51 }
 0x18f   :  { %638 = vpush %v490_v53 }
 0x1c0   :  { %s639_s11 = spop %638 }
 0x1c1   :  { %s492_s12 = smul.f32 9.094947e-13, %s639_s11 }
 0x1c3   :  { %494 = sst [smem:[#allocation4]] %s492_s12 }
 0x1c4   :  { %503 = dma.smem_to_hbm %s655_s13, 16, %s501_s10, [#allocation5]  }
 0x1c5   :  { %653 = dma.done.wait [#allocation5], 16  }
 0x1c6   :  { %654 = vsyncadd [#allocation5], 4294967280 }
 0x1c7   :  { %508 = sfence }
 0x1c8   :  { %509 = vsyncpa [#allocation5], 1 }

</bundles_post_ra>
